<compile_context>
chip_gen: v5e
topology: v5e:2x2
jax: 0.10.0
libtpu: 0.0.40
codegen_flags: <defaults>
</compile_context>

<pallas_src>
import functools

import jax
import jax.numpy as jnp
from jax.experimental import pallas as pl
from jax.experimental.pallas import tpu as pltpu

_VMEM_LIMIT = 32 * 1024 * 1024  # fits default scoped VMEM on v5e/v6e/v7x


def _prefers_bf16_mxu():
    """bf16 MXU operands (f32 accumulate) on v6e/v7x; keep f32 on v5e & older."""
    try:
        kind = jax.devices()[0].device_kind.lower()
    except Exception:
        return False
    return any(tag in kind for tag in ("v6", "v7", "tpu7", "7x"))


def _pick_row_tiles(n, ho, wo):
    """Split each image's output rows so the 'parallel' grid has >= 4 steps
    (>= 2 per TensorCore on v7x) while keeping output blocks lane-dense
    (multiples of 128 lanes -> unmasked vst)."""
    rt = 1
    for cand in (2, 4, 8):
        if n * rt >= 4:
            break
        if ho % cand == 0 and ((ho // cand) * wo) % 128 == 0:
            rt = cand
    return rt


# ------------------------------ Pallas kernels ------------------------------ #

def _bn_stats_kernel(x_ref, sum_ref, sq_ref):
    """Per-channel sum / sum-of-squares, accumulated over an 'arbitrary' grid.

    x_ref : (C, H*W) one image, lane-dense.  Outputs: (C, 1) resident.
    """
    @pl.when(pl.program_id(0) == 0)
    def _():
        sum_ref[...] = jnp.zeros_like(sum_ref)
        sq_ref[...] = jnp.zeros_like(sq_ref)

    x = x_ref[...].astype(jnp.float32)
    sum_ref[...] += jnp.sum(x, axis=1, keepdims=True)
    sq_ref[...] += jnp.sum(x * x, axis=1, keepdims=True)


def _conv_bn_relu_kernel(sum_ref, sq_ref, g_ref, b_ref, x_ref, w_ref, *rest,
                         KH, KW, stride, pad, H, W, Wo, ho_t, m_count, eps,
                         mm_dtype, has_shortcut, has_residual):
    """Fused BN(batch stats) -> ReLU -> pad-in-VMEM -> KHxKW conv
    [+ fused 1x1 shortcut conv] [+ fused residual add] for one image row-tile.

    x_ref : (Ci, H*W)  raw (un-normalized) image, lane-dense
    w_ref : (KH*KW, Co, Ci) per-tap filters (already exp-weighted)
    rest  : [wsc_ref (1,Cs,Ci)] [res_ref (Co,ho_t*Wo)] o_ref (Co,ho_t*Wo)
            [osc_ref (Cs,ho_t*Wo)] pad_ref (Ci,Hp,Wp) scratch
    """
    idx = 0
    wsc_ref = None
    res_ref = None
    if has_shortcut:
        wsc_ref = rest[idx]; idx += 1
    if has_residual:
        res_ref = rest[idx]; idx += 1
    o_ref = rest[idx]; idx += 1
    osc_ref = rest[idx] if has_shortcut else None
    pad_ref = rest[-1]

    r0 = pl.program_id(1) * ho_t            # first output row of this tile
    ci = x_ref.shape[0]
    co = o_ref.shape[0]

    # --- BN scale/shift from batch statistics (tiny per-channel math) ------- #
    inv_m = 1.0 / m_count
    mean = sum_ref[...] * inv_m                                   # (Ci, 1)
    var = jnp.maximum(sq_ref[...] * inv_m - mean * mean, 0.0)     # biased var
    scale = g_ref[...] * jax.lax.rsqrt(var + eps)
    shift = b_ref[...] - mean * scale

    # --- fused BN apply + ReLU on the lane-dense (Ci, H*W) slab -------------- #
    a = jnp.maximum(x_ref[...].astype(jnp.float32) * scale + shift, 0.0)

    # --- zero padding done in VMEM (no extra HBM pass) ----------------------- #
    if pad > 0:
        pad_ref[...] = jnp.zeros_like(pad_ref)
        pad_ref[:, pad:pad + H, pad:pad + W] = a.reshape(ci, H, W)
    else:
        pad_ref[...] = a.reshape(ci, H, W)

    def tap_slice(row_start, col_start):
        if stride == 1:
            return pad_ref[:, pl.ds(row_start, ho_t), pl.ds(col_start, Wo)]
        return pad_ref[:, pl.ds(row_start, ho_t, stride),
                       pl.ds(col_start, Wo, stride)]

    # --- KH*KW accumulating (Co, Ci) @ (Ci, ho_t*Wo) matmuls (no im2col) ----- #
    acc = jnp.zeros((co, ho_t * Wo), jnp.float32)
    t = 0
    for i in range(KH):
        for j in range(KW):
            tap = tap_slice(i + r0 * stride, j).reshape(ci, ho_t * Wo)
            acc = acc + jnp.dot(w_ref[t].astype(mm_dtype), tap.astype(mm_dtype),
                                preferred_element_type=jnp.float32)
            t += 1
    if has_residual:
        acc = acc + res_ref[...].astype(jnp.float32)
    o_ref[...] = acc.astype(o_ref.dtype)

    # --- fused 1x1 (strided) shortcut conv on the same activation ------------ #
    if has_shortcut:
        tap = tap_slice(pad + r0 * stride, pad).reshape(ci, ho_t * Wo)
        osc_ref[...] = jnp.dot(wsc_ref[0].astype(mm_dtype), tap.astype(mm_dtype),
                               preferred_element_type=jnp.float32
                               ).astype(osc_ref.dtype)


# ------------------------------ JAX wrappers -------------------------------- #

def bn_batch_stats(xf):
    """Per-channel sum / sum-of-squares over an (N, C, L) activation slab."""
    N, C, L = xf.shape
    return pl.pallas_call(
        _bn_stats_kernel,
        grid=(N,),
        in_specs=[pl.BlockSpec((None, C, L), lambda n: (n, 0, 0))],
        out_specs=(pl.BlockSpec((C, 1), lambda n: (0, 0)),
                   pl.BlockSpec((C, 1), lambda n: (0, 0))),
        out_shape=(jax.ShapeDtypeStruct((C, 1), jnp.float32),
                   jax.ShapeDtypeStruct((C, 1), jnp.float32)),
        compiler_params=pltpu.CompilerParams(
            dimension_semantics=("arbitrary",),
            vmem_limit_bytes=_VMEM_LIMIT),
        cost_estimate=pl.CostEstimate(flops=3 * N * C * L, transcendentals=0,
                                      bytes_accessed=4 * (N * C * L + 2 * C)),
    )(xf)


def _exp_weight_transform(w, exp_weight, t):
    # Hoisted Conv2dExpWeighted transform (tiny, GLOBAL max like torch.max).
    if not exp_weight:
        return w
    we = jnp.exp(jnp.abs(w) * t)
    we = we / jnp.max(we)
    return we * w


def conv_bn_relu_ew(xf, bn_sum, bn_sq, gamma, beta, w_oihw, *, stride, pad,
                    H, W, m_count, shortcut_w=None, residual=None,
                    eps=1e-5, mm_dtype=jnp.float32):
    """Fused relu(batchnorm(x)) -> conv2d(w) [+ 1x1 shortcut conv]
    [+ residual add].  Activations use the lane-dense (N, C, H*W) layout."""
    N, Ci, HW = xf.shape
    assert HW == H * W
    Co, Ci2, KH, KW = w_oihw.shape
    assert Ci2 == Ci
    Ho = (H + 2 * pad - KH) // stride + 1
    Wo = (W + 2 * pad - KW) // stride + 1
    Hp, Wp = H + 2 * pad, W + 2 * pad
    rt = _pick_row_tiles(N, Ho, Wo)
    ho_t = Ho // rt

    w_taps = jnp.transpose(w_oihw, (2, 3, 0, 1)).reshape(KH * KW, Co, Ci)
    w_taps = w_taps.astype(mm_dtype)
    g2 = gamma.reshape(Ci, 1).astype(jnp.float32)
    b2 = beta.reshape(Ci, 1).astype(jnp.float32)

    has_sc = shortcut_w is not None
    has_res = residual is not None

    cvec = pl.BlockSpec((Ci, 1), lambda n, r: (0, 0))
    in_specs = [cvec, cvec, cvec, cvec,
                pl.BlockSpec((None, Ci, H * W), lambda n, r: (n, 0, 0)),
                pl.BlockSpec((KH * KW, Co, Ci), lambda n, r: (0, 0, 0))]
    args = [bn_sum, bn_sq, g2, b2, xf, w_taps]

    Cs = 0
    if has_sc:
        Cs = shortcut_w.shape[0]
        wsc = shortcut_w.reshape(Cs, Ci)[None].astype(mm_dtype)    # (1, Cs, Ci)
        in_specs.append(pl.BlockSpec((1, Cs, Ci), lambda n, r: (0, 0, 0)))
        args.append(wsc)
    if has_res:
        in_specs.append(pl.BlockSpec((None, Co, ho_t * Wo), lambda n, r: (n, 0, r)))
        args.append(residual)

    out_shape = [jax.ShapeDtypeStruct((N, Co, Ho * Wo), xf.dtype)]
    out_specs = [pl.BlockSpec((None, Co, ho_t * Wo), lambda n, r: (n, 0, r))]
    if has_sc:
        out_shape.append(jax.ShapeDtypeStruct((N, Cs, Ho * Wo), xf.dtype))
        out_specs.append(pl.BlockSpec((None, Cs, ho_t * Wo), lambda n, r: (n, 0, r)))

    kern = functools.partial(
        _conv_bn_relu_kernel, KH=KH, KW=KW, stride=stride, pad=pad, H=H, W=W,
        Wo=Wo, ho_t=ho_t, m_count=float(m_count), eps=eps, mm_dtype=mm_dtype,
        has_shortcut=has_sc, has_residual=has_res)

    flops = 2 * N * Ho * Wo * Co * KH * KW * Ci + 4 * N * Ci * H * W
    if has_sc:
        flops += 2 * N * Ho * Wo * Cs * Ci
    bytes_accessed = (4 * (N * Ci * H * W + N * Co * Ho * Wo
                           + (N * Cs * Ho * Wo if has_sc else 0)
                           + (N * Co * Ho * Wo if has_res else 0))
                      + int(w_taps.size) * jnp.dtype(mm_dtype).itemsize
                      + 16 * Ci)

    out = pl.pallas_call(
        kern,
        grid=(N, rt),
        in_specs=in_specs,
        out_specs=tuple(out_specs) if has_sc else out_specs[0],
        out_shape=tuple(out_shape) if has_sc else out_shape[0],
        scratch_shapes=[pltpu.VMEM((Ci, Hp, Wp), jnp.float32)],
        compiler_params=pltpu.CompilerParams(
            dimension_semantics=("parallel", "parallel"),
            vmem_limit_bytes=_VMEM_LIMIT),
        cost_estimate=pl.CostEstimate(flops=flops, transcendentals=N * rt * Ci,
                                      bytes_accessed=bytes_accessed),
    )(*args)
    return out


def preact_block_ew(x_nchw, params, *, stride=1, exp_weight=False, t=1.0,
                    eps=1e-5, mm_dtype=None):
    """Forward pass of PreActBlockew.  Input/output NCHW (no layout transposes;
    kernels operate directly on the lane-dense (N, C, H*W) view)."""
    if mm_dtype is None:
        mm_dtype = jnp.bfloat16 if _prefers_bf16_mxu() else jnp.float32
    N, C, H, W = x_nchw.shape
    xf = x_nchw.reshape(N, C, H * W)                       # free reshape

    # BN1 statistics (single tiled reduction pass over x).
    s1, q1 = bn_batch_stats(xf)

    w1 = _exp_weight_transform(params["conv1_w"], exp_weight, t)
    has_sc = "shortcut_w" in params

    # Fused BN1 + ReLU -> conv1 (3x3)  [+ 1x1 shortcut conv on same activation].
    if has_sc:
        wsc = _exp_weight_transform(params["shortcut_w"], exp_weight, t)
        y1, shortcut = conv_bn_relu_ew(
            xf, s1, q1, params["bn1_gamma"], params["bn1_beta"], w1,
            stride=stride, pad=1, H=H, W=W, m_count=N * H * W,
            shortcut_w=wsc, eps=eps, mm_dtype=mm_dtype)
    else:
        y1 = conv_bn_relu_ew(
            xf, s1, q1, params["bn1_gamma"], params["bn1_beta"], w1,
            stride=stride, pad=1, H=H, W=W, m_count=N * H * W,
            eps=eps, mm_dtype=mm_dtype)
        shortcut = xf                                      # identity shortcut

    Ho = (H + 2 - 3) // stride + 1
    Wo = (W + 2 - 3) // stride + 1

    # BN2 statistics over y1.
    s2, q2 = bn_batch_stats(y1)

    # Fused BN2 + ReLU -> conv2 (3x3) -> + shortcut (residual fused in-kernel).
    w2 = _exp_weight_transform(params["conv2_w"], exp_weight, t)
    out = conv_bn_relu_ew(
        y1, s2, q2, params["bn2_gamma"], params["bn2_beta"], w2,
        stride=1, pad=1, H=Ho, W=Wo, m_count=N * Ho * Wo,
        residual=shortcut, eps=eps, mm_dtype=mm_dtype)
    # TODO(synk): BN running_mean/var (momentum) buffer updates are a training
    # side effect of nn.BatchNorm2d and are not produced here.
    return out.reshape(N, w2.shape[0], Ho, Wo)


# --------------------- deterministic parameter creation --------------------- #

def init_params(key, in_planes, planes, stride, expansion=1):
    ks = jax.random.split(key, 7)
    p = {
        "bn1_gamma": 1.0 + 0.1 * jax.random.normal(ks[0], (in_planes,), jnp.float32),
        "bn1_beta": 0.1 * jax.random.normal(ks[1], (in_planes,), jnp.float32),
        "conv1_w": 0.2 * jax.random.normal(ks[2], (planes, in_planes, 3, 3), jnp.float32),
        "bn2_gamma": 1.0 + 0.1 * jax.random.normal(ks[3], (planes,), jnp.float32),
        "bn2_beta": 0.1 * jax.random.normal(ks[4], (planes,), jnp.float32),
        "conv2_w": 0.2 * jax.random.normal(ks[5], (planes, planes, 3, 3), jnp.float32),
    }
    if stride != 1 or in_planes != expansion * planes:
        p["shortcut_w"] = 0.2 * jax.random.normal(
            ks[6], (expansion * planes, in_planes, 1, 1), jnp.float32)
    return p


# --------------------------- pure-JAX reference ----------------------------- #

def _ref_forward(x_nchw, params, *, stride, exp_weight, t, eps=1e-5):
    def bn_relu_ref(x, g, b):
        mean = jnp.mean(x, axis=(0, 2, 3), keepdims=True)
        var = jnp.mean(jnp.square(x - mean), axis=(0, 2, 3), keepdims=True)
        y = (x - mean) / jnp.sqrt(var + eps) * g.reshape(1, -1, 1, 1) + b.reshape(1, -1, 1, 1)
        return jnp.maximum(y, 0.0)

    def conv_ref(x, w, s, p):
        if exp_weight:
            we = jnp.exp(jnp.abs(w) * t)
            we = we / jnp.max(we)
            w = we * w
        return jax.lax.conv_general_dilated(
            x, w, (s, s), ((p, p), (p, p)),
            dimension_numbers=("NCHW", "OIHW", "NCHW"))

    out = bn_relu_ref(x_nchw, params["bn1_gamma"], params["bn1_beta"])
    shortcut = (conv_ref(out, params["shortcut_w"], stride, 0)
                if "shortcut_w" in params else x_nchw)
    out = conv_ref(out, params["conv1_w"], stride, 1)
    out = bn_relu_ref(out, params["bn2_gamma"], params["bn2_beta"])
    out = conv_ref(out, params["conv2_w"], 1, 1)
    return out + shortcut


# ----------------------------------- main ----------------------------------- #

if __name__ == "__main__":
    in_planes, planes, stride = 4, 8, 1        # shortcut conv present (4 != 8)
    exp_weight, t = True, 1.0

    key = jax.random.PRNGKey(0)
    kx, kp = jax.random.split(key)
    x = jax.random.normal(kx, (2, in_planes, 16, 16), jnp.float32)
    params = init_params(kp, in_planes, planes, stride)

    mm_dtype = jnp.bfloat16 if _prefers_bf16_mxu() else jnp.float32
    fwd = jax.jit(functools.partial(preact_block_ew, stride=stride,
                                    exp_weight=exp_weight, t=t,
                                    mm_dtype=mm_dtype))
    y = fwd(x, params)
    jax.block_until_ready(y)

    assert y.shape == (2, planes, 16, 16), y.shape
    y_ref = _ref_forward(x, params, stride=stride, exp_weight=exp_weight, t=t)
    tol = 1e-1 if mm_dtype == jnp.bfloat16 else 2e-3
    max_err = float(jnp.max(jnp.abs(y - y_ref)))
    assert max_err < tol, f"mismatch vs reference: {max_err}"
    print("KERNEL_OK")
</pallas_src>

<mosaic_0001>
module attributes {stable_mosaic.version = 11 : i64} {
  func.func @_bn_stats_kernel(%arg0: i32, %arg1: memref<1x4x256xf32, #tpu.memory_space<vmem>>, %arg2: memref<4x1xf32, #tpu.memory_space<vmem>>, %arg3: memref<4x1xf32, #tpu.memory_space<vmem>>) attributes {dimension_semantics = [#tpu.dimension_semantics<arbitrary>], iteration_bounds = array<i64: 2>, scalar_prefetch = 0 : i64, scratch_operands = 0 : i64, tpu.core_type = #tpu.core_type<tc>, window_params = [{transform_indices = @transform_0, window_bounds = array<i64: 1, 4, 256>}, {pipeline_mode = #tpu.pipeline_mode<synchronous>, transform_indices = @transform_1, window_bounds = array<i64: 4, 1>}, {pipeline_mode = #tpu.pipeline_mode<synchronous>, transform_indices = @transform_2, window_bounds = array<i64: 4, 1>}]} {
    %c0_i32 = arith.constant 0 : i32
    %0 = arith.cmpi eq, %arg0, %c0_i32 : i32
    %1 = arith.extui %0 : i1 to i32
    %c0_i32_0 = arith.constant 0 : i32
    %2 = arith.cmpi ne, %1, %c0_i32_0 : i32
    scf.if %2 {
      %cst_12 = arith.constant 0.000000e+00 : f32
      %16 = vector.broadcast %cst_12 : f32 to vector<4x1xf32>
      %c0_13 = arith.constant 0 : index
      %c0_14 = arith.constant 0 : index
      %17 = vector.load %arg2[%c0_13, %c0_14] : memref<4x1xf32, #tpu.memory_space<vmem>>, vector<4x1xf32>
      tpu.vector_store %arg2[%c0_13, %c0_14], %16 {strides = array<i32>} : memref<4x1xf32, #tpu.memory_space<vmem>>, vector<4x1xf32>,
      %cst_15 = arith.constant 0.000000e+00 : f32
      %18 = vector.broadcast %cst_15 : f32 to vector<4x1xf32>
      %c0_16 = arith.constant 0 : index
      %c0_17 = arith.constant 0 : index
      %19 = vector.load %arg3[%c0_16, %c0_17] : memref<4x1xf32, #tpu.memory_space<vmem>>, vector<4x1xf32>
      tpu.vector_store %arg3[%c0_16, %c0_17], %18 {strides = array<i32>} : memref<4x1xf32, #tpu.memory_space<vmem>>, vector<4x1xf32>,
    } else {
    }
    %c0 = arith.constant 0 : index
    %c0_1 = arith.constant 0 : index
    %c0_2 = arith.constant 0 : index
    %3 = vector.load %arg1[%c0, %c0_1, %c0_2] : memref<1x4x256xf32, #tpu.memory_space<vmem>>, vector<1x4x256xf32>
    %4 = vector.shape_cast %3 : vector<1x4x256xf32> to vector<4x256xf32>
    %c0_3 = arith.constant 0 : index
    %c0_4 = arith.constant 0 : index
    %5 = vector.load %arg2[%c0_3, %c0_4] : memref<4x1xf32, #tpu.memory_space<vmem>>, vector<4x1xf32>
    %cst = arith.constant dense<0.000000e+00> : vector<4xf32>
    %6 = vector.multi_reduction <add>, %4, %cst [1] : vector<4x256xf32> to vector<4xf32>
    %7 = vector.shape_cast %6 : vector<4xf32> to vector<4x1xf32>
    %8 = arith.addf %5, %7 : vector<4x1xf32>
    %c0_5 = arith.constant 0 : index
    %c0_6 = arith.constant 0 : index
    %9 = vector.load %arg2[%c0_5, %c0_6] : memref<4x1xf32, #tpu.memory_space<vmem>>, vector<4x1xf32>
    tpu.vector_store %arg2[%c0_5, %c0_6], %8 {strides = array<i32>} : memref<4x1xf32, #tpu.memory_space<vmem>>, vector<4x1xf32>,
    %c0_7 = arith.constant 0 : index
    %c0_8 = arith.constant 0 : index
    %10 = vector.load %arg3[%c0_7, %c0_8] : memref<4x1xf32, #tpu.memory_space<vmem>>, vector<4x1xf32>
    %11 = arith.mulf %4, %4 : vector<4x256xf32>
    %cst_9 = arith.constant dense<0.000000e+00> : vector<4xf32>
    %12 = vector.multi_reduction <add>, %11, %cst_9 [1] : vector<4x256xf32> to vector<4xf32>
    %13 = vector.shape_cast %12 : vector<4xf32> to vector<4x1xf32>
    %14 = arith.addf %10, %13 : vector<4x1xf32>
    %c0_10 = arith.constant 0 : index
    %c0_11 = arith.constant 0 : index
    %15 = vector.load %arg3[%c0_10, %c0_11] : memref<4x1xf32, #tpu.memory_space<vmem>>, vector<4x1xf32>
    tpu.vector_store %arg3[%c0_10, %c0_11], %14 {strides = array<i32>} : memref<4x1xf32, #tpu.memory_space<vmem>>, vector<4x1xf32>,
    return
  }
  func.func @transform_0(%arg0: i32) -> (i32, i32, i32) {
    %c0_i32 = arith.constant 0 : i32
    %c0_i32_0 = arith.constant 0 : i32
    %c0_i32_1 = arith.constant 0 : i32
    return %arg0, %c0_i32, %c0_i32_0 : i32, i32, i32
  }
  func.func @transform_1(%arg0: i32) -> (i32, i32) {
    %c0_i32 = arith.constant 0 : i32
    %c0_i32_0 = arith.constant 0 : i32
    %c0_i32_1 = arith.constant 0 : i32
    return %c0_i32, %c0_i32_0 : i32, i32
  }
  func.func @transform_2(%arg0: i32) -> (i32, i32) {
    %c0_i32 = arith.constant 0 : i32
    %c0_i32_0 = arith.constant 0 : i32
    %c0_i32_1 = arith.constant 0 : i32
    return %c0_i32, %c0_i32_0 : i32, i32
  }
}

module attributes {stable_mosaic.version = 11 : i64} {
  func.func @_bn_stats_kernel(%arg0: i32, %arg1: memref<1x8x256xf32, #tpu.memory_space<vmem>>, %arg2: memref<8x1xf32, #tpu.memory_space<vmem>>, %arg3: memref<8x1xf32, #tpu.memory_space<vmem>>) attributes {dimension_semantics = [#tpu.dimension_semantics<arbitrary>], iteration_bounds = array<i64: 2>, scalar_prefetch = 0 : i64, scratch_operands = 0 : i64, tpu.core_type = #tpu.core_type<tc>, window_params = [{transform_indices = @transform_0, window_bounds = array<i64: 1, 8, 256>}, {pipeline_mode = #tpu.pipeline_mode<synchronous>, transform_indices = @transform_1, window_bounds = array<i64: 8, 1>}, {pipeline_mode = #tpu.pipeline_mode<synchronous>, transform_indices = @transform_2, window_bounds = array<i64: 8, 1>}]} {
    %c0_i32 = arith.constant 0 : i32
    %0 = arith.cmpi eq, %arg0, %c0_i32 : i32
    %1 = arith.extui %0 : i1 to i32
    %c0_i32_0 = arith.constant 0 : i32
    %2 = arith.cmpi ne, %1, %c0_i32_0 : i32
    scf.if %2 {
      %cst_12 = arith.constant 0.000000e+00 : f32
      %16 = vector.broadcast %cst_12 : f32 to vector<8x1xf32>
      %c0_13 = arith.constant 0 : index
      %c0_14 = arith.constant 0 : index
      %17 = vector.load %arg2[%c0_13, %c0_14] : memref<8x1xf32, #tpu.memory_space<vmem>>, vector<8x1xf32>
      tpu.vector_store %arg2[%c0_13, %c0_14], %16 {strides = array<i32>} : memref<8x1xf32, #tpu.memory_space<vmem>>, vector<8x1xf32>,
      %cst_15 = arith.constant 0.000000e+00 : f32
      %18 = vector.broadcast %cst_15 : f32 to vector<8x1xf32>
      %c0_16 = arith.constant 0 : index
      %c0_17 = arith.constant 0 : index
      %19 = vector.load %arg3[%c0_16, %c0_17] : memref<8x1xf32, #tpu.memory_space<vmem>>, vector<8x1xf32>
      tpu.vector_store %arg3[%c0_16, %c0_17], %18 {strides = array<i32>} : memref<8x1xf32, #tpu.memory_space<vmem>>, vector<8x1xf32>,
    } else {
    }
    %c0 = arith.constant 0 : index
    %c0_1 = arith.constant 0 : index
    %c0_2 = arith.constant 0 : index
    %3 = vector.load %arg1[%c0, %c0_1, %c0_2] : memref<1x8x256xf32, #tpu.memory_space<vmem>>, vector<1x8x256xf32>
    %4 = vector.shape_cast %3 : vector<1x8x256xf32> to vector<8x256xf32>
    %c0_3 = arith.constant 0 : index
    %c0_4 = arith.constant 0 : index
    %5 = vector.load %arg2[%c0_3, %c0_4] : memref<8x1xf32, #tpu.memory_space<vmem>>, vector<8x1xf32>
    %cst = arith.constant dense<0.000000e+00> : vector<8xf32>
    %6 = vector.multi_reduction <add>, %4, %cst [1] : vector<8x256xf32> to vector<8xf32>
    %7 = vector.shape_cast %6 : vector<8xf32> to vector<8x1xf32>
    %8 = arith.addf %5, %7 : vector<8x1xf32>
    %c0_5 = arith.constant 0 : index
    %c0_6 = arith.constant 0 : index
    %9 = vector.load %arg2[%c0_5, %c0_6] : memref<8x1xf32, #tpu.memory_space<vmem>>, vector<8x1xf32>
    tpu.vector_store %arg2[%c0_5, %c0_6], %8 {strides = array<i32>} : memref<8x1xf32, #tpu.memory_space<vmem>>, vector<8x1xf32>,
    %c0_7 = arith.constant 0 : index
    %c0_8 = arith.constant 0 : index
    %10 = vector.load %arg3[%c0_7, %c0_8] : memref<8x1xf32, #tpu.memory_space<vmem>>, vector<8x1xf32>
    %11 = arith.mulf %4, %4 : vector<8x256xf32>
    %cst_9 = arith.constant dense<0.000000e+00> : vector<8xf32>
    %12 = vector.multi_reduction <add>, %11, %cst_9 [1] : vector<8x256xf32> to vector<8xf32>
    %13 = vector.shape_cast %12 : vector<8xf32> to vector<8x1xf32>
    %14 = arith.addf %10, %13 : vector<8x1xf32>
    %c0_10 = arith.constant 0 : index
    %c0_11 = arith.constant 0 : index
    %15 = vector.load %arg3[%c0_10, %c0_11] : memref<8x1xf32, #tpu.memory_space<vmem>>, vector<8x1xf32>
    tpu.vector_store %arg3[%c0_10, %c0_11], %14 {strides = array<i32>} : memref<8x1xf32, #tpu.memory_space<vmem>>, vector<8x1xf32>,
    return
  }
  func.func @transform_0(%arg0: i32) -> (i32, i32, i32) {
    %c0_i32 = arith.constant 0 : i32
    %c0_i32_0 = arith.constant 0 : i32
    %c0_i32_1 = arith.constant 0 : i32
    return %arg0, %c0_i32, %c0_i32_0 : i32, i32, i32
  }
  func.func @transform_1(%arg0: i32) -> (i32, i32) {
    %c0_i32 = arith.constant 0 : i32
    %c0_i32_0 = arith.constant 0 : i32
    %c0_i32_1 = arith.constant 0 : i32
    return %c0_i32, %c0_i32_0 : i32, i32
  }
  func.func @transform_2(%arg0: i32) -> (i32, i32) {
    %c0_i32 = arith.constant 0 : i32
    %c0_i32_0 = arith.constant 0 : i32
    %c0_i32_1 = arith.constant 0 : i32
    return %c0_i32, %c0_i32_0 : i32, i32
  }
}

module attributes {stable_mosaic.version = 11 : i64} {
  func.func @_conv_bn_relu_kernel(%arg0: i32, %arg1: i32, %arg2: memref<4x1xf32, #tpu.memory_space<vmem>>, %arg3: memref<4x1xf32, #tpu.memory_space<vmem>>, %arg4: memref<4x1xf32, #tpu.memory_space<vmem>>, %arg5: memref<4x1xf32, #tpu.memory_space<vmem>>, %arg6: memref<1x4x256xf32, #tpu.memory_space<vmem>>, %arg7: memref<9x8x4xf32, #tpu.memory_space<vmem>>, %arg8: memref<1x8x4xf32, #tpu.memory_space<vmem>>, %arg9: memref<1x8x128xf32, #tpu.memory_space<vmem>>, %arg10: memref<1x8x128xf32, #tpu.memory_space<vmem>>, %arg11: memref<4x18x18xf32, #tpu.memory_space<vmem>>) attributes {dimension_semantics = [#tpu.dimension_semantics<parallel>, #tpu.dimension_semantics<parallel>], iteration_bounds = array<i64: 2, 2>, scalar_prefetch = 0 : i64, scratch_operands = 1 : i64, tpu.core_type = #tpu.core_type<tc>, window_params = [{pipeline_mode = #tpu.pipeline_mode<synchronous>, transform_indices = @transform_0, window_bounds = array<i64: 4, 1>}, {pipeline_mode = #tpu.pipeline_mode<synchronous>, transform_indices = @transform_1, window_bounds = array<i64: 4, 1>}, {pipeline_mode = #tpu.pipeline_mode<synchronous>, transform_indices = @transform_2, window_bounds = array<i64: 4, 1>}, {pipeline_mode = #tpu.pipeline_mode<synchronous>, transform_indices = @transform_3, window_bounds = array<i64: 4, 1>}, {transform_indices = @transform_4, window_bounds = array<i64: 1, 4, 256>}, {pipeline_mode = #tpu.pipeline_mode<synchronous>, transform_indices = @transform_5, window_bounds = array<i64: 9, 8, 4>}, {pipeline_mode = #tpu.pipeline_mode<synchronous>, transform_indices = @transform_6, window_bounds = array<i64: 1, 8, 4>}, {transform_indices = @transform_7, window_bounds = array<i64: 1, 8, 128>}, {transform_indices = @transform_8, window_bounds = array<i64: 1, 8, 128>}]} {
    %c8_i32 = arith.constant 8 : i32
    %0 = arith.muli %arg1, %c8_i32 : i32
    %c0 = arith.constant 0 : index
    %c0_0 = arith.constant 0 : index
    %1 = vector.load %arg2[%c0, %c0_0] : memref<4x1xf32, #tpu.memory_space<vmem>>, vector<4x1xf32>
    %cst = arith.constant 0.001953125 : f32
    %2 = vector.broadcast %cst : f32 to vector<4x1xf32>
    %3 = arith.mulf %1, %2 : vector<4x1xf32>
    %c0_1 = arith.constant 0 : index
    %c0_2 = arith.constant 0 : index
    %4 = vector.load %arg3[%c0_1, %c0_2] : memref<4x1xf32, #tpu.memory_space<vmem>>, vector<4x1xf32>
    %cst_3 = arith.constant 0.001953125 : f32
    %5 = vector.broadcast %cst_3 : f32 to vector<4x1xf32>
    %6 = arith.mulf %4, %5 : vector<4x1xf32>
    %7 = arith.mulf %3, %3 : vector<4x1xf32>
    %8 = arith.subf %6, %7 : vector<4x1xf32>
    %cst_4 = arith.constant 0.000000e+00 : f32
    %9 = vector.broadcast %cst_4 : f32 to vector<4x1xf32>
    %10 = arith.maximumf %8, %9 : vector<4x1xf32>
    %c0_5 = arith.constant 0 : index
    %c0_6 = arith.constant 0 : index
    %11 = vector.load %arg4[%c0_5, %c0_6] : memref<4x1xf32, #tpu.memory_space<vmem>>, vector<4x1xf32>
    %cst_7 = arith.constant 9.99999974E-6 : f32
    %12 = vector.broadcast %cst_7 : f32 to vector<4x1xf32>
    %13 = arith.addf %10, %12 : vector<4x1xf32>
    %14 = math.rsqrt %13 : vector<4x1xf32>
    %15 = arith.mulf %11, %14 : vector<4x1xf32>
    %c0_8 = arith.constant 0 : index
    %c0_9 = arith.constant 0 : index
    %16 = vector.load %arg5[%c0_8, %c0_9] : memref<4x1xf32, #tpu.memory_space<vmem>>, vector<4x1xf32>
    %17 = arith.mulf %3, %15 : vector<4x1xf32>
    %18 = arith.subf %16, %17 : vector<4x1xf32>
    %c0_10 = arith.constant 0 : index
    %c0_11 = arith.constant 0 : index
    %c0_12 = arith.constant 0 : index
    %19 = vector.load %arg6[%c0_10, %c0_11, %c0_12] : memref<1x4x256xf32, #tpu.memory_space<vmem>>, vector<1x4x256xf32>
    %20 = vector.shape_cast %19 : vector<1x4x256xf32> to vector<4x256xf32>
    %21 = vector.broadcast %15 : vector<4x1xf32> to vector<4x256xf32>
    %22 = arith.mulf %20, %21 : vector<4x256xf32>
    %23 = vector.broadcast %18 : vector<4x1xf32> to vector<4x256xf32>
    %24 = arith.addf %22, %23 : vector<4x256xf32>
    %cst_13 = arith.constant 0.000000e+00 : f32
    %25 = vector.broadcast %cst_13 : f32 to vector<4x256xf32>
    %26 = arith.maximumf %24, %25 : vector<4x256xf32>
    %cst_14 = arith.constant 0.000000e+00 : f32
    %27 = vector.broadcast %cst_14 : f32 to vector<4x18x18xf32>
    %c0_15 = arith.constant 0 : index
    %c0_16 = arith.constant 0 : index
    %c0_17 = arith.constant 0 : index
    %28 = vector.load %arg11[%c0_15, %c0_16, %c0_17] : memref<4x18x18xf32, #tpu.memory_space<vmem>>, vector<4x18x18xf32>
    tpu.vector_store %arg11[%c0_15, %c0_16, %c0_17], %27 {strides = array<i32>} : memref<4x18x18xf32, #tpu.memory_space<vmem>>, vector<4x18x18xf32>,
    %29 = vector.shape_cast %26 : vector<4x256xf32> to vector<4x16x16xf32>
    %c0_18 = arith.constant 0 : index
    %c1 = arith.constant 1 : index
    %c1_19 = arith.constant 1 : index
    %30 = vector.load %arg11[%c0_18, %c1, %c1_19] : memref<4x18x18xf32, #tpu.memory_space<vmem>>, vector<4x16x16xf32>
    tpu.vector_store %arg11[%c0_18, %c1, %c1_19], %29 {strides = array<i32>} : memref<4x18x18xf32, #tpu.memory_space<vmem>>, vector<4x16x16xf32>,
    %cst_20 = arith.constant 0.000000e+00 : f32
    %31 = vector.broadcast %cst_20 : f32 to vector<8x128xf32>
    %c1_i32 = arith.constant 1 : i32
    %32 = arith.muli %0, %c1_i32 : i32
    %c0_i32 = arith.constant 0 : i32
    %33 = arith.addi %c0_i32, %32 : i32
    %c0_21 = arith.constant 0 : index
    %34 = arith.index_cast %33 : i32 to index
    %c0_22 = arith.constant 0 : index
    %35 = vector.load %arg11[%c0_21, %34, %c0_22] : memref<4x18x18xf32, #tpu.memory_space<vmem>>, vector<4x8x16xf32>
    %36 = vector.shape_cast %35 : vector<4x8x16xf32> to vector<4x128xf32>
    %c0_23 = arith.constant 0 : index
    %c0_24 = arith.constant 0 : index
    %c0_25 = arith.constant 0 : index
    %37 = vector.load %arg7[%c0_23, %c0_24, %c0_25] : memref<9x8x4xf32, #tpu.memory_space<vmem>>, vector<1x8x4xf32>
    %38 = vector.shape_cast %37 : vector<1x8x4xf32> to vector<8x4xf32>
    %cst_26 = arith.constant dense<0.000000e+00> : vector<8x128xf32>
    %39 = tpu.matmul %38, %36, %cst_26 {dimension_numbers = #tpu.dot_dimension_numbers<[1], [0], [0], [1], [0, 0, 1, 1], [], []>} : vector<8x4xf32>, vector<4x128xf32>, vector<8x128xf32> -> vector<8x128xf32>
    %40 = arith.addf %31, %39 : vector<8x128xf32>
    %c1_i32_27 = arith.constant 1 : i32
    %41 = arith.muli %0, %c1_i32_27 : i32
    %c0_i32_28 = arith.constant 0 : i32
    %42 = arith.addi %c0_i32_28, %41 : i32
    %c0_29 = arith.constant 0 : index
    %43 = arith.index_cast %42 : i32 to index
    %c1_30 = arith.constant 1 : index
    %44 = vector.load %arg11[%c0_29, %43, %c1_30] : memref<4x18x18xf32, #tpu.memory_space<vmem>>, vector<4x8x16xf32>
    %45 = vector.shape_cast %44 : vector<4x8x16xf32> to vector<4x128xf32>
    %c1_31 = arith.constant 1 : index
    %c0_32 = arith.constant 0 : index
    %c0_33 = arith.constant 0 : index
    %46 = vector.load %arg7[%c1_31, %c0_32, %c0_33] : memref<9x8x4xf32, #tpu.memory_space<vmem>>, vector<1x8x4xf32>
    %47 = vector.shape_cast %46 : vector<1x8x4xf32> to vector<8x4xf32>
    %cst_34 = arith.constant dense<0.000000e+00> : vector<8x128xf32>
    %48 = tpu.matmul %47, %45, %cst_34 {dimension_numbers = #tpu.dot_dimension_numbers<[1], [0], [0], [1], [0, 0, 1, 1], [], []>} : vector<8x4xf32>, vector<4x128xf32>, vector<8x128xf32> -> vector<8x128xf32>
    %49 = arith.addf %40, %48 : vector<8x128xf32>
    %c1_i32_35 = arith.constant 1 : i32
    %50 = arith.muli %0, %c1_i32_35 : i32
    %c0_i32_36 = arith.constant 0 : i32
    %51 = arith.addi %c0_i32_36, %50 : i32
    %c0_37 = arith.constant 0 : index
    %52 = arith.index_cast %51 : i32 to index
    %c2 = arith.constant 2 : index
    %53 = vector.load %arg11[%c0_37, %52, %c2] : memref<4x18x18xf32, #tpu.memory_space<vmem>>, vector<4x8x16xf32>
    %54 = vector.shape_cast %53 : vector<4x8x16xf32> to vector<4x128xf32>
    %c2_38 = arith.constant 2 : index
    %c0_39 = arith.constant 0 : index
    %c0_40 = arith.constant 0 : index
    %55 = vector.load %arg7[%c2_38, %c0_39, %c0_40] : memref<9x8x4xf32, #tpu.memory_space<vmem>>, vector<1x8x4xf32>
    %56 = vector.shape_cast %55 : vector<1x8x4xf32> to vector<8x4xf32>
    %cst_41 = arith.constant dense<0.000000e+00> : vector<8x128xf32>
    %57 = tpu.matmul %56, %54, %cst_41 {dimension_numbers = #tpu.dot_dimension_numbers<[1], [0], [0], [1], [0, 0, 1, 1], [], []>} : vector<8x4xf32>, vector<4x128xf32>, vector<8x128xf32> -> vector<8x128xf32>
    %58 = arith.addf %49, %57 : vector<8x128xf32>
    %c1_i32_42 = arith.constant 1 : i32
    %59 = arith.muli %0, %c1_i32_42 : i32
    %c1_i32_43 = arith.constant 1 : i32
    %60 = arith.addi %c1_i32_43, %59 : i32
    %c0_44 = arith.constant 0 : index
    %61 = arith.index_cast %60 : i32 to index
    %c0_45 = arith.constant 0 : index
    %62 = vector.load %arg11[%c0_44, %61, %c0_45] : memref<4x18x18xf32, #tpu.memory_space<vmem>>, vector<4x8x16xf32>
    %63 = vector.shape_cast %62 : vector<4x8x16xf32> to vector<4x128xf32>
    %c3 = arith.constant 3 : index
    %c0_46 = arith.constant 0 : index
    %c0_47 = arith.constant 0 : index
    %64 = vector.load %arg7[%c3, %c0_46, %c0_47] : memref<9x8x4xf32, #tpu.memory_space<vmem>>, vector<1x8x4xf32>
    %65 = vector.shape_cast %64 : vector<1x8x4xf32> to vector<8x4xf32>
    %cst_48 = arith.constant dense<0.000000e+00> : vector<8x128xf32>
    %66 = tpu.matmul %65, %63, %cst_48 {dimension_numbers = #tpu.dot_dimension_numbers<[1], [0], [0], [1], [0, 0, 1, 1], [], []>} : vector<8x4xf32>, vector<4x128xf32>, vector<8x128xf32> -> vector<8x128xf32>
    %67 = arith.addf %58, %66 : vector<8x128xf32>
    %c1_i32_49 = arith.constant 1 : i32
    %68 = arith.muli %0, %c1_i32_49 : i32
    %c1_i32_50 = arith.constant 1 : i32
    %69 = arith.addi %c1_i32_50, %68 : i32
    %c0_51 = arith.constant 0 : index
    %70 = arith.index_cast %69 : i32 to index
    %c1_52 = arith.constant 1 : index
    %71 = vector.load %arg11[%c0_51, %70, %c1_52] : memref<4x18x18xf32, #tpu.memory_space<vmem>>, vector<4x8x16xf32>
    %72 = vector.shape_cast %71 : vector<4x8x16xf32> to vector<4x128xf32>
    %c4 = arith.constant 4 : index
    %c0_53 = arith.constant 0 : index
    %c0_54 = arith.constant 0 : index
    %73 = vector.load %arg7[%c4, %c0_53, %c0_54] : memref<9x8x4xf32, #tpu.memory_space<vmem>>, vector<1x8x4xf32>
    %74 = vector.shape_cast %73 : vector<1x8x4xf32> to vector<8x4xf32>
    %cst_55 = arith.constant dense<0.000000e+00> : vector<8x128xf32>
    %75 = tpu.matmul %74, %72, %cst_55 {dimension_numbers = #tpu.dot_dimension_numbers<[1], [0], [0], [1], [0, 0, 1, 1], [], []>} : vector<8x4xf32>, vector<4x128xf32>, vector<8x128xf32> -> vector<8x128xf32>
    %76 = arith.addf %67, %75 : vector<8x128xf32>
    %c1_i32_56 = arith.constant 1 : i32
    %77 = arith.muli %0, %c1_i32_56 : i32
    %c1_i32_57 = arith.constant 1 : i32
    %78 = arith.addi %c1_i32_57, %77 : i32
    %c0_58 = arith.constant 0 : index
    %79 = arith.index_cast %78 : i32 to index
    %c2_59 = arith.constant 2 : index
    %80 = vector.load %arg11[%c0_58, %79, %c2_59] : memref<4x18x18xf32, #tpu.memory_space<vmem>>, vector<4x8x16xf32>
    %81 = vector.shape_cast %80 : vector<4x8x16xf32> to vector<4x128xf32>
    %c5 = arith.constant 5 : index
    %c0_60 = arith.constant 0 : index
    %c0_61 = arith.constant 0 : index
    %82 = vector.load %arg7[%c5, %c0_60, %c0_61] : memref<9x8x4xf32, #tpu.memory_space<vmem>>, vector<1x8x4xf32>
    %83 = vector.shape_cast %82 : vector<1x8x4xf32> to vector<8x4xf32>
    %cst_62 = arith.constant dense<0.000000e+00> : vector<8x128xf32>
    %84 = tpu.matmul %83, %81, %cst_62 {dimension_numbers = #tpu.dot_dimension_numbers<[1], [0], [0], [1], [0, 0, 1, 1], [], []>} : vector<8x4xf32>, vector<4x128xf32>, vector<8x128xf32> -> vector<8x128xf32>
    %85 = arith.addf %76, %84 : vector<8x128xf32>
    %c1_i32_63 = arith.constant 1 : i32
    %86 = arith.muli %0, %c1_i32_63 : i32
    %c2_i32 = arith.constant 2 : i32
    %87 = arith.addi %c2_i32, %86 : i32
    %c0_64 = arith.constant 0 : index
    %88 = arith.index_cast %87 : i32 to index
    %c0_65 = arith.constant 0 : index
    %89 = vector.load %arg11[%c0_64, %88, %c0_65] : memref<4x18x18xf32, #tpu.memory_space<vmem>>, vector<4x8x16xf32>
    %90 = vector.shape_cast %89 : vector<4x8x16xf32> to vector<4x128xf32>
    %c6 = arith.constant 6 : index
    %c0_66 = arith.constant 0 : index
    %c0_67 = arith.constant 0 : index
    %91 = vector.load %arg7[%c6, %c0_66, %c0_67] : memref<9x8x4xf32, #tpu.memory_space<vmem>>, vector<1x8x4xf32>
    %92 = vector.shape_cast %91 : vector<1x8x4xf32> to vector<8x4xf32>
    %cst_68 = arith.constant dense<0.000000e+00> : vector<8x128xf32>
    %93 = tpu.matmul %92, %90, %cst_68 {dimension_numbers = #tpu.dot_dimension_numbers<[1], [0], [0], [1], [0, 0, 1, 1], [], []>} : vector<8x4xf32>, vector<4x128xf32>, vector<8x128xf32> -> vector<8x128xf32>
    %94 = arith.addf %85, %93 : vector<8x128xf32>
    %c1_i32_69 = arith.constant 1 : i32
    %95 = arith.muli %0, %c1_i32_69 : i32
    %c2_i32_70 = arith.constant 2 : i32
    %96 = arith.addi %c2_i32_70, %95 : i32
    %c0_71 = arith.constant 0 : index
    %97 = arith.index_cast %96 : i32 to index
    %c1_72 = arith.constant 1 : index
    %98 = vector.load %arg11[%c0_71, %97, %c1_72] : memref<4x18x18xf32, #tpu.memory_space<vmem>>, vector<4x8x16xf32>
    %99 = vector.shape_cast %98 : vector<4x8x16xf32> to vector<4x128xf32>
    %c7 = arith.constant 7 : index
    %c0_73 = arith.constant 0 : index
    %c0_74 = arith.constant 0 : index
    %100 = vector.load %arg7[%c7, %c0_73, %c0_74] : memref<9x8x4xf32, #tpu.memory_space<vmem>>, vector<1x8x4xf32>
    %101 = vector.shape_cast %100 : vector<1x8x4xf32> to vector<8x4xf32>
    %cst_75 = arith.constant dense<0.000000e+00> : vector<8x128xf32>
    %102 = tpu.matmul %101, %99, %cst_75 {dimension_numbers = #tpu.dot_dimension_numbers<[1], [0], [0], [1], [0, 0, 1, 1], [], []>} : vector<8x4xf32>, vector<4x128xf32>, vector<8x128xf32> -> vector<8x128xf32>
    %103 = arith.addf %94, %102 : vector<8x128xf32>
    %c1_i32_76 = arith.constant 1 : i32
    %104 = arith.muli %0, %c1_i32_76 : i32
    %c2_i32_77 = arith.constant 2 : i32
    %105 = arith.addi %c2_i32_77, %104 : i32
    %c0_78 = arith.constant 0 : index
    %106 = arith.index_cast %105 : i32 to index
    %c2_79 = arith.constant 2 : index
    %107 = vector.load %arg11[%c0_78, %106, %c2_79] : memref<4x18x18xf32, #tpu.memory_space<vmem>>, vector<4x8x16xf32>
    %108 = vector.shape_cast %107 : vector<4x8x16xf32> to vector<4x128xf32>
    %c8 = arith.constant 8 : index
    %c0_80 = arith.constant 0 : index
    %c0_81 = arith.constant 0 : index
    %109 = vector.load %arg7[%c8, %c0_80, %c0_81] : memref<9x8x4xf32, #tpu.memory_space<vmem>>, vector<1x8x4xf32>
    %110 = vector.shape_cast %109 : vector<1x8x4xf32> to vector<8x4xf32>
    %cst_82 = arith.constant dense<0.000000e+00> : vector<8x128xf32>
    %111 = tpu.matmul %110, %108, %cst_82 {dimension_numbers = #tpu.dot_dimension_numbers<[1], [0], [0], [1], [0, 0, 1, 1], [], []>} : vector<8x4xf32>, vector<4x128xf32>, vector<8x128xf32> -> vector<8x128xf32>
    %112 = arith.addf %103, %111 : vector<8x128xf32>
    %c0_83 = arith.constant 0 : index
    %c0_84 = arith.constant 0 : index
    %c0_85 = arith.constant 0 : index
    %113 = vector.load %arg9[%c0_83, %c0_84, %c0_85] : memref<1x8x128xf32, #tpu.memory_space<vmem>>, vector<1x8x128xf32>
    %114 = vector.shape_cast %113 : vector<1x8x128xf32> to vector<8x128xf32>
    %115 = vector.shape_cast %112 : vector<8x128xf32> to vector<1x8x128xf32>
    tpu.vector_store %arg9[%c0_83, %c0_84, %c0_85], %115 {strides = array<i32>} : memref<1x8x128xf32, #tpu.memory_space<vmem>>, vector<1x8x128xf32>,
    %c1_i32_86 = arith.constant 1 : i32
    %116 = arith.muli %0, %c1_i32_86 : i32
    %c1_i32_87 = arith.constant 1 : i32
    %117 = arith.addi %c1_i32_87, %116 : i32
    %c0_88 = arith.constant 0 : index
    %118 = arith.index_cast %117 : i32 to index
    %c1_89 = arith.constant 1 : index
    %119 = vector.load %arg11[%c0_88, %118, %c1_89] : memref<4x18x18xf32, #tpu.memory_space<vmem>>, vector<4x8x16xf32>
    %120 = vector.shape_cast %119 : vector<4x8x16xf32> to vector<4x128xf32>
    %c0_90 = arith.constant 0 : index
    %c0_91 = arith.constant 0 : index
    %c0_92 = arith.constant 0 : index
    %121 = vector.load %arg8[%c0_90, %c0_91, %c0_92] : memref<1x8x4xf32, #tpu.memory_space<vmem>>, vector<1x8x4xf32>
    %122 = vector.shape_cast %121 : vector<1x8x4xf32> to vector<8x4xf32>
    %cst_93 = arith.constant dense<0.000000e+00> : vector<8x128xf32>
    %123 = tpu.matmul %122, %120, %cst_93 {dimension_numbers = #tpu.dot_dimension_numbers<[1], [0], [0], [1], [0, 0, 1, 1], [], []>} : vector<8x4xf32>, vector<4x128xf32>, vector<8x128xf32> -> vector<8x128xf32>
    %c0_94 = arith.constant 0 : index
    %c0_95 = arith.constant 0 : index
    %c0_96 = arith.constant 0 : index
    %124 = vector.load %arg10[%c0_94, %c0_95, %c0_96] : memref<1x8x128xf32, #tpu.memory_space<vmem>>, vector<1x8x128xf32>
    %125 = vector.shape_cast %124 : vector<1x8x128xf32> to vector<8x128xf32>
    %126 = vector.shape_cast %123 : vector<8x128xf32> to vector<1x8x128xf32>
    tpu.vector_store %arg10[%c0_94, %c0_95, %c0_96], %126 {strides = array<i32>} : memref<1x8x128xf32, #tpu.memory_space<vmem>>, vector<1x8x128xf32>,
    return
  }
  func.func @transform_0(%arg0: i32, %arg1: i32) -> (i32, i32) {
    %c0_i32 = arith.constant 0 : i32
    %c0_i32_0 = arith.constant 0 : i32
    %c0_i32_1 = arith.constant 0 : i32
    return %c0_i32, %c0_i32_0 : i32, i32
  }
  func.func @transform_1(%arg0: i32, %arg1: i32) -> (i32, i32) {
    %c0_i32 = arith.constant 0 : i32
    %c0_i32_0 = arith.constant 0 : i32
    %c0_i32_1 = arith.constant 0 : i32
    return %c0_i32, %c0_i32_0 : i32, i32
  }
  func.func @transform_2(%arg0: i32, %arg1: i32) -> (i32, i32) {
    %c0_i32 = arith.constant 0 : i32
    %c0_i32_0 = arith.constant 0 : i32
    %c0_i32_1 = arith.constant 0 : i32
    return %c0_i32, %c0_i32_0 : i32, i32
  }
  func.func @transform_3(%arg0: i32, %arg1: i32) -> (i32, i32) {
    %c0_i32 = arith.constant 0 : i32
    %c0_i32_0 = arith.constant 0 : i32
    %c0_i32_1 = arith.constant 0 : i32
    return %c0_i32, %c0_i32_0 : i32, i32
  }
  func.func @transform_4(%arg0: i32, %arg1: i32) -> (i32, i32, i32) {
    %c0_i32 = arith.constant 0 : i32
    %c0_i32_0 = arith.constant 0 : i32
    %c0_i32_1 = arith.constant 0 : i32
    return %arg0, %c0_i32, %c0_i32_0 : i32, i32, i32
  }
  func.func @transform_5(%arg0: i32, %arg1: i32) -> (i32, i32, i32) {
    %c0_i32 = arith.constant 0 : i32
    %c0_i32_0 = arith.constant 0 : i32
    %c0_i32_1 = arith.constant 0 : i32
    %c0_i32_2 = arith.constant 0 : i32
    return %c0_i32, %c0_i32_0, %c0_i32_1 : i32, i32, i32
  }
  func.func @transform_6(%arg0: i32, %arg1: i32) -> (i32, i32, i32) {
    %c0_i32 = arith.constant 0 : i32
    %c0_i32_0 = arith.constant 0 : i32
    %c0_i32_1 = arith.constant 0 : i32
    %c0_i32_2 = arith.constant 0 : i32
    return %c0_i32, %c0_i32_0, %c0_i32_1 : i32, i32, i32
  }
  func.func @transform_7(%arg0: i32, %arg1: i32) -> (i32, i32, i32) {
    %c0_i32 = arith.constant 0 : i32
    %c0_i32_0 = arith.constant 0 : i32
    return %arg0, %c0_i32, %arg1 : i32, i32, i32
  }
  func.func @transform_8(%arg0: i32, %arg1: i32) -> (i32, i32, i32) {
    %c0_i32 = arith.constant 0 : i32
    %c0_i32_0 = arith.constant 0 : i32
    return %arg0, %c0_i32, %arg1 : i32, i32, i32
  }
}

module attributes {stable_mosaic.version = 11 : i64} {
  func.func @_conv_bn_relu_kernel(%arg0: i32, %arg1: i32, %arg2: memref<8x1xf32, #tpu.memory_space<vmem>>, %arg3: memref<8x1xf32, #tpu.memory_space<vmem>>, %arg4: memref<8x1xf32, #tpu.memory_space<vmem>>, %arg5: memref<8x1xf32, #tpu.memory_space<vmem>>, %arg6: memref<1x8x256xf32, #tpu.memory_space<vmem>>, %arg7: memref<9x8x8xf32, #tpu.memory_space<vmem>>, %arg8: memref<1x8x128xf32, #tpu.memory_space<vmem>>, %arg9: memref<1x8x128xf32, #tpu.memory_space<vmem>>, %arg10: memref<8x18x18xf32, #tpu.memory_space<vmem>>) attributes {dimension_semantics = [#tpu.dimension_semantics<parallel>, #tpu.dimension_semantics<parallel>], iteration_bounds = array<i64: 2, 2>, scalar_prefetch = 0 : i64, scratch_operands = 1 : i64, tpu.core_type = #tpu.core_type<tc>, window_params = [{pipeline_mode = #tpu.pipeline_mode<synchronous>, transform_indices = @transform_0, window_bounds = array<i64: 8, 1>}, {pipeline_mode = #tpu.pipeline_mode<synchronous>, transform_indices = @transform_1, window_bounds = array<i64: 8, 1>}, {pipeline_mode = #tpu.pipeline_mode<synchronous>, transform_indices = @transform_2, window_bounds = array<i64: 8, 1>}, {pipeline_mode = #tpu.pipeline_mode<synchronous>, transform_indices = @transform_3, window_bounds = array<i64: 8, 1>}, {transform_indices = @transform_4, window_bounds = array<i64: 1, 8, 256>}, {pipeline_mode = #tpu.pipeline_mode<synchronous>, transform_indices = @transform_5, window_bounds = array<i64: 9, 8, 8>}, {transform_indices = @transform_6, window_bounds = array<i64: 1, 8, 128>}, {transform_indices = @transform_7, window_bounds = array<i64: 1, 8, 128>}]} {
    %c8_i32 = arith.constant 8 : i32
    %0 = arith.muli %arg1, %c8_i32 : i32
    %c0 = arith.constant 0 : index
    %c0_0 = arith.constant 0 : index
    %1 = vector.load %arg2[%c0, %c0_0] : memref<8x1xf32, #tpu.memory_space<vmem>>, vector<8x1xf32>
    %cst = arith.constant 0.001953125 : f32
    %2 = vector.broadcast %cst : f32 to vector<8x1xf32>
    %3 = arith.mulf %1, %2 : vector<8x1xf32>
    %c0_1 = arith.constant 0 : index
    %c0_2 = arith.constant 0 : index
    %4 = vector.load %arg3[%c0_1, %c0_2] : memref<8x1xf32, #tpu.memory_space<vmem>>, vector<8x1xf32>
    %cst_3 = arith.constant 0.001953125 : f32
    %5 = vector.broadcast %cst_3 : f32 to vector<8x1xf32>
    %6 = arith.mulf %4, %5 : vector<8x1xf32>
    %7 = arith.mulf %3, %3 : vector<8x1xf32>
    %8 = arith.subf %6, %7 : vector<8x1xf32>
    %cst_4 = arith.constant 0.000000e+00 : f32
    %9 = vector.broadcast %cst_4 : f32 to vector<8x1xf32>
    %10 = arith.maximumf %8, %9 : vector<8x1xf32>
    %c0_5 = arith.constant 0 : index
    %c0_6 = arith.constant 0 : index
    %11 = vector.load %arg4[%c0_5, %c0_6] : memref<8x1xf32, #tpu.memory_space<vmem>>, vector<8x1xf32>
    %cst_7 = arith.constant 9.99999974E-6 : f32
    %12 = vector.broadcast %cst_7 : f32 to vector<8x1xf32>
    %13 = arith.addf %10, %12 : vector<8x1xf32>
    %14 = math.rsqrt %13 : vector<8x1xf32>
    %15 = arith.mulf %11, %14 : vector<8x1xf32>
    %c0_8 = arith.constant 0 : index
    %c0_9 = arith.constant 0 : index
    %16 = vector.load %arg5[%c0_8, %c0_9] : memref<8x1xf32, #tpu.memory_space<vmem>>, vector<8x1xf32>
    %17 = arith.mulf %3, %15 : vector<8x1xf32>
    %18 = arith.subf %16, %17 : vector<8x1xf32>
    %c0_10 = arith.constant 0 : index
    %c0_11 = arith.constant 0 : index
    %c0_12 = arith.constant 0 : index
    %19 = vector.load %arg6[%c0_10, %c0_11, %c0_12] : memref<1x8x256xf32, #tpu.memory_space<vmem>>, vector<1x8x256xf32>
    %20 = vector.shape_cast %19 : vector<1x8x256xf32> to vector<8x256xf32>
    %21 = vector.broadcast %15 : vector<8x1xf32> to vector<8x256xf32>
    %22 = arith.mulf %20, %21 : vector<8x256xf32>
    %23 = vector.broadcast %18 : vector<8x1xf32> to vector<8x256xf32>
    %24 = arith.addf %22, %23 : vector<8x256xf32>
    %cst_13 = arith.constant 0.000000e+00 : f32
    %25 = vector.broadcast %cst_13 : f32 to vector<8x256xf32>
    %26 = arith.maximumf %24, %25 : vector<8x256xf32>
    %cst_14 = arith.constant 0.000000e+00 : f32
    %27 = vector.broadcast %cst_14 : f32 to vector<8x18x18xf32>
    %c0_15 = arith.constant 0 : index
    %c0_16 = arith.constant 0 : index
    %c0_17 = arith.constant 0 : index
    %28 = vector.load %arg10[%c0_15, %c0_16, %c0_17] : memref<8x18x18xf32, #tpu.memory_space<vmem>>, vector<8x18x18xf32>
    tpu.vector_store %arg10[%c0_15, %c0_16, %c0_17], %27 {strides = array<i32>} : memref<8x18x18xf32, #tpu.memory_space<vmem>>, vector<8x18x18xf32>,
    %29 = vector.shape_cast %26 : vector<8x256xf32> to vector<8x16x16xf32>
    %c0_18 = arith.constant 0 : index
    %c1 = arith.constant 1 : index
    %c1_19 = arith.constant 1 : index
    %30 = vector.load %arg10[%c0_18, %c1, %c1_19] : memref<8x18x18xf32, #tpu.memory_space<vmem>>, vector<8x16x16xf32>
    tpu.vector_store %arg10[%c0_18, %c1, %c1_19], %29 {strides = array<i32>} : memref<8x18x18xf32, #tpu.memory_space<vmem>>, vector<8x16x16xf32>,
    %cst_20 = arith.constant 0.000000e+00 : f32
    %31 = vector.broadcast %cst_20 : f32 to vector<8x128xf32>
    %c1_i32 = arith.constant 1 : i32
    %32 = arith.muli %0, %c1_i32 : i32
    %c0_i32 = arith.constant 0 : i32
    %33 = arith.addi %c0_i32, %32 : i32
    %c0_21 = arith.constant 0 : index
    %34 = arith.index_cast %33 : i32 to index
    %c0_22 = arith.constant 0 : index
    %35 = vector.load %arg10[%c0_21, %34, %c0_22] : memref<8x18x18xf32, #tpu.memory_space<vmem>>, vector<8x8x16xf32>
    %36 = vector.shape_cast %35 : vector<8x8x16xf32> to vector<8x128xf32>
    %c0_23 = arith.constant 0 : index
    %c0_24 = arith.constant 0 : index
    %c0_25 = arith.constant 0 : index
    %37 = vector.load %arg7[%c0_23, %c0_24, %c0_25] : memref<9x8x8xf32, #tpu.memory_space<vmem>>, vector<1x8x8xf32>
    %38 = vector.shape_cast %37 : vector<1x8x8xf32> to vector<8x8xf32>
    %cst_26 = arith.constant dense<0.000000e+00> : vector<8x128xf32>
    %39 = tpu.matmul %38, %36, %cst_26 {dimension_numbers = #tpu.dot_dimension_numbers<[1], [0], [0], [1], [0, 0, 1, 1], [], []>} : vector<8x8xf32>, vector<8x128xf32>, vector<8x128xf32> -> vector<8x128xf32>
    %40 = arith.addf %31, %39 : vector<8x128xf32>
    %c1_i32_27 = arith.constant 1 : i32
    %41 = arith.muli %0, %c1_i32_27 : i32
    %c0_i32_28 = arith.constant 0 : i32
    %42 = arith.addi %c0_i32_28, %41 : i32
    %c0_29 = arith.constant 0 : index
    %43 = arith.index_cast %42 : i32 to index
    %c1_30 = arith.constant 1 : index
    %44 = vector.load %arg10[%c0_29, %43, %c1_30] : memref<8x18x18xf32, #tpu.memory_space<vmem>>, vector<8x8x16xf32>
    %45 = vector.shape_cast %44 : vector<8x8x16xf32> to vector<8x128xf32>
    %c1_31 = arith.constant 1 : index
    %c0_32 = arith.constant 0 : index
    %c0_33 = arith.constant 0 : index
    %46 = vector.load %arg7[%c1_31, %c0_32, %c0_33] : memref<9x8x8xf32, #tpu.memory_space<vmem>>, vector<1x8x8xf32>
    %47 = vector.shape_cast %46 : vector<1x8x8xf32> to vector<8x8xf32>
    %cst_34 = arith.constant dense<0.000000e+00> : vector<8x128xf32>
    %48 = tpu.matmul %47, %45, %cst_34 {dimension_numbers = #tpu.dot_dimension_numbers<[1], [0], [0], [1], [0, 0, 1, 1], [], []>} : vector<8x8xf32>, vector<8x128xf32>, vector<8x128xf32> -> vector<8x128xf32>
    %49 = arith.addf %40, %48 : vector<8x128xf32>
    %c1_i32_35 = arith.constant 1 : i32
    %50 = arith.muli %0, %c1_i32_35 : i32
    %c0_i32_36 = arith.constant 0 : i32
    %51 = arith.addi %c0_i32_36, %50 : i32
    %c0_37 = arith.constant 0 : index
    %52 = arith.index_cast %51 : i32 to index
    %c2 = arith.constant 2 : index
    %53 = vector.load %arg10[%c0_37, %52, %c2] : memref<8x18x18xf32, #tpu.memory_space<vmem>>, vector<8x8x16xf32>
    %54 = vector.shape_cast %53 : vector<8x8x16xf32> to vector<8x128xf32>
    %c2_38 = arith.constant 2 : index
    %c0_39 = arith.constant 0 : index
    %c0_40 = arith.constant 0 : index
    %55 = vector.load %arg7[%c2_38, %c0_39, %c0_40] : memref<9x8x8xf32, #tpu.memory_space<vmem>>, vector<1x8x8xf32>
    %56 = vector.shape_cast %55 : vector<1x8x8xf32> to vector<8x8xf32>
    %cst_41 = arith.constant dense<0.000000e+00> : vector<8x128xf32>
    %57 = tpu.matmul %56, %54, %cst_41 {dimension_numbers = #tpu.dot_dimension_numbers<[1], [0], [0], [1], [0, 0, 1, 1], [], []>} : vector<8x8xf32>, vector<8x128xf32>, vector<8x128xf32> -> vector<8x128xf32>
    %58 = arith.addf %49, %57 : vector<8x128xf32>
    %c1_i32_42 = arith.constant 1 : i32
    %59 = arith.muli %0, %c1_i32_42 : i32
    %c1_i32_43 = arith.constant 1 : i32
    %60 = arith.addi %c1_i32_43, %59 : i32
    %c0_44 = arith.constant 0 : index
    %61 = arith.index_cast %60 : i32 to index
    %c0_45 = arith.constant 0 : index
    %62 = vector.load %arg10[%c0_44, %61, %c0_45] : memref<8x18x18xf32, #tpu.memory_space<vmem>>, vector<8x8x16xf32>
    %63 = vector.shape_cast %62 : vector<8x8x16xf32> to vector<8x128xf32>
    %c3 = arith.constant 3 : index
    %c0_46 = arith.constant 0 : index
    %c0_47 = arith.constant 0 : index
    %64 = vector.load %arg7[%c3, %c0_46, %c0_47] : memref<9x8x8xf32, #tpu.memory_space<vmem>>, vector<1x8x8xf32>
    %65 = vector.shape_cast %64 : vector<1x8x8xf32> to vector<8x8xf32>
    %cst_48 = arith.constant dense<0.000000e+00> : vector<8x128xf32>
    %66 = tpu.matmul %65, %63, %cst_48 {dimension_numbers = #tpu.dot_dimension_numbers<[1], [0], [0], [1], [0, 0, 1, 1], [], []>} : vector<8x8xf32>, vector<8x128xf32>, vector<8x128xf32> -> vector<8x128xf32>
    %67 = arith.addf %58, %66 : vector<8x128xf32>
    %c1_i32_49 = arith.constant 1 : i32
    %68 = arith.muli %0, %c1_i32_49 : i32
    %c1_i32_50 = arith.constant 1 : i32
    %69 = arith.addi %c1_i32_50, %68 : i32
    %c0_51 = arith.constant 0 : index
    %70 = arith.index_cast %69 : i32 to index
    %c1_52 = arith.constant 1 : index
    %71 = vector.load %arg10[%c0_51, %70, %c1_52] : memref<8x18x18xf32, #tpu.memory_space<vmem>>, vector<8x8x16xf32>
    %72 = vector.shape_cast %71 : vector<8x8x16xf32> to vector<8x128xf32>
    %c4 = arith.constant 4 : index
    %c0_53 = arith.constant 0 : index
    %c0_54 = arith.constant 0 : index
    %73 = vector.load %arg7[%c4, %c0_53, %c0_54] : memref<9x8x8xf32, #tpu.memory_space<vmem>>, vector<1x8x8xf32>
    %74 = vector.shape_cast %73 : vector<1x8x8xf32> to vector<8x8xf32>
    %cst_55 = arith.constant dense<0.000000e+00> : vector<8x128xf32>
    %75 = tpu.matmul %74, %72, %cst_55 {dimension_numbers = #tpu.dot_dimension_numbers<[1], [0], [0], [1], [0, 0, 1, 1], [], []>} : vector<8x8xf32>, vector<8x128xf32>, vector<8x128xf32> -> vector<8x128xf32>
    %76 = arith.addf %67, %75 : vector<8x128xf32>
    %c1_i32_56 = arith.constant 1 : i32
    %77 = arith.muli %0, %c1_i32_56 : i32
    %c1_i32_57 = arith.constant 1 : i32
    %78 = arith.addi %c1_i32_57, %77 : i32
    %c0_58 = arith.constant 0 : index
    %79 = arith.index_cast %78 : i32 to index
    %c2_59 = arith.constant 2 : index
    %80 = vector.load %arg10[%c0_58, %79, %c2_59] : memref<8x18x18xf32, #tpu.memory_space<vmem>>, vector<8x8x16xf32>
    %81 = vector.shape_cast %80 : vector<8x8x16xf32> to vector<8x128xf32>
    %c5 = arith.constant 5 : index
    %c0_60 = arith.constant 0 : index
    %c0_61 = arith.constant 0 : index
    %82 = vector.load %arg7[%c5, %c0_60, %c0_61] : memref<9x8x8xf32, #tpu.memory_space<vmem>>, vector<1x8x8xf32>
    %83 = vector.shape_cast %82 : vector<1x8x8xf32> to vector<8x8xf32>
    %cst_62 = arith.constant dense<0.000000e+00> : vector<8x128xf32>
    %84 = tpu.matmul %83, %81, %cst_62 {dimension_numbers = #tpu.dot_dimension_numbers<[1], [0], [0], [1], [0, 0, 1, 1], [], []>} : vector<8x8xf32>, vector<8x128xf32>, vector<8x128xf32> -> vector<8x128xf32>
    %85 = arith.addf %76, %84 : vector<8x128xf32>
    %c1_i32_63 = arith.constant 1 : i32
    %86 = arith.muli %0, %c1_i32_63 : i32
    %c2_i32 = arith.constant 2 : i32
    %87 = arith.addi %c2_i32, %86 : i32
    %c0_64 = arith.constant 0 : index
    %88 = arith.index_cast %87 : i32 to index
    %c0_65 = arith.constant 0 : index
    %89 = vector.load %arg10[%c0_64, %88, %c0_65] : memref<8x18x18xf32, #tpu.memory_space<vmem>>, vector<8x8x16xf32>
    %90 = vector.shape_cast %89 : vector<8x8x16xf32> to vector<8x128xf32>
    %c6 = arith.constant 6 : index
    %c0_66 = arith.constant 0 : index
    %c0_67 = arith.constant 0 : index
    %91 = vector.load %arg7[%c6, %c0_66, %c0_67] : memref<9x8x8xf32, #tpu.memory_space<vmem>>, vector<1x8x8xf32>
    %92 = vector.shape_cast %91 : vector<1x8x8xf32> to vector<8x8xf32>
    %cst_68 = arith.constant dense<0.000000e+00> : vector<8x128xf32>
    %93 = tpu.matmul %92, %90, %cst_68 {dimension_numbers = #tpu.dot_dimension_numbers<[1], [0], [0], [1], [0, 0, 1, 1], [], []>} : vector<8x8xf32>, vector<8x128xf32>, vector<8x128xf32> -> vector<8x128xf32>
    %94 = arith.addf %85, %93 : vector<8x128xf32>
    %c1_i32_69 = arith.constant 1 : i32
    %95 = arith.muli %0, %c1_i32_69 : i32
    %c2_i32_70 = arith.constant 2 : i32
    %96 = arith.addi %c2_i32_70, %95 : i32
    %c0_71 = arith.constant 0 : index
    %97 = arith.index_cast %96 : i32 to index
    %c1_72 = arith.constant 1 : index
    %98 = vector.load %arg10[%c0_71, %97, %c1_72] : memref<8x18x18xf32, #tpu.memory_space<vmem>>, vector<8x8x16xf32>
    %99 = vector.shape_cast %98 : vector<8x8x16xf32> to vector<8x128xf32>
    %c7 = arith.constant 7 : index
    %c0_73 = arith.constant 0 : index
    %c0_74 = arith.constant 0 : index
    %100 = vector.load %arg7[%c7, %c0_73, %c0_74] : memref<9x8x8xf32, #tpu.memory_space<vmem>>, vector<1x8x8xf32>
    %101 = vector.shape_cast %100 : vector<1x8x8xf32> to vector<8x8xf32>
    %cst_75 = arith.constant dense<0.000000e+00> : vector<8x128xf32>
    %102 = tpu.matmul %101, %99, %cst_75 {dimension_numbers = #tpu.dot_dimension_numbers<[1], [0], [0], [1], [0, 0, 1, 1], [], []>} : vector<8x8xf32>, vector<8x128xf32>, vector<8x128xf32> -> vector<8x128xf32>
    %103 = arith.addf %94, %102 : vector<8x128xf32>
    %c1_i32_76 = arith.constant 1 : i32
    %104 = arith.muli %0, %c1_i32_76 : i32
    %c2_i32_77 = arith.constant 2 : i32
    %105 = arith.addi %c2_i32_77, %104 : i32
    %c0_78 = arith.constant 0 : index
    %106 = arith.index_cast %105 : i32 to index
    %c2_79 = arith.constant 2 : index
    %107 = vector.load %arg10[%c0_78, %106, %c2_79] : memref<8x18x18xf32, #tpu.memory_space<vmem>>, vector<8x8x16xf32>
    %108 = vector.shape_cast %107 : vector<8x8x16xf32> to vector<8x128xf32>
    %c8 = arith.constant 8 : index
    %c0_80 = arith.constant 0 : index
    %c0_81 = arith.constant 0 : index
    %109 = vector.load %arg7[%c8, %c0_80, %c0_81] : memref<9x8x8xf32, #tpu.memory_space<vmem>>, vector<1x8x8xf32>
    %110 = vector.shape_cast %109 : vector<1x8x8xf32> to vector<8x8xf32>
    %cst_82 = arith.constant dense<0.000000e+00> : vector<8x128xf32>
    %111 = tpu.matmul %110, %108, %cst_82 {dimension_numbers = #tpu.dot_dimension_numbers<[1], [0], [0], [1], [0, 0, 1, 1], [], []>} : vector<8x8xf32>, vector<8x128xf32>, vector<8x128xf32> -> vector<8x128xf32>
    %112 = arith.addf %103, %111 : vector<8x128xf32>
    %c0_83 = arith.constant 0 : index
    %c0_84 = arith.constant 0 : index
    %c0_85 = arith.constant 0 : index
    %113 = vector.load %arg8[%c0_83, %c0_84, %c0_85] : memref<1x8x128xf32, #tpu.memory_space<vmem>>, vector<1x8x128xf32>
    %114 = vector.shape_cast %113 : vector<1x8x128xf32> to vector<8x128xf32>
    %115 = arith.addf %112, %114 : vector<8x128xf32>
    %c0_86 = arith.constant 0 : index
    %c0_87 = arith.constant 0 : index
    %c0_88 = arith.constant 0 : index
    %116 = vector.load %arg9[%c0_86, %c0_87, %c0_88] : memref<1x8x128xf32, #tpu.memory_space<vmem>>, vector<1x8x128xf32>
    %117 = vector.shape_cast %116 : vector<1x8x128xf32> to vector<8x128xf32>
    %118 = vector.shape_cast %115 : vector<8x128xf32> to vector<1x8x128xf32>
    tpu.vector_store %arg9[%c0_86, %c0_87, %c0_88], %118 {strides = array<i32>} : memref<1x8x128xf32, #tpu.memory_space<vmem>>, vector<1x8x128xf32>,
    return
  }
  func.func @transform_0(%arg0: i32, %arg1: i32) -> (i32, i32) {
    %c0_i32 = arith.constant 0 : i32
    %c0_i32_0 = arith.constant 0 : i32
    %c0_i32_1 = arith.constant 0 : i32
    return %c0_i32, %c0_i32_0 : i32, i32
  }
  func.func @transform_1(%arg0: i32, %arg1: i32) -> (i32, i32) {
    %c0_i32 = arith.constant 0 : i32
    %c0_i32_0 = arith.constant 0 : i32
    %c0_i32_1 = arith.constant 0 : i32
    return %c0_i32, %c0_i32_0 : i32, i32
  }
  func.func @transform_2(%arg0: i32, %arg1: i32) -> (i32, i32) {
    %c0_i32 = arith.constant 0 : i32
    %c0_i32_0 = arith.constant 0 : i32
    %c0_i32_1 = arith.constant 0 : i32
    return %c0_i32, %c0_i32_0 : i32, i32
  }
  func.func @transform_3(%arg0: i32, %arg1: i32) -> (i32, i32) {
    %c0_i32 = arith.constant 0 : i32
    %c0_i32_0 = arith.constant 0 : i32
    %c0_i32_1 = arith.constant 0 : i32
    return %c0_i32, %c0_i32_0 : i32, i32
  }
  func.func @transform_4(%arg0: i32, %arg1: i32) -> (i32, i32, i32) {
    %c0_i32 = arith.constant 0 : i32
    %c0_i32_0 = arith.constant 0 : i32
    %c0_i32_1 = arith.constant 0 : i32
    return %arg0, %c0_i32, %c0_i32_0 : i32, i32, i32
  }
  func.func @transform_5(%arg0: i32, %arg1: i32) -> (i32, i32, i32) {
    %c0_i32 = arith.constant 0 : i32
    %c0_i32_0 = arith.constant 0 : i32
    %c0_i32_1 = arith.constant 0 : i32
    %c0_i32_2 = arith.constant 0 : i32
    return %c0_i32, %c0_i32_0, %c0_i32_1 : i32, i32, i32
  }
  func.func @transform_6(%arg0: i32, %arg1: i32) -> (i32, i32, i32) {
    %c0_i32 = arith.constant 0 : i32
    %c0_i32_0 = arith.constant 0 : i32
    return %arg0, %c0_i32, %arg1 : i32, i32, i32
  }
  func.func @transform_7(%arg0: i32, %arg1: i32) -> (i32, i32, i32) {
    %c0_i32 = arith.constant 0 : i32
    %c0_i32_0 = arith.constant 0 : i32
    return %arg0, %c0_i32, %arg1 : i32, i32, i32
  }
}

</mosaic_0001>

<bundles_post_ra>
// kernel: preact_block_ew.6
= control target key start
LH: loop header
LB: loop body
LE: loop exit
PB: predicated region body
PF: predicated region fallthrough
CT: control target
= control target key end

     0   :  { %s228_s9 = smov 0   ;;  %s260_s0 = inlined_call_operand.vmem [shape: f32[2,8,256], index: 0, kind: input, shape index: {}]   ;;  %s261_s1 = inlined_call_operand.vmem [shape: f32[8,1], index: 1, kind: output, shape index: {0}]   ;;  %s262_s2 = inlined_call_operand.vmem [shape: f32[8,1], index: 2, kind: output, shape index: {1}]  }
   0x1 LB: > { %s185_s10 = sadd.s32 4294967295, %s210_s9   ;;  %p188_p0 = scmp.ge.s32.totalorder %s210_s9, 1  ;;  %s210_s9 = sphi %s228_s9, %s13_s9  }
   0x2   : > { %p105_p1 = scmp.lt.s32.totalorder %s210_s9, 3 }
   0x4   : > { %p106_p2 = pnand %p188_p0, %p105_p1 }
   0x5   : > { %p122_p3 = scmp.lt.s32.totalorder (!%p106_p2), %s185_s10, 1  ;;  %p191_p4 = scmp.ne.s32.totalorder (!%p106_p2), %s185_s10, 0 }
   0x6   : > { %109 = sbr.rel (%p106_p2) target bundleno = 150 (0x96), region = 24 }
   0xb   : > { %s123_s11 = scalar_select %p122_p3, %s185_s10, 1 }
   0xc   : > { %130 = sbr.rel (%p191_p4) target bundleno = 20 (0x14), region = 28 }
   0xd   : > { %s194_s12 = sshll.u32 %s123_s11, 4 }
   0xe   : > { %s126_s15 = scalar_lea.vmem %s260_s0, %s194_s12 }
  0x11   : > { %vm131_vm0 = vcmask 7168   ;;  %v212_v0 = vmov 0.0  }
  0x12   : > { %132 = vst.msk [vmem:[%s261_s1] sm:$0xff] %vm131_vm0, %v212_v0 }
  0x13   : > { %133 = vst.msk [vmem:[%s262_s2] sm:$0xff] %vm131_vm0, %v212_v0 }
  0x14 PF: > { %v134_v1 = vld [vmem:[%s126_s15] sm:$0xff]  ;;  %v135_v2 = vld [vmem:[%s126_s15 + $0x8] sm:$0xff]  ;;  %vm141_vm1 = vcmask 7168  }
  0x15   : > { %v137_v3 = vadd.f32 %v135_v2, %v134_v1  ;;  %v144_v4 = vmul.f32 %v134_v1, %v134_v1  ;;  %v145_v5 = vmul.f32 %v135_v2, %v135_v2 }
  0x17   : > { %138 = vadd.xlane.f32.xlu0 %v137_v3  ;;  %v146_v6 = vadd.f32 %v145_v5, %v144_v4 }
  0x19   : > { %v136_v7 = vld [vmem:[%s261_s1] sm:$0xff] }
  0x1a   : > { %v143_v10 = vld [vmem:[%s262_s2] sm:$0xff] }
  0x1f   : > { %147 = vadd.xlane.f32.xlu0 %v146_v6 }
  0x8a   : > { %v139_v8 = vpop.xlane.xlu0 %138 }
  0x8b   : > { %v140_v9 = vadd.f32 %v139_v8, %v136_v7 }
  0x8d   : > { %142 = vst.msk [vmem:[%s261_s1] sm:$0xff] %vm141_vm1, %v140_v9 }
  0x92   : > { %v148_v11 = vpop.xlane.xlu0 %147 }
  0x93   : > { %v149_v12 = vadd.f32 %v148_v11, %v143_v10 }
  0x95   : > { %150 = vst.msk [vmem:[%s262_s2] sm:$0xff] %vm141_vm1, %v149_v12 }
  0x96 PF: > { %s13_s9 = sadd.s32 1, %s210_s9  }
  0x97   : > { %p10_p5 = scmp.ge.s32.totalorder %s13_s9, 4  }
  0x99   :  { %12 = sbr.rel (!%p10_p5) target bundleno = 1 (0x1), region = 62 }

// kernel: preact_block_ew.4
= control target key start
LH: loop header
LB: loop body
LE: loop exit
PB: predicated region body
PF: predicated region fallthrough
CT: control target
= control target key end

     0   :  { %s243_s9 = smov 0   ;;  %s275_s0 = inlined_call_operand.vmem [shape: f32[2,4,256], index: 0, kind: input, shape index: {}]   ;;  %s276_s1 = inlined_call_operand.vmem [shape: f32[4,1], index: 1, kind: output, shape index: {0}]   ;;  %s277_s2 = inlined_call_operand.vmem [shape: f32[4,1], index: 2, kind: output, shape index: {1}]  }
   0x1 LB: > { %s200_s10 = sadd.s32 4294967295, %s225_s9   ;;  %p203_p0 = scmp.ge.s32.totalorder %s225_s9, 1  ;;  %s225_s9 = sphi %s243_s9, %s13_s9  }
   0x2   : > { %p105_p1 = scmp.lt.s32.totalorder %s225_s9, 3 }
   0x4   : > { %p106_p2 = pnand %p203_p0, %p105_p1 }
   0x5   : > { %p122_p3 = scmp.lt.s32.totalorder (!%p106_p2), %s200_s10, 1  ;;  %p206_p4 = scmp.ne.s32.totalorder (!%p106_p2), %s200_s10, 0 }
   0x6   : > { %109 = sbr.rel (%p106_p2) target bundleno = 159 (0x9f), region = 24 }
   0xb   : > { %s123_s11 = scalar_select %p122_p3, %s200_s10, 1 }
   0xc   : > { %130 = sbr.rel (%p206_p4) target bundleno = 20 (0x14), region = 28 }
   0xd   : > { %s209_s12 = sshll.u32 %s123_s11, 3 }
   0xe   : > { %s126_s15 = scalar_lea.vmem %s275_s0, %s209_s12 }
  0x11   : > { %vm131_vm0 = vcmask 3072   ;;  %v227_v0 = vmov 0.0  }
  0x12   : > { %132 = vst.msk [vmem:[%s276_s1] sm:$0xf] %vm131_vm0, %v227_v0 }
  0x13   : > { %133 = vst.msk [vmem:[%s277_s2] sm:$0xf] %vm131_vm0, %v227_v0 }
  0x14 PF: > { %v134_v1 = vld [vmem:[%s126_s15] sm:$0xff]  ;;  %vm142_vm1 = vcmask 1043456   ;;  %vm149_vm2 = vcmask 3072  }
  0x15   : > { %137 = vst [vmem:[#allocation1] ss:$2 sm:$0xff] %v134_v1  ;;  %v152_v2 = vmul.f32 %v134_v1, %v134_v1 }
  0x19   : > { %v135_v13 = vld [vmem:[%s276_s1] sm:$0xf] }
  0x1a   : > { %v151_v16 = vld [vmem:[%s277_s2] sm:$0xf] }
  0x1c   : > { %v138_v3 = vld.sshfl [vmem:[#allocation1] sm:$0xff pattern:$0x75316420]  ;;  %v139_v4 = vld.sshfl [vmem:[#allocation1 + $0x8] sm:$0xff pattern:$0x75316420] }
  0x1d   : > { %v143_v5 = vsel %vm142_vm1, %v138_v3, 0.0  ;;  %v144_v6 = vsel %vm142_vm1, %v139_v4, 0.0  ;;  %154 = vst [vmem:[#allocation1] ss:$2 sm:$0xff] %v152_v2 }
  0x1e   : > { %v145_v7 = vadd.f32 %v144_v6, %v143_v5 }
  0x20   : > { %146 = vadd.xlane.f32.xlu0 %v145_v7 }
  0x24   : > { %v155_v8 = vld.sshfl [vmem:[#allocation1] sm:$0xff pattern:$0x75316420]  ;;  %v156_v9 = vld.sshfl [vmem:[#allocation1 + $0x8] sm:$0xff pattern:$0x75316420] }
  0x25   : > { %v159_v10 = vsel %vm142_vm1, %v155_v8, 0.0  ;;  %v160_v11 = vsel %vm142_vm1, %v156_v9, 0.0 }
  0x26   : > { %v161_v12 = vadd.f32 %v160_v11, %v159_v10 }
  0x28   : > { %162 = vadd.xlane.f32.xlu0 %v161_v12 }
  0x93   : > { %v147_v14 = vpop.xlane.xlu0 %146 }
  0x94   : > { %v148_v15 = vadd.f32 %v147_v14, %v135_v13 }
  0x96   : > { %150 = vst.msk [vmem:[%s276_s1] sm:$0xf] %vm149_vm2, %v148_v15 }
  0x9b   : > { %v163_v17 = vpop.xlane.xlu0 %162 }
  0x9c   : > { %v164_v18 = vadd.f32 %v163_v17, %v151_v16 }
  0x9e   : > { %165 = vst.msk [vmem:[%s277_s2] sm:$0xf] %vm149_vm2, %v164_v18 }
  0x9f PF: > { %s13_s9 = sadd.s32 1, %s225_s9  }
  0xa0   : > { %p10_p5 = scmp.ge.s32.totalorder %s13_s9, 4  }
  0xa2   :  { %12 = sbr.rel (!%p10_p5) target bundleno = 1 (0x1), region = 62 }

// kernel: preact_block_ew.5
= control target key start
LH: loop header
LB: loop body
LE: loop exit
PB: predicated region body
PF: predicated region fallthrough
CT: control target
= control target key end

     0   :  { %s2367_s27 = smov 0   ;;  %s2369_s28 = smov 0   ;;  %s3284_s0 = inlined_call_operand.vmem [shape: f32[4,1], index: 0, kind: input, shape index: {}]   ;;  %s3285_s1 = inlined_call_operand.vmem [shape: f32[4,1], index: 1, kind: input, shape index: {}]   ;;  %s3286_s2 = inlined_call_operand.vmem [shape: f32[4,1], index: 2, kind: input, shape index: {}]   ;;  %s3287_s3 = inlined_call_operand.vmem [shape: f32[4,1], index: 3, kind: input, shape index: {}]   ;;  %s3288_s4 = inlined_call_operand.vmem [shape: f32[2,4,256], index: 4, kind: input, shape index: {}]   ;;  %s3289_s5 = inlined_call_operand.vmem [shape: f32[9,8,4], index: 5, kind: input, shape index: {}]   ;;  %s3290_s6 = inlined_call_operand.vmem [shape: f32[1,8,4], index: 6, kind: input, shape index: {}]   ;;  %s3291_s7 = inlined_call_operand.vmem [shape: f32[2,8,256], index: 7, kind: output, shape index: {0}]   ;;  %s3292_s8 = inlined_call_operand.vmem [shape: f32[2,8,256], index: 8, kind: output, shape index: {1}]  }
   0x1   :  { %s2371_s29 = smov 0   ;;  %s2373_s30 = smov 0  }
   0x2   :  { %s2375_s9 = smov 0  }
   0x3 LB: > { %s28_s10 = sadd.s32 1, %s2297_s29  ;;  %s31_s11 = sadd.s32 1, %s2301_s30  ;;  %s2305_s9 = sphi %s2375_s9, %s19_s9   ;;  %s2301_s30 = sphi %s2373_s30, %s3296_s30   ;;  %s2297_s29 = sphi %s2371_s29, %s3295_s29   ;;  %s2293_s28 = sphi %s2369_s28, %s3294_s28   ;;  %s2289_s27 = sphi %s2367_s27, %s3293_s27  }
   0x4   : > { %p29_p0 = scmp.ge.s32.totalorder %s28_s10, 2  ;;  %p2136_p1 = scmp.ge.s32.totalorder %s2305_s9, 1 }
   0x5   : > { %p281_p2 = scmp.lt.s32.totalorder %s2305_s9, 5 }
   0x6   : > { %s3298_s10 = smov (%p29_p0, %s28_s10), 0  ;;  %s3300_s11 = smov (!%p29_p0, %s31_s11), %s2301_s30 }
   0x7   : > { %p282_p3 = pnand %p2136_p1, %p281_p2  ;;  %p33_p4 = scmp.ge.s32.totalorder %s3300_s11, 2 }
   0x8   : > { %p326_p5 = scmp.lt.s32.totalorder (!%p282_p3), %s2293_s28, 1  ;;  %s2309_s24 = smov (!%p282_p3), 96  }
   0x9   : > { %s3302_s11 = smov (%p33_p4, %s3300_s11), 0  ;;  %285 = sbr.rel (%p282_p3) target bundleno = 981 (0x3d5), region = 48 }
   0xa   : > { %s2310_s25 = smov (!%p282_p3), 48   ;;  %s2311_s26 = smov (!%p282_p3), 112  }
   0xb   : > { %s2312_s12 = smov (!%p282_p3), 16   ;;  %s2313_s13 = smov (!%p282_p3), 80  }
   0xc   : > { %s2314_s14 = smov (!%p282_p3), 32   ;;  %s2315_s15 = smov (!%p282_p3), 64  }
   0xd   : > { %s2319_s16 = smov (!%p282_p3), 1   ;;  %s2143_s17 = sshll.u32 (!%p282_p3), %s2289_s27, 3 }
   0xe   : > { %v348_v0 = vld [vmem:[%s3284_s0] sm:$0xf]  ;;  %v2307_v2 = vmov 0   ;;  %s3304_s28 = smov (!%p326_p5, %s2293_s28), 1  ;;  %v2308_v21 = vmov 839922192  }
   0xf   : > { %v350_v1 = vld [vmem:[%s3285_s1] sm:$0xf]  ;;  %2264 = vset.pattern.permute.xlu0 %v2307_v2  ;;  %v349_v3 = vmul.f32 0.001953125, %v348_v0  ;;  %v377_v22 = vunpack.c.l.s4 %v2308_v21  ;;  %s2208_s20 = sshll.u32 %s3304_s28, 3  ;;  %v2316_v35 = vmov 1983009808  }
  0x10   : > { %v351_v4 = vmul.f32 0.001953125, %v350_v1  ;;  %v355_v14 = vld [vmem:[%s3286_s2] sm:$0xf]  ;;  %s330_s23 = scalar_lea.vmem %s3288_s4, %s2208_s20  ;;  %v449_v36 = vunpack.c.l.s4 %v2316_v35  ;;  %vm446_vm3 = vcmask 1047556   ;;  %v2317_v45 = vmov 1934713408  }
  0x11   : > { %v352_v5 = vmul.f32 %v349_v3, %v349_v3  ;;  %v368_v19 = vld [vmem:[%s3287_s3] sm:$0xf]  ;;  %v378_v24 = vunpack.c.0.s8 %v377_v22  ;;  %v463_v46 = vunpack.c.l.s4 %v2317_v45  ;;  %vm393_vm4 = vcmask 146432   ;;  %s2509_s18 = scalar_lea.vmem [#allocation2], %s2143_s17  ;;  %s2320_s19 = smov 127  }
  0x12   : > { %v371_v26 = vld [vmem:[%s330_s23] sm:$0xff]  ;;  %v2428_v42 = vunpack.c.0.s8 %v449_v36  ;;  %vm396_vm5 = vcmask 140288   ;;  %vm629_vm6 = vcmask 138248   ;;  %s2321_s20 = smov 126   ;;  %vm727_vm7 = vcmask 130048   ;;  %p333_p6 = scmp.lt.s32.totalorder %s2289_s27, 1 }
  0x13   : > { %v353_v6 = vsub.f32 %v351_v4, %v352_v5  ;;  %v2439_v59 = vunpack.c.0.s8 %v463_v46  ;;  %vm729_vm8 = vcmask 261120   ;;  %vm731_vm9 = vcmask 392192  }
  0x14   : > { %vm733_vm10 = vcmask 523264   ;;  %vm735_vm11 = vcmask 654336   ;;  %vm737_vm12 = vcmask 785408   ;;  %vm739_vm13 = vcmask 916480   ;;  %s3306_s27 = smov (!%p333_p6, %s2289_s27), 1 }
  0x15   : > { %v354_v7 = vmax.f32 %v353_v6, 0.0  ;;  %vm855_vm14 = vcmask 1043456   ;;  %vm851_vm15 = vcmask 31744  }
  0x17   : > { %v356_v8 = vadd.f32 1e-05, %v354_v7 }
  0x19   : > { %2265 = vrsqrt.f32 %v356_v8  ;;  %vm363_vm0 = vweird.f32 %v356_v8 }
  0x1f   : > { %v2266_v9 = vpop.eup %2265 }
  0x20   : > { %v358_v10 = vmul.f32 %v2266_v9, %v356_v8  ;;  %vm364_vm1 = vweird.f32 %v2266_v9 }
  0x21   : > { %vm365_vm2 = vmor %vm363_vm0, %vm364_vm1 }
  0x22   : > { %v359_v11 = vmul.f32 %v2266_v9, %v358_v10 }
  0x24   : > { %v360_v12 = vmul.f32 0.5, %v359_v11 }
  0x26   : > { %v361_v13 = vsub.f32 1.5, %v360_v12 }
  0x28   : > { %v362_v15 = vmul.f32 %v2266_v9, %v361_v13 }
  0x2a   : > { %v366_v16 = vsel %vm365_vm2, %v2266_v9, %v362_v15 }
  0x2b   : > { %v367_v17 = vmul.f32 %v366_v16, %v355_v14 }
  0x2d   : > { %374 = vperm.xlu0 %2264, %v367_v17   ;;  %v369_v18 = vmul.f32 %v367_v17, %v349_v3 }
  0x2f   : > { %v370_v20 = vsub.f32 %v368_v19, %v369_v18  ;;  %v2318_v18 = vmov 0.0  }
  0x30   : > { %398 = vst.msk [vmem:[#allocation2 + $0x18] sm:$0xff] %vm393_vm4, %v2318_v18 }
  0x31   : > { %399 = vst.msk [vmem:[#allocation2 + $0x20] sm:$0xff] %vm393_vm4, %v2318_v18 }
  0x32   : > { %394 = vst.msk [vmem:[#allocation2] sm:$0xff] %vm393_vm4, %v2318_v18 }
  0x33   : > { %395 = vst.msk [vmem:[#allocation2 + $0x8] sm:$0xff] %vm393_vm4, %v2318_v18 }
  0x34   : > { %401 = vst.msk [vmem:[#allocation2 + $0x30] sm:$0xff] %vm393_vm4, %v2318_v18 }
  0x35   : > { %384 = vperm.xlu0 %2264, %v370_v20   ;;  %402 = vst.msk [vmem:[#allocation2 + $0x38] sm:$0xff] %vm393_vm4, %v2318_v18 }
  0x36   : > { %404 = vst.msk [vmem:[#allocation2 + $0x48] sm:$0xff] %vm393_vm4, %v2318_v18 }
  0x37   : > { %405 = vst.msk [vmem:[#allocation2 + $0x50] sm:$0xff] %vm393_vm4, %v2318_v18 }
  0x38   : > { %403 = vst.msk [vmem:[#allocation2 + $0x40] sm:$0x3] %vm396_vm5, %v2318_v18 }
  0x39   : > { %397 = vst.msk [vmem:[#allocation2 + $0x10] sm:$0x3] %vm396_vm5, %v2318_v18 }
  0x3a   : > { %400 = vst.msk [vmem:[#allocation2 + $0x28] sm:$0x3] %vm396_vm5, %v2318_v18 }
  0x3b   : > { %406 = vst.msk [vmem:[#allocation2 + $0x58] sm:$0x3] %vm396_vm5, %v2318_v18 }
  0x9f   : > { %v375_v23 = vpop.permute.xlu0 %374 }
  0xa0   : > { %v379_v25 = vperm.slane %v375_v23, %v378_v24 }
  0xa2   : > { %v381_v28 = vmul.f32 %v379_v25, %v371_v26 }
  0xa7   : > { %v385_v27 = vpop.permute.xlu0 %384 }
  0xa8   : > { %v389_v29 = vperm.slane %v385_v27, %v378_v24 }
  0xaa   : > { %v391_v30 = vadd.f32 %v389_v29, %v381_v28 }
  0xac   : > { %v392_v31 = vmax.f32 %v391_v30, 0.0 }
  0xae   : > { %414 = vrot.lane.b32.xlu0 %v392_v31, %s2309_s24  ;;  %426 = vrot.lane.b32.xlu2 %v392_v31, %s2310_s25  ;;  %v408_v39 = vrot.slane %v392_v31, 4 }
  0xaf   : > { %410 = vrot.lane.b32.xlu1 %v392_v31, %s2311_s26 }
  0xb6   : > { %434 = vrot.lane.b32.xlu2 %v392_v31, %s2312_s12 }
  0xb7   : > { %418 = vrot.lane.b32.xlu1 %v392_v31, %s2313_s13 }
  0xbe   : > { %430 = vrot.lane.b32.xlu2 %v392_v31, %s2314_s14 }
  0xbf   : > { %422 = vrot.lane.b32.xlu1 %v392_v31, %s2315_s15 }
 0x108   : > { %v427_v32 = vpop.permute.xlu2 %426 }
 0x109   : > { %v428_v49 = vrot.slane %v427_v32, 4 }
 0x110   : > { %v435_v34 = vpop.permute.xlu2 %434 }
 0x111   : > { %v480_v38 = vrot.slane %v435_v34, 4  ;;  %v537_v54 = vsel %vm446_vm3, %v435_v34, %v428_v49 }
 0x112   : > { %v541_v0 = vperm.slane %v537_v54, %v2428_v42 }
 0x113   : > { %v481_v51 = vsel %vm446_vm3, %v480_v38, %v427_v32 }
 0x114   : > { %v485_v60 = vperm.slane %v481_v51, %v2428_v42  ;;  %v542_v11 = vrot.slane %v541_v0, 4 }
 0x116   : > { %v486_v8 = vrot.slane %v485_v60, 4 }
 0x118   : > { %v431_v55 = vpop.permute.xlu2 %430 }
 0x119   : > { %v474_v1 = vrot.slane %v431_v55, 4 }
 0x120   : > { %v415_v37 = vpop.permute.xlu0 %414 }
 0x121   : > { %v411_v33 = vpop.permute.xlu1 %410  ;;  %v445_v40 = vrot.slane %v415_v37, 4  ;;  %v503_v44 = vsel %vm446_vm3, %v415_v37, %v408_v39 }
 0x122   : > { %v412_v41 = vrot.slane %v411_v33, 4  ;;  %v507_v56 = vperm.slane %v503_v44, %v2428_v42 }
 0x123   : > { %v447_v52 = vsel %vm446_vm3, %v445_v40, %v392_v31 }
 0x124   : > { %v451_v61 = vperm.slane %v447_v52, %v2428_v42  ;;  %v516_v24 = vrot.slane %v507_v56, 4 }
 0x126   : > { %v460_v19 = vrot.slane %v451_v61, 4 }
 0x129   : > { %v419_v43 = vpop.permute.xlu1 %418 }
 0x12a   : > { %v452_v47 = vrot.slane %v419_v43, 4  ;;  %v509_v48 = vsel %vm446_vm3, %v419_v43, %v412_v41 }
 0x12b   : > { %v513_v50 = vperm.slane %v509_v48, %v2428_v42 }
 0x12c   : > { %v453_v53 = vsel %vm446_vm3, %v452_v47, %v411_v33 }
 0x12d   : > { %v457_v57 = vperm.slane %v453_v53, %v2428_v42  ;;  %v514_v58 = vrot.slane %v513_v50, 4  ;;  %v517_v29 = vsel %vm446_vm3, %v513_v50, %v516_v24 }
 0x12e   : > { %v525_v36 = vperm.slane %v517_v29, %v2439_v59 }
 0x12f   : > { %v458_v62 = vrot.slane %v457_v57, 4  ;;  %v515_v63 = vsel %vm446_vm3, %v514_v58, %v507_v56  ;;  %v461_v25 = vsel %vm446_vm3, %v457_v57, %v460_v19 }
 0x130   : > { %v521_v2 = vperm.slane %v515_v63, %v2439_v59  ;;  %v469_v32 = vperm.slane %v461_v25, %v2439_v59  ;;  %v528_v43 = vrot.slane %v525_v36, 4 }
 0x131   : > { %v423_v3 = vpop.permute.xlu1 %422  ;;  %v459_v4 = vsel %vm446_vm3, %v458_v62, %v451_v61 }
 0x132   : > { %v424_v5 = vrot.slane %v423_v3, 4  ;;  %v475_v6 = vsel %vm446_vm3, %v474_v1, %v423_v3  ;;  %v465_v7 = vperm.slane %v459_v4, %v2439_v59  ;;  %578 = vst [vmem:[#allocation1 + $0x10] ss:$2 sm:$0xff] %v521_v2  ;;  %v526_v10 = vrot.slane %v521_v2, 4 }
 0x133   : > { %v479_v9 = vperm.slane %v475_v6, %v2428_v42  ;;  %v472_v39 = vrot.slane %v469_v32, 4  ;;  %v529_v49 = vsel %vm446_vm3, 0.0, %v528_v43 }
 0x134   : > { %v531_v12 = vsel %vm446_vm3, %v431_v55, %v424_v5  ;;  %574 = vst [vmem:[#allocation1] ss:$2 sm:$0xff] %v465_v7  ;;  %v470_v13 = vrot.slane %v465_v7, 4  ;;  %v527_v17 = vsel %vm446_vm3, 0.0, %v526_v10 }
 0x135   : > { %v487_v14 = vsel %vm446_vm3, %v486_v8, %v479_v9  ;;  %v488_v15 = vrot.slane %v479_v9, 4  ;;  %v535_v16 = vperm.slane %v531_v12, %v2428_v42  ;;  %588 = vst [vmem:[#allocation1 + $0x30] ss:$2 sm:$0xff] %v527_v17  ;;  %v473_v46 = vsel %vm446_vm3, 0.0, %v472_v39 }
 0x136   : > { %v493_v20 = vperm.slane %v487_v14, %v2439_v59  ;;  %v471_v21 = vsel %vm446_vm3, 0.0, %v470_v13 }
 0x137   : > { %v544_v22 = vrot.slane %v535_v16, 4  ;;  %v543_v23 = vsel %vm446_vm3, %v542_v11, %v535_v16  ;;  %584 = vst [vmem:[#allocation1 + $0x20] ss:$2 sm:$0xff] %v471_v21  ;;  %v489_v28 = vsel %vm446_vm3, %v485_v60, %v488_v15 }
 0x138   : > { %576 = vst [vmem:[#allocation1 + $0x1] ss:$2 sm:$0xff] %v493_v20  ;;  %v549_v26 = vperm.slane %v543_v23, %v2439_v59  ;;  %v498_v27 = vrot.slane %v493_v20, 4  ;;  %v497_v34 = vperm.slane %v489_v28, %v2439_v59 }
 0x139   : > { %v545_v33 = vsel %vm446_vm3, %v541_v0, %v544_v22 }
 0x13a   : > { %580 = vst [vmem:[#allocation1 + $0x11] ss:$2 sm:$0xff] %v549_v26  ;;  %v499_v30 = vsel %vm446_vm3, 0.0, %v498_v27  ;;  %v554_v31 = vrot.slane %v549_v26, 4  ;;  %v553_v37 = vperm.slane %v545_v33, %v2439_v59  ;;  %v500_v40 = vrot.slane %v497_v34, 4 }
 0x13b   : > { %586 = vst [vmem:[#allocation1 + $0x21] ss:$2 sm:$0xff] %v499_v30 }
 0x13c   : > { %v555_v35 = vsel %vm446_vm3, 0.0, %v554_v31  ;;  %v556_v45 = vrot.slane %v553_v37, 4  ;;  %v501_v47 = vsel %vm446_vm3, 0.0, %v500_v40 }
 0x13d   : > { %590 = vst [vmem:[#allocation1 + $0x31] ss:$2 sm:$0xff] %v555_v35 }
 0x13e   : > { %v557_v50 = vsel %vm446_vm3, 0.0, %v556_v45 }
 0x13f   : > { %v581_v38 = vld.sshfl [vmem:[#allocation1] sm:$0xff pattern:$0x75316420] }
 0x140   : > { %605 = vrot.lane.b32.xlu0 %v581_v38, %s2319_s16  ;;  %593 = vst [vmem:[#allocation1] ss:$2 sm:$0xff] %v469_v32 }
 0x141   : > { %594 = vst [vmem:[#allocation1 + $0x1] ss:$2 sm:$0xff] %v497_v34  ;;  %v582_v41 = vld.sshfl [vmem:[#allocation1 + $0x10] sm:$0xff pattern:$0x75316420] }
 0x142   : > { %607 = vrot.lane.b32.xlu1 %v582_v41, %s2319_s16  ;;  %595 = vst [vmem:[#allocation1 + $0x10] ss:$2 sm:$0xff] %v525_v36  ;;  %v591_v44 = vld.sshfl [vmem:[#allocation1 + $0x20] sm:$0xff pattern:$0x75316420] }
 0x143   : > { %596 = vst [vmem:[#allocation1 + $0x11] ss:$2 sm:$0xff] %v553_v37  ;;  %609 = vrot.lane.b32.xlu2 %v591_v44, %s2319_s16 }
 0x144   : > { %599 = vst [vmem:[#allocation1 + $0x20] ss:$2 sm:$0xff] %v473_v46  ;;  %v592_v48 = vld.sshfl [vmem:[#allocation1 + $0x30] sm:$0xff pattern:$0x75316420] }
 0x145   : > { %600 = vst [vmem:[#allocation1 + $0x21] ss:$2 sm:$0xff] %v501_v47 }
 0x146   : > { %601 = vst [vmem:[#allocation1 + $0x30] ss:$2 sm:$0xff] %v529_v49 }
 0x147   : > { %602 = vst [vmem:[#allocation1 + $0x31] ss:$2 sm:$0xff] %v557_v50 }
 0x148   : > { %611 = vrot.lane.b32.xlu0 %v592_v48, %s2319_s16  ;;  %v597_v51 = vld.sshfl [vmem:[#allocation1] sm:$0xff pattern:$0x75316420] }
 0x14a   : > { %613 = vrot.lane.b32.xlu1 %v597_v51, %s2319_s16  ;;  %v598_v52 = vld.sshfl [vmem:[#allocation1 + $0x10] sm:$0xff pattern:$0x75316420] }
 0x14b   : > { %615 = vrot.lane.b32.xlu2 %v598_v52, %s2319_s16 }
 0x14c   : > { %v603_v53 = vld.sshfl [vmem:[#allocation1 + $0x20] sm:$0xff pattern:$0x75316420] }
 0x14e   : > { %v604_v54 = vld.sshfl [vmem:[#allocation1 + $0x30] sm:$0xff pattern:$0x75316420] }
 0x150   : > { %617 = vrot.lane.b32.xlu0 %v603_v53, %s2319_s16 }
 0x152   : > { %619 = vrot.lane.b32.xlu1 %v604_v54, %s2319_s16 }
 0x19d   : > { %v610_v55 = vpop.permute.xlu2 %609 }
 0x19e   : > { %632 = vst.msk [vmem:[#allocation2 + $0x19] sm:$0xff] %vm629_vm6, %v610_v55 }
 0x1a5   : > { %v616_v56 = vpop.permute.xlu2 %615 }
 0x1a6   : > { %635 = vst.msk [vmem:[#allocation2 + $0x39] sm:$0xff] %vm629_vm6, %v616_v56 }
 0x1b2   : > { %v606_v57 = vpop.permute.xlu0 %605 }
 0x1b3   : > { %630 = vst.msk [vmem:[#allocation2 + $0x1] sm:$0xff] %vm629_vm6, %v606_v57 }
 0x1b4   : > { %v608_v58 = vpop.permute.xlu1 %607 }
 0x1b5   : > { %631 = vst.msk [vmem:[#allocation2 + $0x9] sm:$0xff] %vm629_vm6, %v608_v58 }
 0x1ba   : > { %v612_v60 = vpop.permute.xlu0 %611 }
 0x1bb   : > { %633 = vst.msk [vmem:[#allocation2 + $0x21] sm:$0xff] %vm629_vm6, %v612_v60 }
 0x1bc   : > { %v614_v61 = vpop.permute.xlu1 %613 }
 0x1bd   : > { %634 = vst.msk [vmem:[#allocation2 + $0x31] sm:$0xff] %vm629_vm6, %v614_v61 }
 0x1c2   : > { %v618_v62 = vpop.permute.xlu0 %617 }
 0x1c3   : > { %636 = vst.msk [vmem:[#allocation2 + $0x49] sm:$0xff] %vm629_vm6, %v618_v62 }
 0x1c4   : > { %v620_v63 = vpop.permute.xlu1 %619 }
 0x1c5   : > { %637 = vst.msk [vmem:[#allocation2 + $0x51] sm:$0xff] %vm629_vm6, %v620_v63 }
 0x1cc   : > { %v641_v0 = vld [vmem:[%s2509_s18 + $0x30] sm:$0xff]  ;;  %v640_v1 = vld [vmem:[%s2509_s18 + $0x18] sm:$0xff]  ;;  %v639_v2 = vld [vmem:[%s2509_s18] sm:$0xff] }
 0x1cd   : > { %750 = vrot.lane.b32.xlu2 %v641_v0, %s2320_s19  ;;  %v643_v3 = vrot.slane %v641_v0, 4  ;;  %748 = vrot.lane.b32.xlu1 %v640_v1, %s2320_s19  ;;  %v908_v4 = vld [vmem:[%s2509_s18 + $0x48] sm:$0xff]  ;;  %v2166_v15 = vld [vmem:[%s2509_s18 + $0x31] sm:$0xff]  ;;  %v657_v22 = vrot.slane %v640_v1, 4  ;;  %v645_v23 = vrot.slane %v639_v2, 4 }
 0x1ce   : > { %746 = vrot.lane.b32.xlu0 %v639_v2, %s2320_s19  ;;  %v655_v5 = vrot.slane %v908_v4, 4  ;;  %v2529_v13 = vld [vmem:[%s2509_s18 + $0x49] sm:$0xff]  ;;  %v2540_v16 = vld [vmem:[%s2509_s18 + $0x19] sm:$0xff]  ;;  %v2164_v20 = vld [vmem:[%s2509_s18 + $0x1] sm:$0xff]  ;;  %v1051_v40 = vrot.slane %v2166_v15, 4 }
 0x1cf   : > { %v644_v6 = vsel %vm446_vm3, %v643_v3, %v639_v2  ;;  %v2546_v17 = vld [vmem:[%s2509_s18 + $0x4a] sm:$0xff]  ;;  %v2551_v18 = vld [vmem:[%s2509_s18 + $0x32] sm:$0xff]  ;;  %v2554_v19 = vld [vmem:[%s2509_s18 + $0x1a] sm:$0xff]  ;;  %v646_v24 = vsel %vm446_vm3, %v641_v0, %v645_v23  ;;  %v658_v25 = vsel %vm446_vm3, %v908_v4, %v657_v22  ;;  %v1065_v28 = vrot.slane %v2540_v16, 4 }
 0x1d0   : > { %v650_v7 = vperm.slane %v644_v6, %v2428_v42  ;;  %v656_v8 = vsel %vm446_vm3, %v655_v5, %v640_v1  ;;  %v2186_v21 = vld [vmem:[%s2509_s18 + $0x2] sm:$0xff]  ;;  %v654_v26 = vperm.slane %v646_v24, %v2428_v42  ;;  %v666_v27 = vperm.slane %v658_v25, %v2428_v42 }
 0x1d1   : > { %v662_v10 = vperm.slane %v656_v8, %v2428_v42  ;;  %v1457_v29 = vrot.slane %v2551_v18, 4  ;;  %v1066_v32 = vsel %vm446_vm3, %v2529_v13, %v1065_v28  ;;  %v1053_v34 = vrot.slane %v2164_v20, 4 }
 0x1d2   : > { %v669_v9 = vrot.slane %v650_v7, 4  ;;  %v679_v30 = vrot.slane %v666_v27, 4  ;;  %v681_v31 = vrot.slane %v654_v26, 4  ;;  %v1469_v35 = vrot.slane %v2546_v17, 4 }
 0x1d3   : > { %v667_v12 = vrot.slane %v662_v10, 4  ;;  %v1458_v33 = vsel %vm446_vm3, %v1457_v29, %v2186_v21  ;;  %v1074_v38 = vperm.slane %v1066_v32, %v2428_v42  ;;  %v1054_v44 = vsel %vm446_vm3, %v2166_v15, %v1053_v34 }
 0x1d4   : > { %v2526_v11 = vsel %vm446_vm3, %v662_v10, %v669_v9  ;;  %v682_v36 = vsel %vm446_vm3, %v666_v27, %v681_v31  ;;  %v680_v37 = vsel %vm446_vm3, %v679_v30, %v654_v26  ;;  %v2596_v39 = vperm.slane %v1458_v33, %v2428_v42 }
 0x1d5   : > { %915 = vrot.lane.b32.xlu2 %v640_v1, %s2321_s20  ;;  %919 = vrot.lane.b32.xlu1 %v908_v4, %s2321_s20  ;;  %v2532_v14 = vsel %vm446_vm3, %v667_v12, %v650_v7  ;;  %v690_v41 = vperm.slane %v682_v36, %v2439_v59  ;;  %v2600_v43 = vperm.slane %v680_v37, %v2439_v59  ;;  %v1087_v46 = vrot.slane %v1074_v38, 4 }
 0x1d6   : > { %752 = vrot.lane.b32.xlu0 %v908_v4, %s2320_s19  ;;  %v1470_v45 = vsel %vm446_vm3, %v1469_v35, %v2554_v19  ;;  %v1483_v47 = vrot.slane %v2596_v39, 4  ;;  %v1062_v48 = vperm.slane %v1054_v44, %v2428_v42  ;;  %v1052_v50 = vsel %vm446_vm3, %v1051_v40, %v2164_v20 }
 0x1d7   : > { %v2612_v49 = vperm.slane %v1470_v45, %v2428_v42  ;;  %v1063_v53 = vrot.slane %v2529_v13, 4  ;;  %v1471_v54 = vrot.slane %v2554_v19, 4  ;;  %v1058_v55 = vperm.slane %v1052_v50, %v2428_v42 }
 0x1d8   : > { %v1088_v51 = vsel %vm446_vm3, %v1087_v46, %v1062_v48  ;;  %v1459_v56 = vrot.slane %v2186_v21, 4  ;;  %v678_v60 = vperm.slane %v2526_v11, %v2439_v59  ;;  %v1089_v61 = vrot.slane %v1062_v48, 4 }
 0x1d9   : > { %v1484_v52 = vsel %vm446_vm3, %v2612_v49, %v1483_v47  ;;  %v1094_v57 = vperm.slane %v1088_v51, %v2439_v59  ;;  %v1064_v62 = vsel %vm446_vm3, %v1063_v53, %v2540_v16  ;;  %v2631_v63 = vperm.slane %v2532_v14, %v2439_v59 }
 0x1da   : > { %v2623_v58 = vperm.slane %v1484_v52, %v2439_v59  ;;  %v1472_v1 = vsel %vm446_vm3, %v2546_v17, %v1471_v54  ;;  %v1070_v3 = vperm.slane %v1064_v62, %v2428_v42  ;;  %v1090_v4 = vsel %vm446_vm3, %v1074_v38, %v1089_v61 }
 0x1db   : > { %v691_v5 = vrot.slane %v2631_v63, 4  ;;  %v1480_v6 = vperm.slane %v1472_v1, %v2428_v42  ;;  %v1098_v9 = vperm.slane %v1090_v4, %v2439_v59  ;;  %v693_v23 = vrot.slane %v678_v60, 4 }
 0x1dc   : > { %v695_v25 = vrot.slane %v2600_v43, 4  ;;  %v1481_v31 = vrot.slane %v2612_v49, 4  ;;  %v1103_v34 = vrot.slane %v1094_v57, 4 }
 0x1dd   : > { %1185 = vrot.lane.b32.xlu2 %v2529_v13, %s2320_s19  ;;  %913 = vrot.lane.b32.xlu1 %v639_v2, %s2321_s20  ;;  %v1460_v2 = vsel %vm446_vm3, %v2551_v18, %v1459_v56  ;;  %v692_v11 = vsel %vm446_vm3, 0.0, %v691_v5  ;;  %v1493_v12 = vrot.slane %v1480_v6, 4  ;;  %v694_v27 = vsel %vm446_vm3, 0.0, %v693_v23 }
 0x1de   : > { %917 = vrot.lane.b32.xlu0 %v641_v0, %s2321_s20  ;;  %v1077_v0 = vrot.slane %v1058_v55, 4  ;;  %v1468_v8 = vperm.slane %v1460_v2, %v2428_v42  ;;  %v696_v30 = vsel %vm446_vm3, 0.0, %v695_v25  ;;  %v1482_v35 = vsel %vm446_vm3, %v1481_v31, %v2596_v39 }
 0x1df   : > { %v2686_v40 = vperm.slane %v1482_v35, %v2439_v59  ;;  %v1105_v46 = vrot.slane %v1098_v9, 4 }
 0x1e0   : > { %v1078_v7 = vsel %vm446_vm3, %v1070_v3, %v1077_v0 }
 0x1e1   : > { %v1086_v10 = vperm.slane %v1078_v7, %v2439_v59  ;;  %v1505_v39 = vrot.slane %v2686_v40, 4  ;;  %v1106_v52 = vsel %vm446_vm3, 0.0, %v1105_v46 }
 0x1e3   : > { %v1101_v24 = vrot.slane %v1086_v10, 4  ;;  %v1506_v50 = vsel %vm446_vm3, 0.0, %v1505_v39 }
 0x1e5   : > { %1183 = vrot.lane.b32.xlu2 %v2166_v15, %s2320_s19  ;;  %1181 = vrot.lane.b32.xlu1 %v2540_v16, %s2320_s19  ;;  %v1102_v28 = vsel %vm446_vm3, 0.0, %v1101_v24 }
 0x1e6   : > { %1591 = vrot.lane.b32.xlu0 %v2546_v17, %s2320_s19 }
 0x1ed   : > { %1589 = vrot.lane.b32.xlu2 %v2551_v18, %s2320_s19  ;;  %1587 = vrot.lane.b32.xlu1 %v2554_v19, %s2320_s19 }
 0x1ee   : > { %1325 = vrot.lane.b32.xlu0 %v2529_v13, %s2321_s20 }
 0x1f5   : > { %1323 = vrot.lane.b32.xlu2 %v2166_v15, %s2321_s20  ;;  %1321 = vrot.lane.b32.xlu1 %v2540_v16, %s2321_s20 }
 0x1f6   : > { %1179 = vrot.lane.b32.xlu0 %v2164_v20, %s2320_s19 }
 0x1fd   : > { %1731 = vrot.lane.b32.xlu2 %v2546_v17, %s2321_s20  ;;  %1319 = vrot.lane.b32.xlu1 %v2164_v20, %s2321_s20 }
 0x1fe   : > { %1585 = vrot.lane.b32.xlu0 %v2186_v21, %s2320_s19 }
 0x205   : > { %1872 = vrot.lane.b32.xlu2 %v2529_v13, %s2320_s19  ;;  %1729 = vrot.lane.b32.xlu1 %v2551_v18, %s2321_s20  ;;  %v1495_v13 = vrot.slane %v1468_v8, 4 }
 0x206   : > { %1727 = vrot.lane.b32.xlu0 %v2554_v19, %s2321_s20 }
 0x207   : > { %v1496_v17 = vsel %vm446_vm3, %v1480_v6, %v1495_v13 }
 0x208   : > { %v2657_v19 = vperm.slane %v1496_v17, %v2439_v59 }
 0x20d   : > { %1870 = vrot.lane.b32.xlu2 %v2166_v15, %s2320_s19  ;;  %1868 = vrot.lane.b32.xlu1 %v2540_v16, %s2320_s19  ;;  %v1494_v15 = vsel %vm446_vm3, %v1493_v12, %v1468_v8  ;;  %v697_v16 = vrot.slane %v690_v41, 4 }
 0x20e   : > { %1725 = vrot.lane.b32.xlu0 %v2186_v21, %s2321_s20  ;;  %v1500_v18 = vperm.slane %v1494_v15, %v2439_v59  ;;  %v1075_v21 = vrot.slane %v1070_v3, 4 }
 0x210   : > { %v1076_v26 = vsel %vm446_vm3, %v1075_v21, %v1058_v55  ;;  %v1509_v33 = vrot.slane %v1500_v18, 4 }
 0x211   : > { %v2671_v29 = vperm.slane %v1076_v26, %v2439_v59 }
 0x212   : > { %v1510_v38 = vsel %vm446_vm3, 0.0, %v1509_v33 }
 0x213   : > { %v1099_v32 = vrot.slane %v2671_v29, 4 }
 0x215   : > { %720 = vrot.lane.b32.xlu1 %v690_v41, %s2309_s24  ;;  %712 = vrot.lane.b32.xlu2 %v2600_v43, %s2315_s15  ;;  %v1100_v37 = vsel %vm446_vm3, 0.0, %v1099_v32  ;;  %v1104_v41 = vsel %vm446_vm3, 0.0, %v1103_v34 }
 0x216   : > { %1866 = vrot.lane.b32.xlu0 %v2164_v20, %s2320_s19  ;;  %v698_v20 = vsel %vm446_vm3, 0.0, %v697_v16 }
 0x21d   : > { %1120 = vrot.lane.b32.xlu1 %v1094_v57, %s2315_s15  ;;  %1518 = vrot.lane.b32.xlu2 %v2623_v58, %s2314_s14 }
 0x21e   : > { %704 = vrot.lane.b32.xlu0 %v678_v60, %s2314_s14  ;;  %v1507_v60 = vrot.slane %v2623_v58, 4 }
 0x220   : > { %v1508_v6 = vsel %vm446_vm3, 0.0, %v1507_v60 }
 0x225   : > { %1128 = vrot.lane.b32.xlu1 %v1098_v9, %s2309_s24  ;;  %700 = vrot.lane.b32.xlu2 %v692_v11, %s2312_s12 }
 0x226   : > { %1112 = vrot.lane.b32.xlu0 %v1086_v10, %s2314_s14 }
 0x227   : > { %v751_v14 = vpop.permute.xlu2 %750 }
 0x228   : > { %v758_v47 = vrot.slane %v751_v14, 4 }
 0x22d   : > { %1526 = vrot.lane.b32.xlu1 %v1500_v18, %s2315_s15  ;;  %724 = vrot.lane.b32.xlu2 %v698_v20, %s2311_s26 }
 0x22e   : > { %1534 = vrot.lane.b32.xlu0 %v2657_v19, %s2309_s24 }
 0x22f   : > { %v2664_v22 = vpop.permute.xlu2 %915 }
 0x230   : > { %v939_v15 = vrot.slane %v2664_v22, 4 }
 0x235   : > { %708 = vrot.lane.b32.xlu1 %v694_v27, %s2310_s25  ;;  %1116 = vrot.lane.b32.xlu2 %v1102_v28, %s2310_s25 }
 0x236   : > { %716 = vrot.lane.b32.xlu0 %v696_v30, %s2313_s13 }
 0x237   : > { %v2681_v36 = vpop.permute.xlu2 %1185 }
 0x23d   : > { %1108 = vrot.lane.b32.xlu1 %v1100_v37, %s2312_s12  ;;  %1530 = vrot.lane.b32.xlu2 %v1510_v38, %s2313_s13 }
 0x23e   : > { %1124 = vrot.lane.b32.xlu0 %v1104_v41, %s2313_s13 }
 0x23f   : > { %v749_v43 = vpop.permute.xlu1 %748  ;;  %v2694_v49 = vpop.permute.xlu2 %1183 }
 0x240   : > { %v747_v44 = vpop.permute.xlu0 %746  ;;  %v772_v54 = vrot.slane %v749_v43, 4 }
 0x241   : > { %v760_v45 = vrot.slane %v747_v44, 4  ;;  %v759_v51 = vsel %vm446_vm3, %v758_v47, %v747_v44 }
 0x242   : > { %v765_v56 = vperm.slane %v759_v51, %v2428_v42 }
 0x243   : > { %v761_v48 = vsel %vm446_vm3, %v751_v14, %v760_v45  ;;  %v1511_v14 = vrot.slane %v2657_v19, 4 }
 0x244   : > { %v769_v53 = vperm.slane %v761_v48, %v2428_v42  ;;  %v784_v4 = vrot.slane %v765_v56, 4 }
 0x245   : > { %1514 = vrot.lane.b32.xlu1 %v1506_v50, %s2312_s12  ;;  %v1512_v28 = vsel %vm446_vm3, 0.0, %v1511_v14 }
 0x246   : > { %1132 = vrot.lane.b32.xlu0 %v1106_v52, %s2311_s26  ;;  %v796_v1 = vrot.slane %v769_v53, 4 }
 0x247   : > { %v920_v55 = vpop.permute.xlu1 %919  ;;  %v2716_v9 = vpop.permute.xlu2 %1589 }
 0x248   : > { %v753_v57 = vpop.permute.xlu0 %752  ;;  %v937_v61 = vrot.slane %v920_v55, 4  ;;  %v940_v23 = vsel %vm446_vm3, %v920_v55, %v939_v15  ;;  %v1203_v55 = vrot.slane %v2681_v36, 4 }
 0x249   : > { %v770_v62 = vrot.slane %v753_v57, 4  ;;  %v773_v0 = vsel %vm446_vm3, %v753_v57, %v772_v54  ;;  %v948_v30 = vperm.slane %v940_v23, %v2428_v42 }
 0x24a   : > { %v781_v2 = vperm.slane %v773_v0, %v2428_v42  ;;  %v938_v8 = vsel %vm446_vm3, %v937_v61, %v2664_v22 }
 0x24b   : > { %v771_v3 = vsel %vm446_vm3, %v770_v62, %v749_v43  ;;  %v944_v16 = vperm.slane %v938_v8, %v2428_v42  ;;  %v961_v46 = vrot.slane %v948_v30, 4 }
 0x24c   : > { %v777_v5 = vperm.slane %v771_v3, %v2428_v42  ;;  %v797_v7 = vsel %vm446_vm3, %v781_v2, %v796_v1  ;;  %v794_v26 = vrot.slane %v781_v2, 4 }
 0x24d   : > { %1522 = vrot.lane.b32.xlu1 %v1508_v6, %s2310_s25  ;;  %v2714_v58 = vperm.slane %v797_v7, %v2439_v59  ;;  %v949_v22 = vrot.slane %v944_v16, 4 }
 0x24e   : > { %v782_v10 = vrot.slane %v777_v5, 4  ;;  %v785_v11 = vsel %vm446_vm3, %v777_v5, %v784_v4  ;;  %v795_v43 = vsel %vm446_vm3, %v794_v26, %v769_v53 }
 0x24f   : > { %835 = vrot.lane.b32.xlu0 %v2714_v58, %s2309_s24  ;;  %v914_v12 = vpop.permute.xlu1 %913  ;;  %v2722_v13 = vperm.slane %v785_v11, %v2439_v59  ;;  %v1324_v37 = vpop.permute.xlu2 %1323  ;;  %v2755_v45 = vperm.slane %v795_v43, %v2439_v59  ;;  %v1597_v11 = vrot.slane %v2716_v9, 4 }
 0x250   : > { %v927_v17 = vrot.slane %v914_v12, 4  ;;  %v918_v18 = vpop.permute.xlu0 %917  ;;  %v2728_v20 = vsel %vm446_vm3, %v782_v10, %v765_v56  ;;  %v1191_v56 = vrot.slane %v2694_v49, 4  ;;  %v1331_v23 = vrot.slane %v1324_v37, 4 }
 0x251   : > { %v925_v21 = vrot.slane %v918_v18, 4  ;;  %819 = vrot.lane.b32.xlu2 %v2722_v13, %s2314_s14 }
 0x252   : > { %v928_v24 = vsel %vm446_vm3, %v918_v18, %v927_v17 }
 0x253   : > { %v926_v25 = vsel %vm446_vm3, %v925_v21, %v914_v12  ;;  %v936_v19 = vperm.slane %v928_v24, %v2428_v42 }
 0x254   : > { %v932_v27 = vperm.slane %v926_v25, %v2428_v42 }
 0x255   : > { %v963_v31 = vrot.slane %v936_v19, 4  ;;  %1538 = vrot.lane.b32.xlu1 %v1512_v28, %s2311_s26  ;;  %v962_v48 = vsel %vm446_vm3, %v961_v46, %v936_v19 }
 0x256   : > { %v951_v32 = vrot.slane %v932_v27, 4  ;;  %v2741_v33 = vsel %vm446_vm3, %v949_v22, %v932_v27  ;;  %v2767_v53 = vperm.slane %v962_v48, %v2439_v59 }
 0x257   : > { %v1182_v34 = vpop.permute.xlu1 %1181  ;;  %v964_v35 = vsel %vm446_vm3, %v948_v30, %v963_v31  ;;  %v2764_v52 = vpop.permute.xlu2 %1731 }
 0x258   : > { %v1592_v38 = vpop.permute.xlu0 %1591  ;;  %v2745_v41 = vperm.slane %v964_v35, %v2439_v59  ;;  %v952_v44 = vsel %vm446_vm3, %v944_v16, %v951_v32  ;;  %v1205_v51 = vrot.slane %v1182_v34, 4  ;;  %v1204_v60 = vsel %vm446_vm3, %v1203_v55, %v1182_v34 }
 0x259   : > { %v2752_v39 = vperm.slane %v952_v44, %v2439_v59  ;;  %v2782_v4 = vperm.slane %v1204_v60, %v2428_v42  ;;  %v1609_v12 = vrot.slane %v1592_v38, 4 }
 0x25a   : > { %1002 = vrot.lane.b32.xlu0 %v2745_v41, %s2309_s24  ;;  %v1206_v54 = vsel %vm446_vm3, %v2681_v36, %v1205_v51 }
 0x25b   : > { %986 = vrot.lane.b32.xlu2 %v2752_v39, %s2314_s14  ;;  %v1214_v61 = vperm.slane %v1206_v54, %v2428_v42 }
 0x25d   : > { %827 = vrot.lane.b32.xlu1 %v2755_v45, %s2315_s15  ;;  %v1227_v5 = vrot.slane %v1214_v61, 4 }
 0x25f   : > { %v1588_v47 = vpop.permute.xlu1 %1587  ;;  %v2786_v6 = vpop.permute.xlu2 %1872 }
 0x260   : > { %v2762_v50 = vpop.permute.xlu0 %1325  ;;  %v1611_v62 = vrot.slane %v1588_v47, 4  ;;  %v1610_v24 = vsel %vm446_vm3, %v1609_v12, %v1588_v47 }
 0x261   : > { %v2816_v32 = vperm.slane %v1610_v24, %v2428_v42  ;;  %v1343_v48 = vrot.slane %v2762_v50, 4 }
 0x262   : > { %v1612_v7 = vsel %vm446_vm3, %v1592_v38, %v1611_v62 }
 0x263   : > { %994 = vrot.lane.b32.xlu2 %v2767_v53, %s2315_s15  ;;  %v2796_v16 = vperm.slane %v1612_v7, %v2428_v42 }
 0x265   : > { %v1633_v34 = vrot.slane %v2796_v16, 4 }
 0x267   : > { %v1322_v57 = vpop.permute.xlu1 %1321  ;;  %v2831_v51 = vpop.permute.xlu2 %1870 }
 0x268   : > { %v1180_v0 = vpop.permute.xlu0 %1179 }
 0x269   : > { %v1192_v1 = vsel %vm446_vm3, %v1191_v56, %v1180_v0  ;;  %v1193_v2 = vrot.slane %v1180_v0, 4 }
 0x26a   : > { %v2779_v3 = vperm.slane %v1192_v1, %v2428_v42 }
 0x26b   : > { %v1194_v36 = vsel %vm446_vm3, %v2694_v49, %v1193_v2  ;;  %v1345_v49 = vrot.slane %v1322_v57, 4  ;;  %v1749_v2 = vrot.slane %v2764_v52, 4 }
 0x26c   : > { %v1202_v8 = vperm.slane %v1194_v36, %v2428_v42  ;;  %v1217_v10 = vrot.slane %v2779_v3, 4 }
 0x26d   : > { %v1346_v35 = vsel %vm446_vm3, %v2762_v50, %v1345_v49  ;;  %v1344_v50 = vsel %vm446_vm3, %v1343_v48, %v1322_v57 }
 0x26e   : > { %v1218_v14 = vsel %vm446_vm3, %v2782_v4, %v1217_v10  ;;  %v1228_v15 = vsel %vm446_vm3, %v1227_v5, %v1202_v8  ;;  %v1229_v25 = vrot.slane %v1202_v8, 4  ;;  %v1354_v54 = vperm.slane %v1346_v35, %v2428_v42 }
 0x26f   : > { %v1320_v17 = vpop.permute.xlu1 %1319  ;;  %v2799_v18 = vperm.slane %v1218_v14, %v2439_v59  ;;  %v2802_v21 = vperm.slane %v1228_v15, %v2439_v59  ;;  %v2856_v7 = vperm.slane %v1344_v50, %v2428_v42  ;;  %v2870_v24 = vpop.permute.xlu2 %712 }
 0x270   : > { %v1333_v19 = vrot.slane %v1320_v17, 4  ;;  %v1586_v22 = vpop.permute.xlu0 %1585  ;;  %v1332_v28 = vsel %vm446_vm3, %v1331_v23, %v1320_v17  ;;  %v1230_v46 = vsel %vm446_vm3, %v1214_v61, %v1229_v25  ;;  %v1367_v5 = vrot.slane %v1354_v54, 4 }
 0x271   : > { %v1598_v26 = vsel %vm446_vm3, %v1597_v11, %v1586_v22  ;;  %v1599_v27 = vrot.slane %v1586_v22, 4  ;;  %1252 = vrot.lane.b32.xlu0 %v2799_v18, %s2314_s14  ;;  %1260 = vrot.lane.b32.xlu1 %v2802_v21, %s2315_s15  ;;  %v2828_v47 = vperm.slane %v1332_v28, %v2428_v42  ;;  %v2838_v60 = vperm.slane %v1230_v46, %v2439_v59 }
 0x272   : > { %v1334_v30 = vsel %vm446_vm3, %v1324_v37, %v1333_v19  ;;  %v2813_v31 = vperm.slane %v1598_v26, %v2428_v42 }
 0x273   : > { %v1600_v38 = vsel %vm446_vm3, %v2716_v9, %v1599_v27  ;;  %v1342_v43 = vperm.slane %v1334_v30, %v2428_v42  ;;  %v1357_v36 = vrot.slane %v2828_v47, 4  ;;  %v1890_v30 = vrot.slane %v2786_v6, 4 }
 0x274   : > { %v1608_v44 = vperm.slane %v1600_v38, %v2428_v42  ;;  %v1623_v37 = vrot.slane %v2813_v31, 4 }
 0x275   : > { %v1369_v0 = vrot.slane %v1342_v43, 4  ;;  %v1368_v10 = vsel %vm446_vm3, %v1367_v5, %v1342_v43  ;;  %v1358_v11 = vsel %vm446_vm3, %v2856_v7, %v1357_v36 }
 0x276   : > { %v1634_v55 = vsel %vm446_vm3, %v1633_v34, %v1608_v44  ;;  %v1624_v9 = vsel %vm446_vm3, %v2816_v32, %v1623_v37  ;;  %v2868_v23 = vperm.slane %v1368_v10, %v2439_v59  ;;  %v2873_v19 = vperm.slane %v1358_v11, %v2439_v59 }
 0x277   : > { %v1730_v56 = vpop.permute.xlu1 %1729  ;;  %v2841_v61 = vperm.slane %v1634_v55, %v2439_v59  ;;  %v2844_v62 = vperm.slane %v1624_v9, %v2439_v59  ;;  %v1370_v8 = vsel %vm446_vm3, %v1354_v54, %v1369_v0  ;;  %v1635_v22 = vrot.slane %v1608_v44, 4 }
 0x278   : > { %v1728_v1 = vpop.permute.xlu0 %1727  ;;  %v1737_v14 = vrot.slane %v1730_v56, 4  ;;  %v2865_v17 = vperm.slane %v1370_v8, %v2439_v59  ;;  %v2912_v8 = vpop.permute.xlu2 %1518 }
 0x279   : > { %1268 = vrot.lane.b32.xlu0 %v2838_v60, %s2309_s24  ;;  %1666 = vrot.lane.b32.xlu1 %v2841_v61, %s2315_s15  ;;  %v1750_v57 = vsel %vm446_vm3, %v1749_v2, %v1728_v1  ;;  %v1751_v15 = vrot.slane %v1728_v1, 4  ;;  %v1636_v54 = vsel %vm446_vm3, %v2796_v16, %v1635_v22 }
 0x27a   : > { %1658 = vrot.lane.b32.xlu2 %v2844_v62, %s2314_s14  ;;  %v1756_v12 = vperm.slane %v1750_v57, %v2428_v42  ;;  %v2907_v16 = vperm.slane %v1636_v54, %v2439_v59  ;;  %v810_v54 = vrot.slane %v2755_v45, 4  ;;  %v1215_v45 = vrot.slane %v2782_v4, 4 }
 0x27b   : > { %v1752_v38 = vsel %vm446_vm3, %v2764_v52, %v1751_v15  ;;  %v1878_v52 = vrot.slane %v2831_v51, 4 }
 0x27c   : > { %v1761_v34 = vrot.slane %v1756_v12, 4  ;;  %v1760_v55 = vperm.slane %v1752_v38, %v2428_v42 }
 0x27e   : > { %v1773_v57 = vrot.slane %v1760_v55, 4 }
 0x27f   : > { %v1869_v49 = vpop.permute.xlu1 %1868 }
 0x280   : > { %v1726_v25 = vpop.permute.xlu0 %1725  ;;  %v1892_v26 = vrot.slane %v1869_v49, 4  ;;  %v1891_v43 = vsel %vm446_vm3, %v1890_v30, %v1869_v49 }
 0x281   : > { %v1738_v27 = vsel %vm446_vm3, %v1737_v14, %v1726_v25  ;;  %v1739_v28 = vrot.slane %v1726_v25, 4  ;;  %1408 = vrot.lane.b32.xlu0 %v2865_v17, %s2309_s24  ;;  %1400 = vrot.lane.b32.xlu1 %v2868_v23, %s2315_s15  ;;  %v1897_v50 = vperm.slane %v1891_v43, %v2428_v42 }
 0x282   : > { %v1744_v35 = vperm.slane %v1738_v27, %v2428_v42  ;;  %1392 = vrot.lane.b32.xlu2 %v2873_v19, %s2314_s14  ;;  %v1893_v46 = vsel %vm446_vm3, %v2786_v6, %v1892_v26 }
 0x283   : > { %v1740_v48 = vsel %vm446_vm3, %v1730_v56, %v1739_v28  ;;  %v1901_v6 = vperm.slane %v1893_v46, %v2428_v42  ;;  %v1902_v11 = vrot.slane %v1897_v50, 4  ;;  %v808_v46 = vrot.slane %v2722_v13, 4 }
 0x284   : > { %v1763_v44 = vrot.slane %v1744_v35, 4  ;;  %v2888_v37 = vsel %vm446_vm3, %v1761_v34, %v1744_v35  ;;  %v1748_v56 = vperm.slane %v1740_v48, %v2428_v42  ;;  %v811_v13 = vsel %vm446_vm3, 0.0, %v810_v54 }
 0x285   : > { %v1914_v14 = vrot.slane %v1901_v6, 4 }
 0x286   : > { %v1764_v9 = vsel %vm446_vm3, %v1756_v12, %v1763_v44  ;;  %v1774_v25 = vsel %vm446_vm3, %v1773_v57, %v1748_v56  ;;  %v1775_v35 = vrot.slane %v1748_v56, 4  ;;  %v701_v44 = vpop.permute.xlu2 %700  ;;  %v2959_v56 = vperm.slane %v2728_v20, %v2439_v59 }
 0x287   : > { %v2899_v0 = vpop.permute.xlu1 %720  ;;  %v2902_v1 = vperm.slane %v1764_v9, %v2439_v59  ;;  %v2929_v34 = vperm.slane %v1774_v25, %v2439_v59  ;;  %v1216_v20 = vsel %vm446_vm3, %v1215_v45, %v2779_v3  ;;  %v1621_v3 = vrot.slane %v2816_v32, 4 }
 0x288   : > { %v1867_v2 = vpop.permute.xlu0 %1866  ;;  %v1776_v48 = vsel %vm446_vm3, %v1760_v55, %v1775_v35  ;;  %v975_v55 = vrot.slane %v2752_v39, 4  ;;  %v2979_v4 = vperm.slane %v1216_v20, %v2439_v59  ;;  %v2983_v39 = vperm.slane %v2741_v33, %v2439_v59 }
 0x289   : > { %v1879_v36 = vsel %vm446_vm3, %v1878_v52, %v1867_v2  ;;  %v1880_v5 = vrot.slane %v1867_v2, 4  ;;  %1798 = vrot.lane.b32.xlu0 %v2902_v1, %s2314_s14  ;;  %v2952_v52 = vperm.slane %v1776_v48, %v2439_v59  ;;  %v806_v2 = vrot.slane %v2959_v56, 4 }
 0x28a   : > { %v1885_v10 = vperm.slane %v1879_v36, %v2428_v42  ;;  %1674 = vrot.lane.b32.xlu2 %v2907_v16, %s2309_s24  ;;  %v979_v36 = vrot.slane %v2745_v41, 4  ;;  %v812_v33 = vrot.slane %v2714_v58, 4  ;;  %v1622_v25 = vsel %vm446_vm3, %v1621_v3, %v2813_v31 }
 0x28b   : > { %v1881_v12 = vsel %vm446_vm3, %v2831_v51, %v1880_v5  ;;  %v3007_v31 = vperm.slane %v1622_v25, %v2439_v59 }
 0x28c   : > { %v1889_v15 = vperm.slane %v1881_v12, %v2428_v42  ;;  %v1904_v49 = vrot.slane %v1885_v10, 4  ;;  %v2922_v22 = vsel %vm446_vm3, %v1902_v11, %v1885_v10  ;;  %v976_v11 = vsel %vm446_vm3, 0.0, %v975_v55 }
 0x28d   : > { %v807_v12 = vsel %vm446_vm3, 0.0, %v806_v2  ;;  %v980_v41 = vsel %vm446_vm3, 0.0, %v979_v36  ;;  %v813_v58 = vsel %vm446_vm3, 0.0, %v812_v33  ;;  %v1645_v45 = vrot.slane %v3007_v31, 4 }
 0x28e   : > { %v1916_v26 = vrot.slane %v1889_v15, 4  ;;  %v1905_v27 = vsel %vm446_vm3, %v1897_v50, %v1904_v49  ;;  %v1915_v28 = vsel %vm446_vm3, %v1914_v14, %v1889_v15  ;;  %v725_v5 = vpop.permute.xlu2 %724  ;;  %v1239_v14 = vrot.slane %v2979_v4, 4 }
 0x28f   : > { %v2926_v30 = vpop.permute.xlu1 %1120  ;;  %v2932_v51 = vperm.slane %v1905_v27, %v2439_v59  ;;  %v2935_v42 = vperm.slane %v1915_v28, %v2439_v59  ;;  %v973_v15 = vrot.slane %v2983_v39, 4  ;;  %v728_v49 = vsel %vm727_vm7, %v2631_v63, %v701_v44 }
 0x290   : > { %v705_v38 = vpop.permute.xlu0 %704  ;;  %v2938_v43 = vsel %vm446_vm3, %v1901_v6, %v1916_v26  ;;  %v809_v6 = vsel %vm446_vm3, 0.0, %v808_v46  ;;  %v1240_v46 = vsel %vm446_vm3, 0.0, %v1239_v14  ;;  %v1355_v44 = vrot.slane %v2856_v7, 4 }
 0x291   : > { %1806 = vrot.lane.b32.xlu0 %v2929_v34, %s2315_s15  ;;  %1939 = vrot.lane.b32.xlu1 %v2932_v51, %s2314_s14  ;;  %v730_v26 = vsel %vm729_vm8, %v728_v49, %v705_v38  ;;  %v974_v48 = vsel %vm446_vm3, 0.0, %v973_v15 }
 0x292   : > { %1947 = vrot.lane.b32.xlu2 %v2935_v42, %s2315_s15  ;;  %v1356_v55 = vsel %vm446_vm3, %v1355_v44, %v2828_v47  ;;  %v1646_v47 = vsel %vm446_vm3, 0.0, %v1645_v45 }
 0x296   : > { %v1117_v32 = vpop.permute.xlu2 %1116 }
 0x297   : > { %v2949_v9 = vpop.permute.xlu1 %1128 }
 0x298   : > { %v2954_v50 = vpop.permute.xlu0 %1112 }
 0x299   : > { %823 = vrot.lane.b32.xlu0 %v809_v6, %s2310_s25  ;;  %1814 = vrot.lane.b32.xlu1 %v2952_v52, %s2309_s24  ;;  %v1241_v6 = vrot.slane %v2799_v18, 4  ;;  %v3026_v18 = vperm.slane %v1356_v55, %v2439_v59 }
 0x29a   : > { %831 = vrot.lane.b32.xlu2 %v811_v13, %s2313_s13  ;;  %v977_v13 = vrot.slane %v2767_v53, 4 }
 0x29c   : > { %v978_v20 = vsel %vm446_vm3, 0.0, %v977_v13  ;;  %v1787_v13 = vrot.slane %v2902_v1, 4 }
 0x29f   : > { %v2972_v57 = vpop.permute.xlu1 %1526 }
 0x2a0   : > { %v2974_v10 = vpop.permute.xlu0 %1534 }
 0x2a1   : > { %990 = vrot.lane.b32.xlu0 %v976_v11, %s2310_s25  ;;  %815 = vrot.lane.b32.xlu1 %v807_v12, %s2312_s12  ;;  %v1647_v12 = vrot.slane %v2844_v62, 4 }
 0x2a2   : > { %1006 = vrot.lane.b32.xlu2 %v980_v41, %s2311_s26  ;;  %v1379_v41 = vrot.slane %v3026_v18, 4 }
 0x2a3   : > { %v1648_v49 = vsel %vm446_vm3, 0.0, %v1647_v12 }
 0x2a4   : > { %v1380_v25 = vsel %vm446_vm3, 0.0, %v1379_v41 }
 0x2a7   : > { %v709_v27 = vpop.permute.xlu1 %708 }
 0x2a8   : > { %v717_v28 = vpop.permute.xlu0 %716  ;;  %v732_v35 = vsel %vm731_vm9, %v730_v26, %v709_v27 }
 0x2a9   : > { %v734_v63 = vsel %vm733_vm10, %v732_v35, %v2870_v24  ;;  %1248 = vrot.lane.b32.xlu0 %v1240_v46, %s2312_s12  ;;  %982 = vrot.lane.b32.xlu1 %v974_v48, %s2312_s12 }
 0x2aa   : > { %839 = vrot.lane.b32.xlu2 %v813_v58, %s2311_s26  ;;  %v736_v38 = vsel %vm735_vm11, %v734_v63, %v717_v28  ;;  %v1245_v58 = vrot.slane %v2838_v60, 4  ;;  %v3087_v60 = vperm.slane %v2888_v37, %v2439_v59 }
 0x2ab   : > { %v738_v24 = vsel %vm737_vm12, %v736_v38, %v2899_v0  ;;  %v1242_v0 = vsel %vm446_vm3, 0.0, %v1241_v6  ;;  %v1385_v38 = vrot.slane %v2865_v17, 4 }
 0x2ac   : > { %v740_v54 = vsel %vm739_vm13, %v738_v24, %v725_v5  ;;  %v1531_v5 = vpop.permute.xlu2 %1530  ;;  %v1246_v24 = vsel %vm446_vm3, 0.0, %v1245_v58  ;;  %v1785_v45 = vrot.slane %v3087_v60, 4 }
 0x2ad   : > { %2151 = vmatpush.msk.msra.mxu1 %vm855_vm14, %v740_v54  ;;  %v1386_v54 = vsel %vm446_vm3, 0.0, %v1385_v38 }
 0x2ae   : > { %v1786_v37 = vsel %vm446_vm3, 0.0, %v1785_v45 }
 0x2af   : > { %v1109_v2 = vpop.permute.xlu1 %1108 }
 0x2b0   : > { %v1125_v36 = vpop.permute.xlu0 %1124  ;;  %v1135_v7 = vsel %vm727_vm7, %v2671_v29, %v1109_v2  ;;  %v1788_v2 = vsel %vm446_vm3, 0.0, %v1787_v13 }
 0x2b1   : > { %v1136_v53 = vsel %vm729_vm8, %v1135_v7, %v2954_v50  ;;  %1256 = vrot.lane.b32.xlu0 %v1242_v0, %s2310_s25  ;;  %998 = vrot.lane.b32.xlu1 %v978_v20, %s2313_s13  ;;  %v1243_v50 = vrot.slane %v2802_v21, 4  ;;  %v1791_v7 = vrot.slane %v2952_v52, 4  ;;  %v1930_v0 = vrot.slane %v2935_v42, 4 }
 0x2b2   : > { %v1137_v11 = vsel %vm731_vm9, %v1136_v53, %v1117_v32  ;;  %1654 = vrot.lane.b32.xlu2 %v1646_v47, %s2312_s12  ;;  %v1649_v32 = vrot.slane %v2841_v61, 4 }
 0x2b3   : > { %v1138_v29 = vsel %vm733_vm10, %v1137_v11, %v2926_v30  ;;  %v1244_v21 = vsel %vm446_vm3, 0.0, %v1243_v50  ;;  %v1792_v53 = vsel %vm446_vm3, 0.0, %v1791_v7  ;;  %v1931_v47 = vsel %vm446_vm3, 0.0, %v1930_v0  ;;  %v2161_v7 = vld [vmem:[%s3289_s5 + $0x18] sm:$0xff] }
 0x2b4   : > { %v1139_v3 = vsel %vm735_vm11, %v1138_v29, %v1125_v36  ;;  %v3053_v27 = vpop.permute.xlu2 %819  ;;  %v3102_v36 = vperm.slane %v2922_v22, %v2439_v59  ;;  %v1789_v29 = vrot.slane %v2929_v34, 4 }
 0x2b5   : > { %v1140_v30 = vsel %vm737_vm12, %v1139_v3, %v2949_v9  ;;  %v1383_v9 = vrot.slane %v2868_v23, 4 }
 0x2b6   : > { %v1926_v20 = vrot.slane %v3102_v36, 4 }
 0x2b7   : > { %v1515_v14 = vpop.permute.xlu1 %1514  ;;  %v1384_v48 = vsel %vm446_vm3, 0.0, %v1383_v9 }
 0x2b8   : > { %v1133_v15 = vpop.permute.xlu0 %1132  ;;  %v1541_v33 = vsel %vm727_vm7, %v2686_v40, %v1515_v14  ;;  %v1381_v40 = vrot.slane %v2873_v19, 4  ;;  %v1650_v19 = vsel %vm446_vm3, 0.0, %v1649_v32  ;;  %v1927_v22 = vsel %vm446_vm3, 0.0, %v1926_v20  ;;  %v2153_v20 = vld [vmem:[%s3289_s5 + $0x10] sm:$0xff] }
 0x2b9   : > { %1662 = vrot.lane.b32.xlu0 %v1648_v49, %s2310_s25  ;;  %1388 = vrot.lane.b32.xlu1 %v1380_v25, %s2312_s12  ;;  %v1141_v62 = vsel %vm739_vm13, %v1140_v30, %v1133_v15  ;;  %v1542_v26 = vsel %vm729_vm8, %v1541_v33, %v2912_v8 }
 0x2ba   : > { %1264 = vrot.lane.b32.xlu2 %v1244_v21, %s2313_s13  ;;  %2162 = vmatpush.msk.msra.mxu3 %vm855_vm14, %v1141_v62  ;;  %v1382_v46 = vsel %vm446_vm3, 0.0, %v1381_v40 }
 0x2bb   : > { %2163 = vmatmul.msk.f32.vlgmr.msra.gmra.mxu3 %vm851_vm15, %v2161_v7 }
 0x2bc   : > { %v3068_v63 = vpop.permute.xlu2 %986 }
 0x2bf   : > { %v1523_v28 = vpop.permute.xlu1 %1522 }
 0x2c0   : > { %v1543_v35 = vsel %vm731_vm9, %v1542_v26, %v1523_v28 }
 0x2c1   : > { %v1544_v8 = vsel %vm733_vm10, %v1543_v35, %v2972_v57  ;;  %1396 = vrot.lane.b32.xlu0 %v1382_v46, %s2310_s25  ;;  %1404 = vrot.lane.b32.xlu1 %v1384_v48, %s2313_s13  ;;  %v1651_v57 = vrot.slane %v2907_v16, 4  ;;  %v1928_v16 = vrot.slane %v2932_v51, 4  ;;  %v836_v51 = vpop.permute.xlu0 %835 }
 0x2c2   : > { %1670 = vrot.lane.b32.xlu2 %v1650_v19, %s2313_s13  ;;  %v1545_v61 = vsel %vm735_vm11, %v1544_v8, %v1531_v5  ;;  %v1925_v5 = vperm.slane %v2938_v43, %v2439_v59  ;;  %v1790_v59 = vsel %vm446_vm3, 0.0, %v1789_v29 }
 0x2c3   : > { %v1546_v23 = vsel %vm737_vm12, %v1545_v61, %v2974_v10  ;;  %v1652_v10 = vsel %vm446_vm3, 0.0, %v1651_v57  ;;  %v1929_v55 = vsel %vm446_vm3, 0.0, %v1928_v16 }
 0x2c4   : > { %v3090_v17 = vpop.permute.xlu2 %994  ;;  %v1932_v42 = vrot.slane %v1925_v5, 4 }
 0x2c6   : > { %v1933_v41 = vsel %vm446_vm3, 0.0, %v1932_v42 }
 0x2c7   : > { %v1539_v44 = vpop.permute.xlu1 %1538 }
 0x2c8   : > { %v3080_v6 = vsel %vm739_vm13, %v1546_v23, %v1539_v44 }
 0x2c9   : > { %1272 = vrot.lane.b32.xlu0 %v1246_v24, %s2311_s26  ;;  %1412 = vrot.lane.b32.xlu1 %v1386_v54, %s2311_s26 }
 0x2ca   : > { %1678 = vrot.lane.b32.xlu2 %v1652_v10, %s2311_s26 }
 0x2cc   : > { %v1003_v52 = vpop.permute.xlu0 %1002 }
 0x2cf   : > { %v828_v12 = vpop.permute.xlu1 %827 }
 0x2d1   : > { %1943 = vrot.lane.b32.xlu0 %v1929_v55, %s2310_s25  ;;  %1802 = vrot.lane.b32.xlu1 %v1788_v2, %s2310_s25 }
 0x2d2   : > { %1794 = vrot.lane.b32.xlu2 %v1786_v37, %s2312_s12 }
 0x2d4   : > { %v3105_v1 = vpop.permute.xlu2 %1658 }
 0x2d9   : > { %1818 = vrot.lane.b32.xlu0 %v1792_v53, %s2311_s26  ;;  %1951 = vrot.lane.b32.xlu1 %v1931_v47, %s2313_s13 }
 0x2da   : > { %1935 = vrot.lane.b32.xlu2 %v1927_v22, %s2312_s12 }
 0x2dc   : > { %v3118_v11 = vpop.permute.xlu2 %1392 }
 0x2e1   : > { %1959 = vrot.lane.b32.xlu0 %v1933_v41, %s2311_s26  ;;  %s2139_s26 = sshll.u32 %s3304_s28, 1 }
 0x2e2   : > { %1810 = vrot.lane.b32.xlu2 %v1790_v59, %s2313_s13  ;;  %v2190_v59 = vld [vmem:[%s3289_s5 + $0x38] sm:$0xff]  ;;  %s336_s12 = sadd.s32 %s2139_s26, %s3306_s27 }
 0x2e3   : > { %v1253_v43 = vpop.permute.xlu0 %1252  ;;  %v1261_v3 = vpop.permute.xlu1 %1260  ;;  %s2140_s13 = sshll.u32 %s336_s12, 3 }
 0x2e4   : > { %v3125_v50 = vpop.permute.xlu2 %1674  ;;  %s338_s16 = scalar_lea.vmem %s3291_s7, %s2140_s13  ;;  %s346_s19 = scalar_lea.vmem %s3292_s8, %s2140_s13 }
 0x2ea   : > { %1955 = vrot.lane.b32.xlu2 %v1925_v5, %s2309_s24 }
 0x2eb   : > { %v1269_v14 = vpop.permute.xlu0 %1268  ;;  %v1667_v33 = vpop.permute.xlu1 %1666 }
 0x2ec   : > { %v3128_v15 = vpop.permute.xlu2 %1947 }
 0x2f3   : > { %v3130_v34 = vpop.permute.xlu0 %1408  ;;  %v3132_v25 = vpop.permute.xlu1 %1400 }
 0x2f4   : > { %v832_v49 = vpop.permute.xlu2 %831 }
 0x2fb   : > { %v3134_v30 = vpop.permute.xlu0 %1798 }
 0x2fc   : > { %v1007_v21 = vpop.permute.xlu2 %1006 }
 0x303   : > { %v3136_v62 = vpop.permute.xlu0 %1806  ;;  %v3138_v26 = vpop.permute.xlu1 %1939 }
 0x304   : > { %v840_v40 = vpop.permute.xlu2 %839 }
 0x30b   : > { %v824_v9 = vpop.permute.xlu0 %823  ;;  %v3140_v32 = vpop.permute.xlu1 %1814 }
 0x30c   : > { %v1655_v28 = vpop.permute.xlu2 %1654 }
 0x30d   : > { %v1681_v47 = vsel %vm727_vm7, %v3007_v31, %v1655_v28 }
 0x313   : > { %v991_v35 = vpop.permute.xlu0 %990  ;;  %v816_v46 = vpop.permute.xlu1 %815 }
 0x314   : > { %v842_v48 = vsel %vm727_vm7, %v2959_v56, %v816_v46  ;;  %v1265_v8 = vpop.permute.xlu2 %1264  ;;  %v2168_v46 = vld [vmem:[%s3289_s5 + $0x20] sm:$0xff] }
 0x315   : > { %v843_v19 = vsel %vm729_vm8, %v842_v48, %v3053_v27 }
 0x316   : > { %v844_v61 = vsel %vm731_vm9, %v843_v19, %v824_v9 }
 0x317   : > { %v845_v23 = vsel %vm733_vm10, %v844_v61, %v828_v12  ;;  %v741_v12 = vld [vmem:[%s3289_s5] sm:$0xff] }
 0x318   : > { %v846_v58 = vsel %vm735_vm11, %v845_v23, %v832_v49  ;;  %2152 = vmatmul.msk.f32.vlgmr.msra.gmra.mxu1 %vm851_vm15, %v741_v12 }
 0x319   : > { %v847_v38 = vsel %vm737_vm12, %v846_v58, %v836_v51 }
 0x31a   : > { %v848_v57 = vsel %vm739_vm13, %v847_v38, %v840_v40 }
 0x31b   : > { %v1249_v44 = vpop.permute.xlu0 %1248  ;;  %v983_v24 = vpop.permute.xlu1 %982  ;;  %2149 = vmatpush.msk.msra.mxu0 %vm855_vm14, %v848_v57 }
 0x31c   : > { %v1009_v56 = vsel %vm727_vm7, %v2983_v39, %v983_v24  ;;  %v1671_v54 = vpop.permute.xlu2 %1670  ;;  %v1275_v10 = vsel %vm727_vm7, %v2979_v4, %v1249_v44  ;;  %v2148_v4 = vld [vmem:[%s3289_s5 + $0x8] sm:$0xff] }
 0x31d   : > { %v1010_v27 = vsel %vm729_vm8, %v1009_v56, %v3068_v63  ;;  %v1276_v13 = vsel %vm729_vm8, %v1275_v10, %v1253_v43  ;;  %2150 = vmatmul.msk.f32.vlgmr.msra.gmra.mxu0 %vm851_vm15, %v2148_v4 }
 0x31e   : > { %v1011_v16 = vsel %vm731_vm9, %v1010_v27, %v991_v35 }
 0x31f   : > { %v1012_v2 = vsel %vm733_vm10, %v1011_v16, %v3090_v17 }
 0x323   : > { %v1257_v45 = vpop.permute.xlu0 %1256  ;;  %v999_v55 = vpop.permute.xlu1 %998 }
 0x324   : > { %v1277_v37 = vsel %vm731_vm9, %v1276_v13, %v1257_v45  ;;  %v1013_v39 = vsel %vm735_vm11, %v1012_v2, %v999_v55  ;;  %v1679_v5 = vpop.permute.xlu2 %1678  ;;  %v1969_v45 = vld [vmem:[%s3290_s6] sm:$0xff] }
 0x325   : > { %v1278_v51 = vsel %vm733_vm10, %v1277_v37, %v1261_v3  ;;  %v1014_v63 = vsel %vm737_vm12, %v1013_v39, %v1003_v52  ;;  %v1682_v52 = vsel %vm729_vm8, %v1681_v47, %v3105_v1 }
 0x326   : > { %v1015_v0 = vsel %vm739_vm13, %v1014_v63, %v1007_v21  ;;  %v1279_v17 = vsel %vm735_vm11, %v1278_v51, %v1265_v8 }
 0x327   : > { %2154 = vmatpush.msk.msra.mxu2 %vm855_vm14, %v1015_v0  ;;  %v1280_v53 = vsel %vm737_vm12, %v1279_v17, %v1269_v14 }
 0x328   : > { %2155 = vmatmul.msk.f32.vlgmr.msra.gmra.mxu2 %vm851_vm15, %v2153_v20 }
 0x329   : > { %2184 = vmatpush.msk.msrb.mxu2 %vm855_vm14, %v3080_v6  ;;  %v2183_v6 = vld [vmem:[%s3289_s5 + $0x30] sm:$0xff] }
 0x32b   : > { %v1663_v22 = vpop.permute.xlu0 %1662  ;;  %v1389_v42 = vpop.permute.xlu1 %1388 }
 0x32c   : > { %v1683_v29 = vsel %vm731_vm9, %v1682_v52, %v1663_v22  ;;  %v1415_v43 = vsel %vm727_vm7, %v3026_v18, %v1389_v42  ;;  %v1795_v14 = vpop.permute.xlu2 %1794 }
 0x32d   : > { %v1684_v41 = vsel %vm733_vm10, %v1683_v29, %v1667_v33 }
 0x32e   : > { %v1685_v31 = vsel %vm735_vm11, %v1684_v41, %v1671_v54 }
 0x32f   : > { %v1686_v1 = vsel %vm737_vm12, %v1685_v31, %v3125_v50  ;;  %v1416_v50 = vsel %vm729_vm8, %v1415_v43, %v3118_v11  ;;  %v2175_v11 = vld [vmem:[%s3289_s5 + $0x28] sm:$0xff] }
 0x330   : > { %v1687_v3 = vsel %vm739_vm13, %v1686_v1, %v1679_v5  ;;  %2185 = vmatmul.msk.f32.vlgmr.msrb.gmra.mxu2 %vm851_vm15, %v2183_v6 }
 0x331   : > { %2191 = vmatpush.msk.msrb.mxu3 %vm855_vm14, %v1687_v3 }
 0x332   : > { %2192 = vmatmul.msk.f32.vlgmr.msrb.gmra.mxu3 %vm851_vm15, %v2190_v59 }
 0x333   : > { %v1397_v33 = vpop.permute.xlu0 %1396  ;;  %v1405_v49 = vpop.permute.xlu1 %1404 }
 0x334   : > { %v1417_v21 = vsel %vm731_vm9, %v1416_v50, %v1397_v33 }
 0x335   : > { %v1418_v40 = vsel %vm733_vm10, %v1417_v21, %v3132_v25  ;;  %v1936_v25 = vpop.permute.xlu2 %1935 }
 0x336   : > { %v1419_v18 = vsel %vm735_vm11, %v1418_v40, %v1405_v49  ;;  %v1962_v44 = vsel %vm727_vm7, %v3102_v36, %v1936_v25 }
 0x337   : > { %v1420_v35 = vsel %vm737_vm12, %v1419_v18, %v3130_v34  ;;  %v1821_v34 = vsel %vm727_vm7, %v3087_v60, %v1795_v14  ;;  %v1963_v56 = vsel %vm729_vm8, %v1962_v44, %v3138_v26 }
 0x338   : > { %v1822_v23 = vsel %vm729_vm8, %v1821_v34, %v3134_v30  ;;  %v2197_v30 = vld [vmem:[%s3289_s5 + $0x40] sm:$0xff] }
 0x33b   : > { %v1273_v9 = vpop.permute.xlu0 %1272  ;;  %v1413_v28 = vpop.permute.xlu1 %1412 }
 0x33c   : > { %v1281_v48 = vsel %vm739_vm13, %v1280_v53, %v1273_v9  ;;  %v1421_v8 = vsel %vm739_vm13, %v1420_v35, %v1413_v28 }
 0x33d   : > { %2169 = vmatpush.msk.msrb.mxu0 %vm855_vm14, %v1281_v48  ;;  %2176 = vmatpush.msk.msrb.mxu1 %vm855_vm14, %v1421_v8  ;;  %v1811_v57 = vpop.permute.xlu2 %1810 }
 0x33e   : > { %2170 = vmatmul.msk.f32.vlgmr.msrb.gmra.mxu0 %vm851_vm15, %v2168_v46  ;;  %2177 = vmatmul.msk.f32.vlgmr.msrb.gmra.mxu1 %vm851_vm15, %v2175_v11  ;;  %v1167_v63 = vpop.f32.mrf.mxu3 }
 0x343   : > { %v1944_v19 = vpop.permute.xlu0 %1943  ;;  %v1803_v61 = vpop.permute.xlu1 %1802 }
 0x344   : > { %v1823_v58 = vsel %vm731_vm9, %v1822_v23, %v1803_v61  ;;  %v1964_v54 = vsel %vm731_vm9, %v1963_v56, %v1944_v19 }
 0x345   : > { %v1824_v38 = vsel %vm733_vm10, %v1823_v58, %v3136_v62  ;;  %v1965_v36 = vsel %vm733_vm10, %v1964_v54, %v3128_v15  ;;  %v1956_v16 = vpop.permute.xlu2 %1955 }
 0x346   : > { %v1825_v24 = vsel %vm735_vm11, %v1824_v38, %v1811_v57 }
 0x347   : > { %v1826_v27 = vsel %vm737_vm12, %v1825_v24, %v3140_v32 }
 0x34b   : > { %v1819_v60 = vpop.permute.xlu0 %1818  ;;  %v1952_v10 = vpop.permute.xlu1 %1951 }
 0x34c   : > { %v1827_v62 = vsel %vm739_vm13, %v1826_v27, %v1819_v60  ;;  %v1966_v26 = vsel %vm735_vm11, %v1965_v36, %v1952_v10 }
 0x34d   : > { %2198 = vmatpush.msk.msra.mxu0 %vm855_vm14, %v1827_v62  ;;  %v1967_v13 = vsel %vm737_vm12, %v1966_v26, %v1956_v16 }
 0x34e   : > { %2199 = vmatmul.msk.f32.vlgmr.msra.gmra.mxu0 %vm851_vm15, %v2197_v30 }
 0x353   : > { %v1960_v32 = vpop.permute.xlu0 %1959 }
 0x354   : > { %v1968_v55 = vsel %vm739_vm13, %v1967_v13, %v1960_v32 }
 0x355   : > { %2204 = vmatpush.msk.msra.mxu1 %vm855_vm14, %v1968_v55 }
 0x356   : > { %2205 = vmatmul.msk.f32.vlgmr.msra.gmra.mxu1 %vm851_vm15, %v1969_v45 }
 0x395   : > { %v902_v15 = vpop.f32.mrf.mxu1 }
 0x39a   : > { %v876_v2 = vpop.f32.mrf.mxu0 }
 0x39b   : > { %v903_v37 = vadd.f32 %v902_v15, %v876_v2 }
 0x3ab   : > { %v1041_v39 = vpop.f32.mrf.mxu2 }
 0x3ac   : > { %v1044_v51 = vadd.f32 %v1041_v39, %v903_v37 }
 0x3ae   : > { %v1170_v4 = vadd.f32 %v1167_v63, %v1044_v51 }
 0x3b3   : > { %v1573_v53 = vpop.f32.mrf.mxu2 }
 0x3b5   : > { %v1713_v5 = vpop.f32.mrf.mxu3 }
 0x3bb   : > { %v1307_v7 = vpop.f32.mrf.mxu0  ;;  %v1447_v17 = vpop.f32.mrf.mxu1 }
 0x3bc   : > { %v1310_v0 = vadd.f32 %v1307_v7, %v1170_v4 }
 0x3be   : > { %v1450_v20 = vadd.f32 %v1447_v17, %v1310_v0 }
 0x3c0   : > { %v1576_v47 = vadd.f32 %v1573_v53, %v1450_v20 }
 0x3c2   : > { %v1716_v22 = vadd.f32 %v1713_v5, %v1576_v47 }
 0x3cb   : > { %v1853_v52 = vpop.f32.mrf.mxu0 }
 0x3cc   : > { %v1856_v42 = vadd.f32 %v1853_v52, %v1716_v22 }
 0x3ce   : > { %1857 = vst [vmem:[%s338_s16] sm:$0xff] %v1856_v42 }
 0x3d3   : > { %v1993_v29 = vpop.f32.mrf.mxu1 }
 0x3d4   : > { %1996 = vst [vmem:[%s346_s19] sm:$0xff] %v1993_v29 }
 0x3d5 PF: > { %s19_s9 = sadd.s32 1, %s2305_s9   ;;  %s3293_s27 = smov %s2297_s29 }
 0x3d6   : > { %p16_p7 = scmp.ge.s32.totalorder %s19_s9, 6   ;;  %s3294_s28 = smov %s2301_s30 }
 0x3d7   : > { %s3295_s29 = smov %s3298_s10  ;;  %s3296_s30 = smov %s3302_s11 }
 0x3d8   :  { %18 = sbr.rel (!%p16_p7) target bundleno = 3 (0x3), region = 108 }

// kernel: preact_block_ew.7
= control target key start
LH: loop header
LB: loop body
LE: loop exit
PB: predicated region body
PF: predicated region fallthrough
CT: control target
= control target key end

     0   :  { %s3138_s24 = smov 0   ;;  %s3140_s25 = smov 0   ;;  %s4676_s0 = inlined_call_operand.vmem [shape: f32[8,1], index: 0, kind: input, shape index: {}]   ;;  %s4677_s1 = inlined_call_operand.vmem [shape: f32[8,1], index: 1, kind: input, shape index: {}]   ;;  %s4678_s2 = inlined_call_operand.vmem [shape: f32[8,1], index: 2, kind: input, shape index: {}]   ;;  %s4679_s3 = inlined_call_operand.vmem [shape: f32[8,1], index: 3, kind: input, shape index: {}]   ;;  %s4680_s4 = inlined_call_operand.vmem [shape: f32[2,8,256], index: 4, kind: input, shape index: {}]   ;;  %s4681_s5 = inlined_call_operand.vmem [shape: f32[9,8,8], index: 5, kind: input, shape index: {}]   ;;  %s4682_s6 = inlined_call_operand.vmem [shape: f32[2,8,256], index: 6, kind: input, shape index: {}]   ;;  %s4683_s7 = inlined_call_operand.vmem [shape: f32[2,8,256], index: 7, kind: output, shape index: {}]  }
   0x1   :  { %s3142_s26 = smov 0   ;;  %s3144_s27 = smov 0  }
   0x2   :  { %s3146_s28 = smov 0  }
   0x3 LB: > { %s26_s29 = sadd.s32 1, %s3074_s26  ;;  %s29_s30 = sadd.s32 1, %s3078_s27  ;;  %s3082_s28 = sphi %s3146_s28, %s17_s28   ;;  %s3078_s27 = sphi %s3144_s27, %s4770_s27   ;;  %s3074_s26 = sphi %s3142_s26, %s4769_s26   ;;  %s3070_s25 = sphi %s3140_s25, %s4768_s25   ;;  %s3066_s24 = sphi %s3138_s24, %s4767_s24  }
   0x4   : > { %p27_p0 = scmp.ge.s32.totalorder %s26_s29, 2  ;;  %p2684_p1 = scmp.ge.s32.totalorder %s3082_s28, 1 }
   0x5   : > { %p266_p2 = scmp.lt.s32.totalorder %s3082_s28, 5 }
   0x6   : > { %s4772_s29 = smov (%p27_p0, %s26_s29), 0  ;;  %s4774_s30 = smov (!%p27_p0, %s29_s30), %s3078_s27 }
   0x7   : > { %p267_p3 = pnand %p2684_p1, %p266_p2  ;;  %p31_p4 = scmp.ge.s32.totalorder %s4774_s30, 2 }
   0x9   : > { %s4776_s30 = smov (%p31_p4, %s4774_s30), 0  ;;  %270 = sbr.rel (%p267_p3) target bundleno = 992 (0x3e0), region = 48 }
   0xe   : > { %v331_v0 = vld [vmem:[%s4676_s0] sm:$0xff]  ;;  %v3084_v2 = vmov 0   ;;  %p309_p5 = scmp.lt.s32.totalorder %s3070_s25, 1  ;;  %s3085_s20 = smov 48   ;;  %v3092_v36 = vmov 1983009808  }
   0xf   : > { %v333_v1 = vld [vmem:[%s4677_s1] sm:$0xff]  ;;  %2816 = vset.pattern.permute.xlu0 %v3084_v2  ;;  %v332_v3 = vmul.f32 0.001953125, %v331_v0  ;;  %s3086_s21 = smov 80   ;;  %s3087_s22 = smov 112   ;;  %v448_v37 = vunpack.c.l.s4 %v3092_v36  ;;  %vm443_vm3 = vcmask 1047556   ;;  %vm372_vm4 = vcmask 146432  }
  0x10   : > { %v334_v4 = vmul.f32 0.001953125, %v333_v1  ;;  %v338_v14 = vld [vmem:[%s4678_s2] sm:$0xff]  ;;  %s4778_s25 = smov (!%p309_p5, %s3070_s25), 1  ;;  %s3088_s23 = smov 64   ;;  %v3093_v48 = vmov 1934713408  }
  0x11   : > { %v335_v5 = vmul.f32 %v332_v3, %v332_v3  ;;  %v351_v19 = vld [vmem:[%s4679_s3] sm:$0xff]  ;;  %s2761_s16 = sshll.u32 %s4778_s25, 4  ;;  %s3089_s8 = smov 96   ;;  %v3215_v40 = vunpack.c.0.s8 %v448_v37  ;;  %v496_v49 = vunpack.c.l.s4 %v3093_v48  ;;  %vm375_vm5 = vcmask 140288  }
  0x12   : > { %s313_s19 = scalar_lea.vmem %s4680_s4, %s2761_s16  ;;  %s3090_s9 = smov 16   ;;  %vm731_vm6 = vcmask 138248   ;;  %vm897_vm7 = vcmask 130048   ;;  %vm899_vm8 = vcmask 261120   ;;  %vm901_vm9 = vcmask 392192  }
  0x13   : > { %v336_v6 = vsub.f32 %v334_v4, %v335_v5  ;;  %v354_v22 = vld [vmem:[%s313_s19] sm:$0xff]  ;;  %v355_v26 = vld [vmem:[%s313_s19 + $0x8] sm:$0xff]  ;;  %s3091_s10 = smov 32   ;;  %v3228_v59 = vunpack.c.0.s8 %v496_v49  ;;  %s3094_s11 = smov 1   ;;  %vm903_vm10 = vcmask 523264   ;;  %vm905_vm11 = vcmask 654336  }
  0x14   : > { %s2691_s12 = sshll.u32 %s3066_s24, 3  ;;  %s3096_s14 = smov 127   ;;  %vm907_vm12 = vcmask 785408   ;;  %vm909_vm13 = vcmask 916480   ;;  %vm1093_vm14 = vcmask 64512  }
  0x15   : > { %v337_v7 = vmax.f32 %v336_v6, 0.0  ;;  %s3414_s13 = scalar_lea.vmem [#allocation2], %s2691_s12  ;;  %s3097_s15 = smov 126  }
  0x16   : > { %p316_p6 = scmp.lt.s32.totalorder %s3066_s24, 1  ;;  %s2687_s18 = sshll.u32 %s4778_s25, 1 }
  0x17   : > { %v339_v8 = vadd.f32 1e-05, %v337_v7 }
  0x18   : > { %s4780_s24 = smov (!%p316_p6, %s3066_s24), 1 }
  0x19   : > { %3042 = vrsqrt.f32 %v339_v8  ;;  %vm346_vm0 = vweird.f32 %v339_v8  ;;  %s319_s19 = sadd.s32 %s2687_s18, %s4780_s24 }
  0x1f   : > { %v3043_v9 = vpop.eup %3042 }
  0x20   : > { %v341_v10 = vmul.f32 %v3043_v9, %v339_v8  ;;  %vm347_vm1 = vweird.f32 %v3043_v9 }
  0x21   : > { %vm348_vm2 = vmor %vm346_vm0, %vm347_vm1 }
  0x22   : > { %v342_v11 = vmul.f32 %v3043_v9, %v341_v10 }
  0x24   : > { %v343_v12 = vmul.f32 0.5, %v342_v11 }
  0x26   : > { %v344_v13 = vsub.f32 1.5, %v343_v12 }
  0x28   : > { %v345_v15 = vmul.f32 %v3043_v9, %v344_v13 }
  0x2a   : > { %v349_v16 = vsel %vm348_vm2, %v3043_v9, %v345_v15 }
  0x2b   : > { %v350_v17 = vmul.f32 %v349_v16, %v338_v14 }
  0x2d   : > { %358 = vperm.xlu0 %2816, %v350_v17   ;;  %v352_v18 = vmul.f32 %v350_v17, %v332_v3 }
  0x2f   : > { %v353_v20 = vsub.f32 %v351_v19, %v352_v18 }
  0x35   : > { %365 = vperm.xlu0 %2816, %v353_v20  }
  0x9f   : > { %v359_v21 = vpop.permute.xlu0 %358 }
  0xa0   : > { %v361_v23 = vmul.f32 %v359_v21, %v354_v22  ;;  %v362_v28 = vmul.f32 %v359_v21, %v355_v26 }
  0xa7   : > { %v366_v24 = vpop.permute.xlu0 %365 }
  0xa8   : > { %v368_v25 = vadd.f32 %v366_v24, %v361_v23  ;;  %v369_v29 = vadd.f32 %v366_v24, %v362_v28 }
  0xaa   : > { %v370_v27 = vmax.f32 %v368_v25, 0.0  ;;  %v3195_v30 = vmax.f32 %v369_v29, 0.0 }
  0xac   : > { %411 = vrot.lane.b32.xlu0 %v370_v27, %s3085_s20  ;;  %405 = vrot.lane.b32.xlu2 %v370_v27, %s3086_s21  ;;  %v445_v39 = vrot.slane %v370_v27, 4  ;;  %v557_v15 = vrot.slane %v3195_v30, 4 }
  0xad   : > { %399 = vrot.lane.b32.xlu1 %v370_v27, %s3087_s22 }
  0xb4   : > { %421 = vrot.lane.b32.xlu0 %v3195_v30, %s3087_s22  ;;  %408 = vrot.lane.b32.xlu2 %v370_v27, %s3088_s23 }
  0xb5   : > { %402 = vrot.lane.b32.xlu1 %v370_v27, %s3089_s8 }
  0xbc   : > { %430 = vrot.lane.b32.xlu0 %v3195_v30, %s3088_s23  ;;  %417 = vrot.lane.b32.xlu2 %v370_v27, %s3090_s9 }
  0xbd   : > { %414 = vrot.lane.b32.xlu1 %v370_v27, %s3091_s10 }
  0xc4   : > { %439 = vrot.lane.b32.xlu0 %v3195_v30, %s3090_s9  ;;  %427 = vrot.lane.b32.xlu2 %v3195_v30, %s3086_s21 }
  0xc5   : > { %424 = vrot.lane.b32.xlu1 %v3195_v30, %s3089_s8 }
  0xcc   : > { %436 = vrot.lane.b32.xlu2 %v3195_v30, %s3091_s10 }
  0xcd   : > { %433 = vrot.lane.b32.xlu1 %v3195_v30, %s3085_s20 }
 0x106   : > { %v406_v31 = vpop.permute.xlu2 %405 }
 0x107   : > { %v455_v50 = vrot.slane %v406_v31, 4 }
 0x10e   : > { %v409_v32 = vpop.permute.xlu2 %408 }
 0x10f   : > { %v469_v55 = vrot.slane %v409_v32, 4 }
 0x116   : > { %v418_v35 = vpop.permute.xlu2 %417 }
 0x117   : > { %v479_v53 = vrot.slane %v418_v35, 4 }
 0x11e   : > { %v412_v33 = vpop.permute.xlu0 %411  ;;  %v428_v46 = vpop.permute.xlu2 %427 }
 0x11f   : > { %v400_v34 = vpop.permute.xlu1 %399  ;;  %v481_v51 = vrot.slane %v412_v33, 4  ;;  %v480_v57 = vsel %vm443_vm3, %v479_v53, %v412_v33  ;;  %v567_v19 = vrot.slane %v428_v46, 4 }
 0x120   : > { %v457_v38 = vrot.slane %v400_v34, 4  ;;  %v456_v56 = vsel %vm443_vm3, %v455_v50, %v400_v34  ;;  %v3246_v6 = vperm.slane %v480_v57, %v3215_v40 }
 0x121   : > { %v482_v61 = vsel %vm443_vm3, %v418_v35, %v481_v51  ;;  %v3236_v1 = vperm.slane %v456_v56, %v3215_v40 }
 0x122   : > { %v458_v45 = vsel %vm443_vm3, %v406_v31, %v457_v38  ;;  %v490_v7 = vperm.slane %v482_v61, %v3215_v40  ;;  %v515_v18 = vrot.slane %v3246_v6, 4 }
 0x123   : > { %v3224_v54 = vperm.slane %v458_v45, %v3215_v40  ;;  %v491_v10 = vrot.slane %v3236_v1, 4 }
 0x124   : > { %v527_v53 = vrot.slane %v490_v7, 4 }
 0x126   : > { %v422_v41 = vpop.permute.xlu0 %421  ;;  %v437_v12 = vpop.permute.xlu2 %436 }
 0x127   : > { %v403_v42 = vpop.permute.xlu1 %402  ;;  %v569_v11 = vrot.slane %v422_v41, 4  ;;  %v579_v23 = vrot.slane %v437_v12, 4  ;;  %v568_v31 = vsel %vm443_vm3, %v567_v19, %v422_v41 }
 0x128   : > { %v446_v43 = vsel %vm443_vm3, %v403_v42, %v445_v39  ;;  %v442_v52 = vrot.slane %v403_v42, 4  ;;  %v574_v41 = vperm.slane %v568_v31, %v3215_v40 }
 0x129   : > { %v3219_v44 = vperm.slane %v446_v43, %v3215_v40 }
 0x12a   : > { %v444_v62 = vsel %vm443_vm3, %v442_v52, %v370_v27  ;;  %v570_v27 = vsel %vm443_vm3, %v428_v46, %v569_v11 }
 0x12b   : > { %v505_v47 = vrot.slane %v3219_v44, 4  ;;  %v3250_v8 = vperm.slane %v444_v62, %v3215_v40  ;;  %v578_v39 = vperm.slane %v570_v27, %v3215_v40 }
 0x12d   : > { %v506_v60 = vsel %vm443_vm3, %v3224_v54, %v505_v47  ;;  %v492_v22 = vsel %vm443_vm3, %v491_v10, %v3250_v8 }
 0x12e   : > { %v431_v2 = vpop.permute.xlu0 %430  ;;  %v3243_v5 = vperm.slane %v506_v60, %v3228_v59  ;;  %v3281_v34 = vperm.slane %v492_v22, %v3228_v59 }
 0x12f   : > { %v415_v58 = vpop.permute.xlu1 %414  ;;  %v581_v20 = vrot.slane %v431_v2, 4 }
 0x130   : > { %v467_v63 = vrot.slane %v415_v58, 4  ;;  %v470_v0 = vsel %vm443_vm3, %v415_v58, %v469_v55  ;;  %v553_v17 = vrot.slane %v3243_v5, 4  ;;  %v541_v46 = vrot.slane %v3281_v34, 4 }
 0x131   : > { %v3239_v3 = vperm.slane %v470_v0, %v3215_v40  ;;  %v582_v35 = vsel %vm443_vm3, %v437_v12, %v581_v20  ;;  %v603_v58 = vrot.slane %v574_v41, 4 }
 0x132   : > { %v468_v4 = vsel %vm443_vm3, %v467_v63, %v409_v32  ;;  %v580_v32 = vsel %vm443_vm3, %v579_v23, %v431_v2 }
 0x133   : > { %v529_v9 = vrot.slane %v3239_v3, 4  ;;  %v3255_v13 = vperm.slane %v468_v4, %v3215_v40  ;;  %v586_v43 = vperm.slane %v580_v32, %v3215_v40  ;;  %v615_v32 = vrot.slane %v578_v39, 4 }
 0x135   : > { %v530_v14 = vsel %vm443_vm3, %v490_v7, %v529_v9  ;;  %v516_v29 = vsel %vm443_vm3, %v515_v18, %v3255_v13  ;;  %v629_v55 = vrot.slane %v586_v43, 4  ;;  %v517_v61 = vrot.slane %v3255_v13, 4 }
 0x136   : > { %v3260_v16 = vperm.slane %v530_v14, %v3228_v59  ;;  %v440_v36 = vpop.permute.xlu0 %439  ;;  %v522_v42 = vperm.slane %v516_v29, %v3228_v59  ;;  %v528_v7 = vsel %vm443_vm3, %v527_v53, %v3239_v3 }
 0x137   : > { %v425_v21 = vpop.permute.xlu1 %424  ;;  %v591_v45 = vrot.slane %v440_v36, 4  ;;  %v3318_v3 = vperm.slane %v528_v7, %v3228_v59  ;;  %v518_v19 = vsel %vm443_vm3, %v3246_v6, %v517_v61 }
 0x138   : > { %v555_v24 = vrot.slane %v425_v21, 4  ;;  %v558_v25 = vsel %vm443_vm3, %v425_v21, %v557_v15  ;;  %v554_v26 = vsel %vm443_vm3, %v3260_v16, %v553_v17  ;;  %v542_v52 = vsel %vm443_vm3, %v522_v42, %v541_v46 }
 0x139   : > { %v3271_v28 = vperm.slane %v558_v25, %v3215_v40  ;;  %711 = vrot.lane.b32.xlu0 %v554_v26, %s3094_s11  ;;  %v493_v25 = vrot.slane %v3250_v8, 4  ;;  %v526_v6 = vperm.slane %v518_v19, %v3228_v59  ;;  %v539_v29 = vrot.slane %v522_v42, 4 }
 0x13a   : > { %v556_v33 = vsel %vm443_vm3, %v555_v24, %v3195_v30  ;;  %v590_v30 = vperm.slane %v582_v35, %v3215_v40  ;;  %v503_v24 = vrot.slane %v3224_v54, 4  ;;  %v547_v31 = vrot.slane %v3318_v3, 4 }
 0x13b   : > { %v562_v37 = vperm.slane %v556_v33, %v3215_v40  ;;  %v617_v38 = vrot.slane %v3271_v28, 4  ;;  %v494_v8 = vsel %vm443_vm3, %v3236_v1, %v493_v25  ;;  %v543_v35 = vrot.slane %v526_v6, 4 }
 0x13c   : > { %v641_v60 = vrot.slane %v590_v30, 4  ;;  %v504_v27 = vsel %vm443_vm3, %v503_v24, %v3219_v44  ;;  %v502_v44 = vperm.slane %v494_v8, %v3228_v59 }
 0x13d   : > { %v618_v47 = vsel %vm443_vm3, %v578_v39, %v617_v38  ;;  %v605_v48 = vrot.slane %v562_v37, 4  ;;  %v604_v12 = vsel %vm443_vm3, %v603_v58, %v562_v37  ;;  %v510_v33 = vperm.slane %v504_v27, %v3228_v59 }
 0x13e   : > { %v3298_v57 = vperm.slane %v618_v47, %v3228_v59  ;;  %v610_v22 = vperm.slane %v604_v12, %v3228_v59  ;;  %v540_v37 = vsel %vm443_vm3, %v539_v29, %v3281_v34  ;;  %v544_v1 = vsel %vm443_vm3, %v543_v35, %v502_v44 }
 0x13f   : > { %v434_v49 = vpop.permute.xlu1 %433  ;;  %v606_v4 = vsel %vm443_vm3, %v574_v41, %v605_v48  ;;  %v548_v38 = vsel %vm443_vm3, %v547_v31, %v510_v33  ;;  %v545_v48 = vrot.slane %v502_v44, 4  ;;  %v551_v58 = vrot.slane %v3260_v16, 4 }
 0x140   : > { %v592_v50 = vsel %vm443_vm3, %v591_v45, %v434_v49  ;;  %v593_v51 = vrot.slane %v434_v49, 4  ;;  %v665_v11 = vrot.slane %v3298_v57, 4  ;;  %v614_v15 = vperm.slane %v606_v4, %v3228_v59 }
 0x141   : > { %v598_v56 = vperm.slane %v592_v50, %v3215_v40  ;;  %687 = vrot.lane.b32.xlu0 %v542_v52, %s3094_s11  ;;  %v653_v41 = vrot.slane %v610_v22, 4  ;;  %v546_v49 = vsel %vm443_vm3, %v526_v6, %v545_v48  ;;  %v549_v50 = vrot.slane %v510_v33, 4 }
 0x142   : > { %v594_v62 = vsel %vm443_vm3, %v440_v36, %v593_v51  ;;  %v616_v36 = vsel %vm443_vm3, %v615_v32, %v3271_v28  ;;  %v3095_v28 = vmov 0.0   ;;  %v657_v46 = vrot.slane %v614_v15, 4 }
 0x143   : > { %v602_v63 = vperm.slane %v594_v62, %v3215_v40  ;;  %v627_v0 = vrot.slane %v598_v56, 4  ;;  %v630_v2 = vsel %vm443_vm3, %v598_v56, %v629_v55  ;;  %v622_v42 = vperm.slane %v616_v36, %v3228_v59  ;;  %374 = vst.msk [vmem:[#allocation2 + $0x8] sm:$0xff] %vm372_vm4, %v3095_v28 }
 0x144   : > { %v638_v9 = vperm.slane %v630_v2, %v3228_v59  ;;  %376 = vst.msk [vmem:[#allocation2 + $0x10] sm:$0x3] %vm375_vm5, %v3095_v28  ;;  %v550_v51 = vsel %vm443_vm3, %v3318_v3, %v549_v50 }
 0x145   : > { %v642_v10 = vsel %vm443_vm3, %v602_v63, %v641_v60  ;;  %v628_v13 = vsel %vm443_vm3, %v627_v0, %v586_v43  ;;  %v639_v54 = vrot.slane %v602_v63, 4  ;;  %373 = vst.msk [vmem:[#allocation2] sm:$0xff] %vm372_vm4, %v3095_v28  ;;  %v661_v43 = vrot.slane %v622_v42, 4 }
 0x146   : > { %v3313_v14 = vperm.slane %v642_v10, %v3228_v59  ;;  %v655_v17 = vrot.slane %v638_v9, 4  ;;  %v634_v18 = vperm.slane %v628_v13, %v3228_v59  ;;  %377 = vst.msk [vmem:[#allocation2 + $0x18] sm:$0xff] %vm372_vm4, %v3095_v28  ;;  %v658_v47 = vsel %vm443_vm3, %v638_v9, %v657_v46 }
 0x147   : > { %v640_v39 = vsel %vm443_vm3, %v639_v54, %v590_v30  ;;  %378 = vst.msk [vmem:[#allocation2 + $0x20] sm:$0xff] %vm372_vm4, %v3095_v28  ;;  %v552_v60 = vsel %vm443_vm3, %v551_v58, %v3243_v5 }
 0x148   : > { %v666_v20 = vsel %vm443_vm3, %v3313_v14, %v665_v11  ;;  %v656_v21 = vsel %vm443_vm3, %v655_v17, %v614_v15  ;;  %v651_v23 = vrot.slane %v634_v18, 4  ;;  %v646_v34 = vperm.slane %v640_v39, %v3228_v59  ;;  %379 = vst.msk [vmem:[#allocation2 + $0x28] sm:$0x3] %vm375_vm5, %v3095_v28 }
 0x149   : > { %713 = vrot.lane.b32.xlu1 %v666_v20, %s3094_s11  ;;  %693 = vrot.lane.b32.xlu0 %v656_v21, %s3094_s11  ;;  %v654_v30 = vsel %vm443_vm3, %v634_v18, %v653_v41  ;;  %380 = vst.msk [vmem:[#allocation2 + $0x30] sm:$0xff] %vm372_vm4, %v3095_v28  ;;  %v663_v53 = vrot.slane %v3313_v14, 4 }
 0x14a   : > { %v652_v26 = vsel %vm443_vm3, %v651_v23, %v610_v22  ;;  %v662_v45 = vsel %vm443_vm3, %v646_v34, %v661_v43  ;;  %381 = vst.msk [vmem:[#allocation2 + $0x38] sm:$0xff] %vm372_vm4, %v3095_v28  ;;  %v659_v52 = vrot.slane %v646_v34, 4 }
 0x14b   : > { %685 = vrot.lane.b32.xlu2 %v652_v26, %s3094_s11  ;;  %382 = vst.msk [vmem:[#allocation2 + $0x40] sm:$0x3] %vm375_vm5, %v3095_v28  ;;  %v664_v56 = vsel %vm443_vm3, %v663_v53, %v3298_v57 }
 0x14c   : > { %383 = vst.msk [vmem:[#allocation2 + $0x48] sm:$0xff] %vm372_vm4, %v3095_v28  ;;  %v660_v55 = vsel %vm443_vm3, %v659_v52, %v622_v42 }
 0x14d   : > { %384 = vst.msk [vmem:[#allocation2 + $0x50] sm:$0xff] %vm372_vm4, %v3095_v28 }
 0x14e   : > { %385 = vst.msk [vmem:[#allocation2 + $0x58] sm:$0x3] %vm375_vm5, %v3095_v28 }
 0x14f   : > { %386 = vst.msk [vmem:[#allocation2 + $0x60] sm:$0xff] %vm372_vm4, %v3095_v28 }
 0x150   : > { %387 = vst.msk [vmem:[#allocation2 + $0x68] sm:$0xff] %vm372_vm4, %v3095_v28 }
 0x151   : > { %683 = vrot.lane.b32.xlu1 %v540_v37, %s3094_s11  ;;  %699 = vrot.lane.b32.xlu0 %v548_v38, %s3094_s11  ;;  %388 = vst.msk [vmem:[#allocation2 + $0x70] sm:$0x3] %vm375_vm5, %v3095_v28 }
 0x152   : > { %389 = vst.msk [vmem:[#allocation2 + $0x78] sm:$0xff] %vm372_vm4, %v3095_v28 }
 0x153   : > { %691 = vrot.lane.b32.xlu2 %v544_v1, %s3094_s11  ;;  %390 = vst.msk [vmem:[#allocation2 + $0x80] sm:$0xff] %vm372_vm4, %v3095_v28 }
 0x154   : > { %391 = vst.msk [vmem:[#allocation2 + $0x88] sm:$0x3] %vm375_vm5, %v3095_v28 }
 0x155   : > { %392 = vst.msk [vmem:[#allocation2 + $0x90] sm:$0xff] %vm372_vm4, %v3095_v28 }
 0x156   : > { %393 = vst.msk [vmem:[#allocation2 + $0x98] sm:$0xff] %vm372_vm4, %v3095_v28 }
 0x157   : > { %394 = vst.msk [vmem:[#allocation2 + $0xa0] sm:$0x3] %vm375_vm5, %v3095_v28 }
 0x158   : > { %395 = vst.msk [vmem:[#allocation2 + $0xa8] sm:$0xff] %vm372_vm4, %v3095_v28 }
 0x159   : > { %689 = vrot.lane.b32.xlu1 %v654_v30, %s3094_s11  ;;  %705 = vrot.lane.b32.xlu0 %v662_v45, %s3094_s11  ;;  %396 = vst.msk [vmem:[#allocation2 + $0xb0] sm:$0xff] %vm372_vm4, %v3095_v28 }
 0x15a   : > { %397 = vst.msk [vmem:[#allocation2 + $0xb8] sm:$0x3] %vm375_vm5, %v3095_v28 }
 0x15b   : > { %697 = vrot.lane.b32.xlu2 %v658_v47, %s3094_s11 }
 0x161   : > { %695 = vrot.lane.b32.xlu1 %v546_v49, %s3094_s11 }
 0x163   : > { %703 = vrot.lane.b32.xlu2 %v550_v51, %s3094_s11 }
 0x169   : > { %701 = vrot.lane.b32.xlu1 %v660_v55, %s3094_s11 }
 0x16b   : > { %709 = vrot.lane.b32.xlu2 %v664_v56, %s3094_s11 }
 0x171   : > { %707 = vrot.lane.b32.xlu1 %v552_v60, %s3094_s11 }
 0x1a5   : > { %v686_v61 = vpop.permute.xlu2 %685 }
 0x1a6   : > { %733 = vst.msk [vmem:[#allocation2 + $0x9] sm:$0xff] %vm731_vm6, %v686_v61 }
 0x1ab   : > { %v712_v62 = vpop.permute.xlu0 %711 }
 0x1ac   : > { %746 = vst.msk [vmem:[#allocation2 + $0xa9] sm:$0xff] %vm731_vm6, %v712_v62 }
 0x1ad   : > { %v692_v63 = vpop.permute.xlu2 %691 }
 0x1ae   : > { %736 = vst.msk [vmem:[#allocation2 + $0x31] sm:$0xff] %vm731_vm6, %v692_v63 }
 0x1b3   : > { %v688_v57 = vpop.permute.xlu0 %687 }
 0x1b4   : > { %734 = vst.msk [vmem:[#allocation2 + $0x19] sm:$0xff] %vm731_vm6, %v688_v57 }
 0x1b5   : > { %v698_v0 = vpop.permute.xlu2 %697 }
 0x1b6   : > { %739 = vst.msk [vmem:[#allocation2 + $0x51] sm:$0xff] %vm731_vm6, %v698_v0 }
 0x1bb   : > { %v714_v16 = vpop.permute.xlu1 %713  ;;  %v694_v5 = vpop.permute.xlu0 %693 }
 0x1bc   : > { %747 = vst.msk [vmem:[#allocation2 + $0xb1] sm:$0xff] %vm731_vm6, %v714_v16 }
 0x1bd   : > { %737 = vst.msk [vmem:[#allocation2 + $0x39] sm:$0xff] %vm731_vm6, %v694_v5  ;;  %v704_v2 = vpop.permute.xlu2 %703 }
 0x1be   : > { %742 = vst.msk [vmem:[#allocation2 + $0x79] sm:$0xff] %vm731_vm6, %v704_v2 }
 0x1c3   : > { %v684_v4 = vpop.permute.xlu1 %683  ;;  %v700_v7 = vpop.permute.xlu0 %699 }
 0x1c4   : > { %732 = vst.msk [vmem:[#allocation2 + $0x1] sm:$0xff] %vm731_vm6, %v684_v4 }
 0x1c5   : > { %740 = vst.msk [vmem:[#allocation2 + $0x61] sm:$0xff] %vm731_vm6, %v700_v7  ;;  %v710_v9 = vpop.permute.xlu2 %709 }
 0x1c6   : > { %745 = vst.msk [vmem:[#allocation2 + $0x99] sm:$0xff] %vm731_vm6, %v710_v9 }
 0x1cb   : > { %v690_v10 = vpop.permute.xlu1 %689  ;;  %v706_v11 = vpop.permute.xlu0 %705 }
 0x1cc   : > { %735 = vst.msk [vmem:[#allocation2 + $0x21] sm:$0xff] %vm731_vm6, %v690_v10 }
 0x1cd   : > { %743 = vst.msk [vmem:[#allocation2 + $0x81] sm:$0xff] %vm731_vm6, %v706_v11 }
 0x1d3   : > { %v696_v12 = vpop.permute.xlu1 %695 }
 0x1d4   : > { %738 = vst.msk [vmem:[#allocation2 + $0x49] sm:$0xff] %vm731_vm6, %v696_v12 }
 0x1db   : > { %v702_v13 = vpop.permute.xlu1 %701 }
 0x1dc   : > { %741 = vst.msk [vmem:[#allocation2 + $0x69] sm:$0xff] %vm731_vm6, %v702_v13 }
 0x1e3   : > { %v708_v14 = vpop.permute.xlu1 %707 }
 0x1e4   : > { %744 = vst.msk [vmem:[#allocation2 + $0x91] sm:$0xff] %vm731_vm6, %v708_v14 }
 0x1eb   : > { %v753_v15 = vld [vmem:[%s3414_s13 + $0x60] sm:$0xff]  ;;  %v3418_v17 = vld [vmem:[%s3414_s13 + $0x78] sm:$0xff]  ;;  %v3421_v18 = vld [vmem:[%s3414_s13 + $0x30] sm:$0xff] }
 0x1ec   : > { %v2827_v3 = vpack.i.bf16 %v3418_v17, %v753_v15  ;;  %v3425_v19 = vld [vmem:[%s3414_s13 + $0x48] sm:$0xff]  ;;  %v3428_v20 = vld [vmem:[%s3414_s13] sm:$0xff]  ;;  %v3431_v21 = vld [vmem:[%s3414_s13 + $0x18] sm:$0xff]  ;;  %v757_v29 = vrot.slane %v3421_v18, 4  ;;  %v783_v37 = vrot.slane %v753_v15, 4  ;;  %v795_v49 = vrot.slane %v3418_v17, 4 }
 0x1ed   : > { %v2822_v22 = vpack.i.bf16 %v3425_v19, %v3421_v18  ;;  %v2817_v23 = vpack.i.bf16 %v3431_v21, %v3428_v20  ;;  %v769_v24 = vrot.slane %v3425_v19, 4  ;;  %v3442_v25 = vld [vmem:[%s3414_s13 + $0xa8] sm:$0xff]  ;;  %v755_v6 = vld [vmem:[%s3414_s13 + $0x90] sm:$0xff]  ;;  %v2709_v39 = vld [vmem:[%s3414_s13 + $0x19] sm:$0xff]  ;;  %v759_v51 = vrot.slane %v3428_v20, 4 }
 0x1ee   : > { %2828 = vrot.lane.b32.xlu2 %v2827_v3, %s3096_s14  ;;  %v793_v27 = vrot.slane %v3442_v25, 4  ;;  %v2832_v32 = vpack.i.bf16 %v3442_v25, %v755_v6  ;;  %v781_v54 = vrot.slane %v755_v6, 4  ;;  %v758_v35 = vsel %vm443_vm3, %v757_v29, %v3428_v20  ;;  %v2710_v36 = vld [vmem:[%s3414_s13 + $0x31] sm:$0xff]  ;;  %v3468_v1 = vld [vmem:[%s3414_s13 + $0x49] sm:$0xff]  ;;  %v3493_v47 = vld [vmem:[%s3414_s13 + $0x1a] sm:$0xff] }
 0x1ef   : > { %2823 = vrot.lane.b32.xlu1 %v2822_v22, %s3096_s14  ;;  %2818 = vrot.lane.b32.xlu0 %v2817_v23, %s3096_s14  ;;  %v770_v26 = vsel %vm443_vm3, %v769_v24, %v3431_v21  ;;  %v3471_v42 = vld [vmem:[%s3414_s13 + $0x4a] sm:$0xff]  ;;  %v3474_v28 = vld [vmem:[%s3414_s13 + $0x32] sm:$0xff]  ;;  %v3484_v30 = vperm.slane %v758_v35, %v3215_v40  ;;  %v1363_v48 = vrot.slane %v2710_v36, 4  ;;  %v3511_v58 = vsel %vm443_vm3, %v755_v6, %v783_v37 }
 0x1f0   : > { %v3450_v31 = vperm.slane %v770_v26, %v3215_v40  ;;  %v794_v8 = vsel %vm443_vm3, %v793_v27, %v3418_v17  ;;  %v782_v44 = vsel %vm443_vm3, %v781_v54, %v753_v15  ;;  %v3477_v34 = vld [vmem:[%s3414_s13 + $0xaa] sm:$0xff]  ;;  %v3487_v45 = vld [vmem:[%s3414_s13 + $0x92] sm:$0xff]  ;;  %v3499_v52 = vld [vmem:[%s3414_s13 + $0x1] sm:$0xff]  ;;  %v3513_v60 = vpack.i.bf16 %v2710_v36, %v2709_v39 }
 0x1f1   : > { %v3459_v33 = vperm.slane %v794_v8, %v3215_v40  ;;  %v3480_v41 = vld [vmem:[%s3414_s13 + $0x91] sm:$0xff]  ;;  %v3490_v46 = vld [vmem:[%s3414_s13 + $0xa9] sm:$0xff]  ;;  %v3505_v55 = vld [vmem:[%s3414_s13 + $0x61] sm:$0xff]  ;;  %v3508_v56 = vperm.slane %v782_v44, %v3215_v40  ;;  %v2857_v61 = vpack.i.bf16 %v3471_v42, %v3468_v1  ;;  %v2882_v16 = vpack.i.bf16 %v3477_v34, %v3474_v28 }
 0x1f2   : > { %v805_v38 = vrot.slane %v3450_v31, 4  ;;  %v3502_v53 = vld [vmem:[%s3414_s13 + $0x2] sm:$0xff]  ;;  %v3518_v62 = vld [vmem:[%s3414_s13 + $0x79] sm:$0xff]  ;;  %v2862_v5 = vpack.i.bf16 %v3487_v45, %v3480_v41  ;;  %v2872_v2 = vpack.i.bf16 %v3493_v47, %v3490_v46  ;;  %v2877_v9 = vpack.i.bf16 %v3480_v41, %v3468_v1 }
 0x1f3   : > { %v829_v43 = vrot.slane %v3459_v33, 4  ;;  %v3521_v63 = vld [vmem:[%s3414_s13 + $0x62] sm:$0xff]  ;;  %v3524_v57 = vld [vmem:[%s3414_s13 + $0x7a] sm:$0xff]  ;;  %v2897_v7 = vpack.i.bf16 %v3502_v53, %v3499_v52  ;;  %v1364_v10 = vsel %vm443_vm3, %v1363_v48, %v3499_v52  ;;  %v1365_v11 = vrot.slane %v3499_v52, 4 }
 0x1f4   : > { %v806_v0 = vsel %vm443_vm3, %v805_v38, %v3484_v30  ;;  %v2887_v12 = vpack.i.bf16 %v3518_v62, %v3505_v55  ;;  %v2912_v13 = vpack.i.bf16 %v3499_v52, %v3518_v62  ;;  %v2892_v14 = vpack.i.bf16 %v3524_v57, %v3521_v63 }
 0x1f5   : > { %v830_v4 = vsel %vm443_vm3, %v829_v43, %v3508_v56  ;;  %v3554_v15 = vperm.slane %v806_v0, %v3228_v59  ;;  %v1387_v24 = vrot.slane %v3480_v41, 4  ;;  %v1370_v26 = vperm.slane %v1364_v10, %v3215_v40 }
 0x1f6   : > { %2838 = vrot.lane.b32.xlu2 %v2817_v23, %s3097_s15  ;;  %v1377_v23 = vrot.slane %v2709_v39, 4  ;;  %v1389_v6 = vrot.slane %v3505_v55, 4  ;;  %v1399_v27 = vrot.slane %v3490_v46, 4  ;;  %v1401_v29 = vrot.slane %v3518_v62, 4 }
 0x1f7   : > { %2848 = vrot.lane.b32.xlu1 %v2827_v3, %s3097_s15  ;;  %2833 = vrot.lane.b32.xlu0 %v2832_v32, %s3096_s14  ;;  %v3557_v3 = vperm.slane %v830_v4, %v3228_v59  ;;  %v1388_v54 = vsel %vm443_vm3, %v1387_v24, %v3505_v55  ;;  %v1366_v8 = vsel %vm443_vm3, %v2710_v36, %v1365_v11 }
 0x1f8   : > { %v1378_v35 = vsel %vm443_vm3, %v3468_v1, %v1377_v23  ;;  %v1394_v38 = vperm.slane %v1388_v54, %v3215_v40  ;;  %v1400_v44 = vsel %vm443_vm3, %v1399_v27, %v3518_v62  ;;  %v3576_v43 = vperm.slane %v1366_v8, %v3215_v40 }
 0x1f9   : > { %v1386_v48 = vperm.slane %v1378_v35, %v3215_v40  ;;  %v1390_v36 = vsel %vm443_vm3, %v3480_v41, %v1389_v6  ;;  %v1402_v0 = vsel %vm443_vm3, %v3490_v46, %v1401_v29  ;;  %v1972_v6 = vrot.slane %v3474_v28, 4 }
 0x1fa   : > { %v1398_v10 = vperm.slane %v1390_v36, %v3215_v40  ;;  %v1410_v11 = vperm.slane %v1402_v0, %v3215_v40  ;;  %v1437_v27 = vrot.slane %v1394_v38, 4  ;;  %v1984_v54 = vrot.slane %v3471_v42, 4 }
 0x1fb   : > { %v1423_v24 = vrot.slane %v1386_v48, 4 }
 0x1fc   : > { %v1447_v29 = vrot.slane %v1410_v11, 4 }
 0x1fe   : > { %2853 = vrot.lane.b32.xlu2 %v2832_v32, %s3097_s15 }
 0x1ff   : > { %2868 = vrot.lane.b32.xlu1 %v3513_v60, %s3096_s14  ;;  %2843 = vrot.lane.b32.xlu0 %v2822_v22, %s3097_s15  ;;  %v1375_v22 = vrot.slane %v3468_v1, 4 }
 0x201   : > { %v1376_v32 = vsel %vm443_vm3, %v1375_v22, %v2709_v39  ;;  %v1406_v39 = vperm.slane %v1400_v44, %v3215_v40  ;;  %v1413_v22 = vrot.slane %v1370_v26, 4  ;;  %v853_v44 = vrot.slane %v3557_v3, 4 }
 0x202   : > { %v1382_v37 = vperm.slane %v1376_v32, %v3215_v40 }
 0x203   : > { %v1435_v23 = vrot.slane %v1406_v39, 4 }
 0x204   : > { %v1411_v4 = vrot.slane %v1382_v37, 4 }
 0x205   : > { %v1436_v35 = vsel %vm443_vm3, %v1435_v23, %v1394_v38 }
 0x206   : > { %2858 = vrot.lane.b32.xlu2 %v2857_v61, %s3096_s14  ;;  %v1412_v32 = vsel %vm443_vm3, %v1411_v4, %v1370_v26  ;;  %v1414_v61 = vsel %vm443_vm3, %v1382_v37, %v1413_v22  ;;  %v1448_v26 = vsel %vm443_vm3, %v1447_v29, %v1398_v10  ;;  %v1438_v37 = vsel %vm443_vm3, %v1406_v39, %v1437_v27 }
 0x207   : > { %2883 = vrot.lane.b32.xlu1 %v2882_v16, %s3096_s14  ;;  %2863 = vrot.lane.b32.xlu0 %v2862_v5, %s3096_s14  ;;  %v3594_v8 = vperm.slane %v1412_v32, %v3228_v59  ;;  %v1424_v16 = vsel %vm443_vm3, %v1423_v24, %v3576_v43  ;;  %v1422_v5 = vperm.slane %v1414_v61, %v3228_v59 }
 0x208   : > { %v1430_v36 = vperm.slane %v1424_v16, %v3228_v59  ;;  %v3605_v0 = vperm.slane %v1436_v35, %v3228_v59  ;;  %v1446_v38 = vperm.slane %v1438_v37, %v3228_v59  ;;  %v1454_v23 = vperm.slane %v1448_v26, %v3228_v59 }
 0x209   : > { %v1461_v4 = vrot.slane %v3594_v8, 4  ;;  %v1465_v22 = vrot.slane %v1422_v5, 4  ;;  %v1973_v32 = vsel %vm443_vm3, %v1972_v6, %v3502_v53  ;;  %v1985_v61 = vsel %vm443_vm3, %v1984_v54, %v3493_v47 }
 0x20a   : > { %v1469_v24 = vrot.slane %v1430_v36, 4  ;;  %v1463_v27 = vrot.slane %v1446_v38, 4  ;;  %v1979_v35 = vperm.slane %v1973_v32, %v3215_v40  ;;  %v1991_v54 = vperm.slane %v1985_v61, %v3215_v40 }
 0x20b   : > { %v3616_v39 = vsel %vm443_vm3, %v3605_v0, %v1461_v4  ;;  %v3619_v29 = vsel %vm443_vm3, %v1446_v38, %v1465_v22  ;;  %v1996_v16 = vrot.slane %v3487_v45, 4  ;;  %v1998_v26 = vrot.slane %v3521_v63, 4 }
 0x20c   : > { %v3627_v6 = vsel %vm443_vm3, %v1454_v23, %v1469_v24  ;;  %v2008_v37 = vrot.slane %v3477_v34, 4  ;;  %v2010_v4 = vrot.slane %v3524_v57, 4  ;;  %v3647_v38 = vsel %vm443_vm3, %v853_v44, %v3554_v15 }
 0x20d   : > { %v1997_v22 = vsel %vm443_vm3, %v1996_v16, %v3521_v63  ;;  %v1467_v24 = vrot.slane %v1454_v23, 4  ;;  %v1425_v32 = vrot.slane %v3576_v43, 4 }
 0x20e   : > { %2873 = vrot.lane.b32.xlu2 %v2872_v2, %s3096_s14  ;;  %v3641_v2 = vsel %vm443_vm3, %v1463_v27, %v1422_v5  ;;  %v2003_v1 = vperm.slane %v1997_v22, %v3215_v40  ;;  %v2009_v41 = vsel %vm443_vm3, %v2008_v37, %v3524_v57  ;;  %v2022_v5 = vrot.slane %v1979_v35, 4 }
 0x20f   : > { %2898 = vrot.lane.b32.xlu1 %v2897_v7, %s3096_s14  ;;  %2878 = vrot.lane.b32.xlu0 %v2877_v9, %s3097_s15  ;;  %v2020_v7 = vrot.slane %v1991_v54, 4  ;;  %v1449_v9 = vrot.slane %v1398_v10, 4  ;;  %v2015_v61 = vperm.slane %v2009_v41, %v3215_v40  ;;  %v3658_v44 = vsel %vm443_vm3, %v1467_v24, %v1430_v36 }
 0x210   : > { %v1426_v16 = vsel %vm443_vm3, %v1386_v48, %v1425_v32  ;;  %v2023_v37 = vsel %vm443_vm3, %v1991_v54, %v2022_v5  ;;  %v1974_v48 = vrot.slane %v3502_v53, 4  ;;  %v1986_v24 = vrot.slane %v3493_v47, 4 }
 0x211   : > { %v2021_v27 = vsel %vm443_vm3, %v2020_v7, %v1979_v35  ;;  %v1434_v43 = vperm.slane %v1426_v16, %v3228_v59  ;;  %v1450_v22 = vsel %vm443_vm3, %v1410_v11, %v1449_v9  ;;  %v2044_v10 = vrot.slane %v2015_v61, 4 }
 0x212   : > { %v3662_v23 = vperm.slane %v2021_v27, %v3228_v59  ;;  %v1458_v50 = vperm.slane %v1450_v22, %v3228_v59  ;;  %v2031_v41 = vperm.slane %v2023_v37, %v3228_v59  ;;  %v2046_v35 = vrot.slane %v2003_v1, 4 }
 0x213   : > { %v1473_v7 = vrot.slane %v1434_v43, 4  ;;  %v2045_v11 = vsel %vm443_vm3, %v2044_v10, %v2003_v1  ;;  %v807_v5 = vrot.slane %v3484_v30, 4  ;;  %v1975_v52 = vsel %vm443_vm3, %v3474_v28, %v1974_v48 }
 0x214   : > { %v2070_v36 = vrot.slane %v3662_v23, 4  ;;  %v1471_v54 = vrot.slane %v1458_v50, 4  ;;  %v2047_v32 = vsel %vm443_vm3, %v2015_v61, %v2046_v35  ;;  %v2074_v9 = vrot.slane %v2031_v41, 4 }
 0x215   : > { %v3691_v1 = vsel %vm443_vm3, %v1458_v50, %v1473_v7  ;;  %v2055_v61 = vperm.slane %v2047_v32, %v3228_v59  ;;  %v1987_v62 = vsel %vm443_vm3, %v3471_v42, %v1986_v24  ;;  %v760_v50 = vsel %vm443_vm3, %v3421_v18, %v759_v51 }
 0x216   : > { %2888 = vrot.lane.b32.xlu2 %v2887_v12, %s3096_s14  ;;  %v3688_v12 = vperm.slane %v2045_v11, %v3228_v59  ;;  %v3695_v30 = vsel %vm443_vm3, %v1471_v54, %v1434_v43  ;;  %v1983_v43 = vperm.slane %v1975_v52, %v3215_v40  ;;  %v1995_v22 = vperm.slane %v1987_v62, %v3215_v40 }
 0x217   : > { %2913 = vrot.lane.b32.xlu1 %v2912_v13, %s3097_s15  ;;  %2893 = vrot.lane.b32.xlu0 %v2892_v14, %s3096_s14  ;;  %v1999_v13 = vsel %vm443_vm3, %v3487_v45, %v1998_v26  ;;  %v2072_v27 = vrot.slane %v2055_v61, 4  ;;  %v3712_v16 = vsel %vm443_vm3, %v2055_v61, %v2074_v9  ;;  %v2011_v20 = vsel %vm443_vm3, %v3477_v34, %v2010_v4 }
 0x218   : > { %v3709_v14 = vsel %vm443_vm3, %v3688_v12, %v2070_v36  ;;  %v2007_v37 = vperm.slane %v1999_v13, %v3215_v40  ;;  %v3721_v18 = vperm.slane %v3511_v58, %v3215_v40  ;;  %v808_v51 = vsel %vm443_vm3, %v3450_v31, %v807_v5 }
 0x219   : > { %v3726_v26 = vsel %vm443_vm3, %v2072_v27, %v2031_v41  ;;  %v2019_v10 = vperm.slane %v2011_v20, %v3215_v40  ;;  %v796_v35 = vsel %vm443_vm3, %v3442_v25, %v795_v49  ;;  %v2032_v36 = vrot.slane %v1995_v22, 4 }
 0x21a   : > { %v2034_v7 = vrot.slane %v1983_v43, 4  ;;  %v2058_v4 = vrot.slane %v2007_v37, 4  ;;  %v2927_v58 = vpack.i.bf16 %v3521_v63, %v3477_v34  ;;  %v2907_v48 = vpack.i.bf16 %v3505_v55, %v3490_v46 }
 0x21b   : > { %v831_v31 = vrot.slane %v3508_v56, 4  ;;  %v2056_v41 = vrot.slane %v2019_v10, 4  ;;  %v816_v17 = vperm.slane %v808_v51, %v3228_v59  ;;  %v2033_v24 = vsel %vm443_vm3, %v2032_v36, %v1983_v43 }
 0x21c   : > { %v2035_v25 = vsel %vm443_vm3, %v1995_v22, %v2034_v7  ;;  %v2059_v49 = vsel %vm443_vm3, %v2019_v10, %v2058_v4  ;;  %v843_v11 = vrot.slane %v3721_v18, 4  ;;  %v2039_v34 = vperm.slane %v2033_v24, %v3228_v59 }
 0x21d   : > { %v2057_v46 = vsel %vm443_vm3, %v2056_v41, %v2007_v37  ;;  %v2043_v55 = vperm.slane %v2035_v25, %v3228_v59  ;;  %v804_v56 = vperm.slane %v796_v35, %v3215_v40  ;;  %v2067_v32 = vperm.slane %v2059_v49, %v3228_v59 }
 0x21e   : > { %2903 = vrot.lane.b32.xlu2 %v3513_v60, %s3097_s15  ;;  %v4700_v60 = vrot.slane %v3431_v21, 4  ;;  %v2063_v54 = vperm.slane %v2057_v46, %v3228_v59  ;;  %v832_v9 = vsel %vm443_vm3, %v3459_v33, %v831_v31  ;;  %v768_v5 = vperm.slane %v760_v50, %v3215_v40 }
 0x21f   : > { %2928 = vrot.lane.b32.xlu1 %v2927_v58, %s3097_s15  ;;  %2908 = vrot.lane.b32.xlu0 %v2907_v48, %s3097_s15  ;;  %v2078_v61 = vrot.slane %v2039_v34, 4  ;;  %v2082_v52 = vrot.slane %v2043_v55, 4  ;;  %v859_v62 = vrot.slane %v816_v17, 4  ;;  %v2080_v27 = vrot.slane %v2067_v32, 4 }
 0x220   : > { %v772_v63 = vsel %vm443_vm3, %v3425_v19, %v4700_v60  ;;  %v2076_v13 = vrot.slane %v2063_v54, 4  ;;  %v844_v21 = vsel %vm443_vm3, %v804_v56, %v843_v11  ;;  %v2917_v33 = vpack.i.bf16 %v3487_v45, %v3471_v42 }
 0x221   : > { %v780_v43 = vperm.slane %v772_v63, %v3215_v40  ;;  %v3763_v19 = vsel %vm443_vm3, %v2063_v54, %v2078_v61  ;;  %v3766_v22 = vsel %vm443_vm3, %v2067_v32, %v2082_v52  ;;  %v840_v50 = vperm.slane %v832_v9, %v3228_v59 }
 0x222   : > { %4701 = vst [vmem:[#allocation3_spill] sm:$0xff] %v3766_v22  ;;  %v3772_v37 = vsel %vm443_vm3, %v2076_v13, %v2039_v34  ;;  %v3775_v20 = vsel %vm443_vm3, %v2080_v27, %v2043_v55  ;;  %v2922_v51 = vpack.i.bf16 %v3474_v28, %v3493_v47  ;;  %v819_v10 = vrot.slane %v768_v5, 4 }
 0x223   : > { %4702 = vst [vmem:[#allocation4_spill] sm:$0xff] %v3775_v20  ;;  %v860_v35 = vsel %vm443_vm3, %v840_v50, %v859_v62  ;;  %v852_v36 = vperm.slane %v844_v21, %v3228_v59  ;;  %v817_v42 = vrot.slane %v780_v43, 4  ;;  %v857_v4 = vrot.slane %v840_v50, 4 }
 0x224   : > { %v820_v45 = vsel %vm443_vm3, %v780_v43, %v819_v10  ;;  %v2932_v28 = vpack.i.bf16 %v3502_v53, %v3524_v57  ;;  %v841_v48 = vrot.slane %v804_v56, 4  ;;  %v1459_v25 = vrot.slane %v3605_v0, 4 }
 0x225   : > { %v865_v7 = vrot.slane %v852_v36, 4  ;;  %v818_v58 = vsel %vm443_vm3, %v817_v42, %v768_v5  ;;  %v828_v47 = vperm.slane %v820_v45, %v3228_v59  ;;  %v858_v41 = vsel %vm443_vm3, %v857_v4, %v816_v17 }
 0x226   : > { %2918 = vrot.lane.b32.xlu2 %v2917_v33, %s3097_s15  ;;  %v824_v24 = vperm.slane %v818_v58, %v3228_v59  ;;  %v2068_v49 = vrot.slane %v3688_v12, 4  ;;  %v842_v53 = vsel %vm443_vm3, %v841_v48, %v3721_v18  ;;  %v855_v57 = vrot.slane %v3554_v15, 4 }
 0x227   : > { %2923 = vrot.lane.b32.xlu0 %v2922_v51, %s3097_s15  ;;  %878 = vrot.lane.b32.xlu1 %v860_v35, %s3085_s20  ;;  %v866_v31 = vsel %vm443_vm3, %v865_v7, %v828_v47  ;;  %v3806_v17 = vsel %vm443_vm3, %v1459_v25, %v3594_v8  ;;  %v848_v46 = vperm.slane %v842_v53, %v3228_v59 }
 0x228   : > { %v863_v11 = vrot.slane %v824_v24, 4  ;;  %v3802_v34 = vsel %vm443_vm3, %v2068_v49, %v3662_v23  ;;  %4704 = vst [vmem:[#allocation6_spill] sm:$0xff] %v3806_v17  ;;  %v856_v0 = vsel %vm443_vm3, %v3557_v3, %v855_v57  ;;  %v867_v23 = vrot.slane %v828_v47, 4 }
 0x229   : > { %4703 = vst [vmem:[#allocation5_spill] sm:$0xff] %v3802_v34  ;;  %v861_v15 = vrot.slane %v848_v46, 4 }
 0x22a   : > { %v864_v12 = vsel %vm443_vm3, %v848_v46, %v863_v11  ;;  %v868_v8 = vsel %vm443_vm3, %v852_v36, %v867_v23 }
 0x22b   : > { %v862_v18 = vsel %vm443_vm3, %v861_v15, %v824_v24 }
 0x22e   : > { %2933 = vrot.lane.b32.xlu2 %v2932_v28, %s3097_s15 }
 0x22f   : > { %890 = vrot.lane.b32.xlu1 %v866_v31, %s3089_s8  ;;  %874 = vrot.lane.b32.xlu0 %v858_v41, %s3091_s10 }
 0x236   : > { %870 = vrot.lane.b32.xlu2 %v856_v0, %s3090_s9 }
 0x237   : > { %886 = vrot.lane.b32.xlu0 %v864_v12, %s3086_s21 }
 0x23e   : > { %882 = vrot.lane.b32.xlu2 %v862_v18, %s3088_s23 }
 0x246   : > { %894 = vrot.lane.b32.xlu2 %v868_v8, %s3087_s22 }
 0x248   : > { %v2829_v55 = vpop.permute.xlu2 %2828 }
 0x249   : > { %v2831_v62 = vunpack.i.h.bf16 %v2829_v55  ;;  %v2830_v21 = vunpack.i.l.bf16 %v2829_v55 }
 0x24b   : > { %v982_v42 = vrot.slane %v2831_v62, 4  ;;  %v970_v31 = vrot.slane %v2830_v21, 4 }
 0x250   : > { %v3818_v56 = vpop.permute.xlu2 %2838 }
 0x251   : > { %v4685_v41 = vunpack.i.h.bf16 %v3818_v56  ;;  %v4684_v24 = vunpack.i.l.bf16 %v3818_v56 }
 0x258   : > { %v3820_v3 = vpop.permute.xlu2 %2853 }
 0x259   : > { %v2856_v51 = vunpack.i.h.bf16 %v3820_v3  ;;  %v2855_v58 = vunpack.i.l.bf16 %v3820_v3 }
 0x25b   : > { %v1216_v49 = vrot.slane %v2856_v51, 4  ;;  %v1204_v23 = vrot.slane %v2855_v58, 4 }
 0x260   : > { %v3822_v54 = vpop.permute.xlu2 %2858 }
 0x261   : > { %v2824_v60 = vpop.permute.xlu1 %2823  ;;  %v2819_v63 = vpop.permute.xlu0 %2818  ;;  %v2861_v10 = vunpack.i.h.bf16 %v3822_v54  ;;  %v4686_v8 = vunpack.i.l.bf16 %v3822_v54 }
 0x262   : > { %v2826_v32 = vunpack.i.h.bf16 %v2824_v60  ;;  %v2825_v9 = vunpack.i.l.bf16 %v2824_v60  ;;  %v2821_v61 = vunpack.i.h.bf16 %v2819_v63  ;;  %v2820_v13 = vunpack.i.l.bf16 %v2819_v63 }
 0x263   : > { %v2197_v53 = vrot.slane %v2861_v10, 4 }
 0x264   : > { %v956_v5 = vrot.slane %v2826_v32, 4  ;;  %v944_v27 = vrot.slane %v2825_v9, 4  ;;  %v958_v35 = vrot.slane %v2821_v61, 4  ;;  %v946_v45 = vrot.slane %v2820_v13, 4 }
 0x266   : > { %v957_v33 = vsel %vm443_vm3, %v956_v5, %v2821_v61  ;;  %v945_v47 = vsel %vm443_vm3, %v944_v27, %v2820_v13  ;;  %v959_v57 = vsel %vm443_vm3, %v2826_v32, %v958_v35  ;;  %v947_v46 = vsel %vm443_vm3, %v2825_v9, %v946_v45 }
 0x267   : > { %v963_v28 = vperm.slane %v957_v33, %v3215_v40  ;;  %v951_v0 = vperm.slane %v945_v47, %v3215_v40  ;;  %v3852_v9 = vrot.slane %v4685_v41, 4  ;;  %v3855_v61 = vperm.slane %v959_v57, %v3215_v40 }
 0x268   : > { %v3828_v50 = vpop.permute.xlu2 %2873  ;;  %v3862_v13 = vrot.slane %v4684_v24, 4  ;;  %v1588_v47 = vrot.slane %v4686_v8, 4 }
 0x269   : > { %v3824_v52 = vpop.permute.xlu0 %2833  ;;  %v2849_v36 = vpop.permute.xlu1 %2848  ;;  %v2876_v48 = vunpack.i.h.bf16 %v3828_v50  ;;  %v992_v55 = vrot.slane %v963_v28, 4  ;;  %v994_v27 = vrot.slane %v951_v0, 4  ;;  %v2875_v33 = vunpack.i.l.bf16 %v3828_v50 }
 0x26a   : > { %v2836_v43 = vunpack.i.h.bf16 %v3824_v52  ;;  %v2835_v4 = vunpack.i.l.bf16 %v3824_v52  ;;  %v2851_v25 = vunpack.i.h.bf16 %v2849_v36  ;;  %v2850_v12 = vunpack.i.l.bf16 %v2849_v36 }
 0x26b   : > { %v2199_v3 = vrot.slane %v2876_v48, 4  ;;  %v2198_v60 = vsel %vm443_vm3, %v2197_v53, %v2876_v48  ;;  %v3858_v52 = vperm.slane %v947_v46, %v3215_v40  ;;  %v1004_v53 = vrot.slane %v3855_v61, 4 }
 0x26c   : > { %v980_v7 = vrot.slane %v2836_v43, 4  ;;  %v968_v15 = vrot.slane %v2835_v4, 4  ;;  %v1217_v63 = vsel %vm443_vm3, %v1216_v49, %v2851_v25  ;;  %v3867_v35 = vperm.slane %v2198_v60, %v3215_v40 }
 0x26d   : > { %v3870_v36 = vperm.slane %v1217_v63, %v3215_v40  ;;  %v2200_v48 = vsel %vm443_vm3, %v2861_v10, %v2199_v3 }
 0x26e   : > { %v981_v11 = vsel %vm443_vm3, %v980_v7, %v2831_v62  ;;  %v969_v5 = vsel %vm443_vm3, %v968_v15, %v2830_v21  ;;  %v1218_v62 = vrot.slane %v2851_v25, 4  ;;  %v1205_v21 = vsel %vm443_vm3, %v1204_v23, %v2850_v12 }
 0x26f   : > { %v987_v32 = vperm.slane %v981_v11, %v3215_v40  ;;  %v975_v45 = vperm.slane %v969_v5, %v3215_v40  ;;  %v993_v7 = vsel %vm443_vm3, %v992_v55, %v951_v0  ;;  %v1206_v25 = vrot.slane %v2850_v12, 4 }
 0x270   : > { %v1219_v11 = vsel %vm443_vm3, %v2856_v51, %v1218_v62  ;;  %v3881_v46 = vperm.slane %v1205_v21, %v3215_v40  ;;  %v1612_v0 = vrot.slane %v2875_v33, 4  ;;  %v983_v23 = vsel %vm443_vm3, %v2836_v43, %v982_v42  ;;  %v3888_v55 = vpop.permute.xlu2 %2888 }
 0x271   : > { %v3843_v18 = vpop.permute.xlu0 %2843  ;;  %v1016_v49 = vrot.slane %v987_v32, 4  ;;  %v3883_v15 = vpop.permute.xlu1 %2868  ;;  %v3891_v10 = vperm.slane %v993_v7, %v3228_v59  ;;  %v995_v12 = vsel %vm443_vm3, %v963_v28, %v994_v27  ;;  %v3895_v3 = vperm.slane %v2200_v48, %v3215_v40 }
 0x272   : > { %v1018_v63 = vrot.slane %v975_v45, 4  ;;  %v3900_v5 = vperm.slane %v1219_v11, %v3215_v40  ;;  %v1207_v43 = vsel %vm443_vm3, %v2855_v58, %v1206_v25  ;;  %v971_v42 = vsel %vm443_vm3, %v2835_v4, %v970_v31 }
 0x273   : > { %4705 = vst [vmem:[#allocation7_spill] sm:$0xff] %v3891_v10  ;;  %v1017_v62 = vsel %vm443_vm3, %v1016_v49, %v975_v45  ;;  %v1254_v28 = vrot.slane %v3881_v46, 4  ;;  %v991_v27 = vperm.slane %v983_v23, %v3215_v40  ;;  %v2891_v7 = vunpack.i.h.bf16 %v3888_v55 }
 0x274   : > { %4706 = vst [vmem:[#allocation8_spill] sm:$0xff] %v3895_v3  ;;  %v3911_v48 = vperm.slane %v1017_v62, %v3228_v59  ;;  %v2870_v11 = vunpack.i.l.bf16 %v3883_v15  ;;  %v2846_v51 = vunpack.i.h.bf16 %v3843_v18  ;;  %v1042_v58 = vrot.slane %v3891_v10, 4 }
 0x275   : > { %v1003_v4 = vperm.slane %v995_v12, %v3228_v59  ;;  %v979_v45 = vperm.slane %v971_v42, %v3215_v40  ;;  %v2845_v25 = vunpack.i.l.bf16 %v3843_v18  ;;  %v1019_v49 = vsel %vm443_vm3, %v987_v32, %v1018_v63 }
 0x276   : > { %4707 = vst [vmem:[#allocation9_spill] sm:$0xff] %v3911_v48  ;;  %v3922_v23 = vperm.slane %v1207_v43, %v3215_v40  ;;  %v1043_v62 = vsel %vm443_vm3, %v3911_v48, %v1042_v58  ;;  %v1027_v60 = vperm.slane %v1019_v49, %v3228_v59  ;;  %v1028_v12 = vrot.slane %v991_v27, 4 }
 0x277   : > { %v1046_v57 = vrot.slane %v1003_v4, 4  ;;  %v1614_v41 = vrot.slane %v2891_v7, 4  ;;  %v1613_v31 = vsel %vm443_vm3, %v1612_v0, %v2891_v7  ;;  %1057 = vrot.lane.b32.xlu1 %v1043_v62, %s3090_s9  ;;  %v1590_v18 = vrot.slane %v2870_v11, 4 }
 0x278   : > { %v1192_v42 = vrot.slane %v2846_v51, 4  ;;  %v1044_v63 = vrot.slane %v1027_v60, 4  ;;  %v3933_v43 = vsel %vm443_vm3, %v3870_v36, %v1254_v28  ;;  %v1030_v58 = vrot.slane %v979_v45, 4 }
 0x279   : > { %v3905_v21 = vpop.permute.xlu0 %2863  ;;  %v1047_v32 = vsel %vm443_vm3, %v1027_v60, %v1046_v57  ;;  %v1195_v49 = vsel %vm443_vm3, %v2846_v51, %v3852_v9  ;;  %v1180_v24 = vrot.slane %v2845_v25, 4  ;;  %v3938_v8 = vpop.permute.xlu1 %2883  ;;  %v2890_v0 = vunpack.i.l.bf16 %v3888_v55 }
 0x27a   : > { %1065 = vrot.lane.b32.xlu0 %v1047_v32, %s3085_s20  ;;  %v3942_v7 = vperm.slane %v1613_v31, %v3215_v40  ;;  %v4687_v57 = vunpack.i.h.bf16 %v3883_v15  ;;  %v1045_v60 = vsel %vm443_vm3, %v1044_v63, %v1003_v4  ;;  %v1615_v28 = vsel %vm443_vm3, %v2875_v33, %v1614_v41 }
 0x27b   : > { %v1589_v9 = vsel %vm443_vm3, %v1588_v47, %v2870_v11  ;;  %1061 = vrot.lane.b32.xlu2 %v1045_v60, %s3091_s10  ;;  %v1005_v51 = vsel %vm443_vm3, %v1004_v53, %v3858_v52  ;;  %v1029_v55 = vsel %vm443_vm3, %v1028_v12, %v979_v45  ;;  %v4708_v31 = vunpack.i.l.bf16 %v3822_v54 }
 0x27c   : > { %v4709_v32 = vunpack.i.h.bf16 %v3818_v56  ;;  %v3961_v50 = vperm.slane %v1195_v49, %v3215_v40  ;;  %v1035_v41 = vperm.slane %v1029_v55, %v3228_v59  ;;  %v4710_v47 = vunpack.i.l.bf16 %v3818_v56 }
 0x27d   : > { %v1591_v62 = vsel %vm443_vm3, %v4708_v31, %v1590_v18  ;;  %v1183_v54 = vsel %vm443_vm3, %v2845_v25, %v3862_v13  ;;  %v4711_v11 = vrot.slane %v3858_v52, 4  ;;  %v1031_v12 = vsel %vm443_vm3, %v991_v27, %v1030_v58  ;;  %v3976_v18 = vpop.permute.xlu2 %2903 }
 0x27e   : > { %v1193_v4 = vsel %vm443_vm3, %v1192_v42, %v4709_v32  ;;  %v1181_v53 = vsel %vm443_vm3, %v1180_v24, %v4710_v47  ;;  %v2865_v42 = vunpack.i.l.bf16 %v3905_v21  ;;  %v1011_v63 = vperm.slane %v1005_v51, %v3228_v59 }
 0x27f   : > { %v1007_v45 = vsel %vm443_vm3, %v3855_v61, %v4711_v11  ;;  %v1048_v49 = vrot.slane %v1035_v41, 4  ;;  %v1039_v56 = vperm.slane %v1031_v12, %v3228_v59  ;;  %v3982_v24 = vperm.slane %v1615_v28, %v3215_v40 }
 0x280   : > { %v3985_v13 = vperm.slane %v1589_v9, %v3215_v40  ;;  %v3988_v52 = vperm.slane %v1591_v62, %v3215_v40  ;;  %v3991_v61 = vperm.slane %v1193_v4, %v3215_v40  ;;  %v1240_v27 = vrot.slane %v3961_v50, 4 }
 0x281   : > { %v3964_v33 = vpop.permute.xlu0 %2878  ;;  %4712 = vst [vmem:[#allocation10_spill] sm:$0xff] %v3982_v24  ;;  %v1049_v25 = vsel %vm443_vm3, %v1048_v49, %v1011_v63  ;;  %v1015_v58 = vperm.slane %v1007_v45, %v3228_v59  ;;  %v1052_v60 = vrot.slane %v1039_v56, 4  ;;  %v1602_v28 = vrot.slane %v2890_v0, 4 }
 0x282   : > { %v3998_v55 = vperm.slane %v1181_v53, %v3215_v40  ;;  %v4001_v9 = vperm.slane %v1183_v54, %v3215_v40  ;;  %1069 = vrot.lane.b32.xlu1 %v1049_v25, %s3088_s23  ;;  %v1576_v62 = vrot.slane %v4687_v57, 4  ;;  %v1600_v32 = vrot.slane %v2865_v42, 4  ;;  %v2899_v54 = vpop.permute.xlu1 %2898 }
 0x283   : > { %v1053_v4 = vsel %vm443_vm3, %v1052_v60, %v1015_v58  ;;  %v1660_v47 = vrot.slane %v3982_v24, 4  ;;  %v1228_v45 = vrot.slane %v3991_v61, 4  ;;  %v4688_v25 = vunpack.i.l.bf16 %v3976_v18 }
 0x284   : > { %1077 = vrot.lane.b32.xlu0 %v1053_v4, %s3089_s8  ;;  %v1241_v12 = vsel %vm443_vm3, %v1240_v27, %v4001_v9  ;;  %v1050_v51 = vrot.slane %v1011_v63, 4  ;;  %v2885_v53 = vunpack.i.l.bf16 %v3938_v8  ;;  %v1601_v57 = vsel %vm443_vm3, %v1600_v32, %v2890_v0 }
 0x285   : > { %v1603_v4 = vsel %vm443_vm3, %v2865_v42, %v1602_v28  ;;  %v2900_v34 = vunpack.i.l.bf16 %v2899_v54  ;;  %v2901_v49 = vunpack.i.h.bf16 %v2899_v54  ;;  %v1054_v63 = vrot.slane %v1015_v58, 4  ;;  %v4040_v28 = vpop.permute.xlu2 %2918 }
 0x286   : > { %v1051_v27 = vsel %vm443_vm3, %v1035_v41, %v1050_v51  ;;  %v1229_v31 = vsel %vm443_vm3, %v1228_v45, %v3998_v55  ;;  %v4713_v60 = vrot.slane %v3870_v36, 4  ;;  %v4714_v0 = vunpack.i.h.bf16 %v3976_v18  ;;  %4715 = vst [vmem:[#allocation11_spill] sm:$0xff] %v4040_v28 }
 0x287   : > { %1073 = vrot.lane.b32.xlu2 %v1051_v27, %s3086_s21  ;;  %v1803_v41 = vrot.slane %v4688_v25, 4  ;;  %v4043_v58 = vperm.slane %v1229_v31, %v3228_v59  ;;  %v2185_v32 = vrot.slane %v2885_v53, 4  ;;  %v4046_v45 = vperm.slane %v1601_v57, %v3215_v40 }
 0x288   : > { %v1253_v11 = vsel %vm443_vm3, %v4713_v60, %v3881_v46  ;;  %v4035_v42 = vrot.slane %v4714_v0, 4  ;;  %v4049_v36 = vperm.slane %v1603_v4, %v3215_v40  ;;  %v1055_v46 = vsel %vm443_vm3, %v1039_v56, %v1054_v63 }
 0x289   : > { %v4024_v17 = vpop.permute.xlu0 %2893  ;;  %4716 = vst [vmem:[#allocation12_spill] sm:$0xff] %v4043_v58  ;;  %v1577_v54 = vsel %vm443_vm3, %v1576_v62, %v2900_v34  ;;  %v1578_v60 = vrot.slane %v2900_v34, 4  ;;  %v4055_v27 = vperm.slane %v1253_v11, %v3228_v59  ;;  %v1278_v31 = vrot.slane %v4043_v58, 4 }
 0x28a   : > { %4717 = vst [vmem:[#allocation13_spill] sm:$0xff] %v4049_v36  ;;  %1081 = vrot.lane.b32.xlu1 %v1055_v46, %s3087_s22  ;;  %v2187_v25 = vrot.slane %v2901_v49, 4  ;;  %v2880_v4 = vunpack.i.l.bf16 %v3964_v33  ;;  %v4719_v51 = vunpack.i.h.bf16 %v3938_v8  ;;  %v4720_v34 = vunpack.i.h.bf16 %v3905_v21  ;;  %v4075_v10 = vpop.permute.xlu1 %2913 }
 0x28b   : > { %4718 = vst [vmem:[#allocation14_spill] sm:$0xff] %v4055_v27  ;;  %v1279_v11 = vsel %vm443_vm3, %v4055_v27, %v1278_v31  ;;  %v4071_v46 = vperm.slane %v1577_v54, %v3215_v40  ;;  %v2186_v57 = vsel %vm443_vm3, %v2185_v32, %v2901_v49  ;;  %v4721_v54 = vunpack.i.h.bf16 %v3883_v15 }
 0x28c   : > { %v4063_v56 = vrot.slane %v4719_v51, 4  ;;  %v2209_v62 = vrot.slane %v4720_v34, 4  ;;  %v2937_v0 = vpack.i.bf16 %v3616_v39, %v1279_v11  ;;  %v4078_v51 = vperm.slane %v1241_v12, %v3228_v59 }
 0x28d   : > { %v4083_v34 = vsel %vm443_vm3, %v1660_v47, %v4049_v36  ;;  %v1579_v63 = vsel %vm443_vm3, %v4721_v54, %v1578_v60  ;;  %v4722_v49 = vunpack.i.h.bf16 %v4040_v28  ;;  %v4723_v32 = vunpack.i.l.bf16 %v4040_v28 }
 0x28e   : > { %v2188_v11 = vsel %vm443_vm3, %v2885_v53, %v2187_v25  ;;  %v1801_v48 = vrot.slane %v2880_v4, 4  ;;  %2938 = vrot.lane.b32.xlu0 %v2937_v0, %s3090_s9  ;;  %v4100_v47 = vperm.slane %v2186_v57, %v3215_v40  ;;  %v2916_v15 = vunpack.i.h.bf16 %v4075_v10 }
 0x28f   : > { %v4091_v39 = vrot.slane %v4722_v49, 4  ;;  %v4095_v12 = vrot.slane %v4723_v32, 4  ;;  %v4725_v60 = vrot.slane %v3900_v5, 4  ;;  %v1286_v49 = vrot.slane %v4078_v51, 4 }
 0x290   : > { %v4111_v32 = vperm.slane %v1579_v63, %v3215_v40  ;;  %v4726_v53 = vrot.slane %v3985_v13, 4  ;;  %v4727_v0 = vunpack.i.h.bf16 %v3964_v33  ;;  %v4126_v22 = vperm.slane %v2188_v11, %v3215_v40 }
 0x291   : > { %4724 = vst [vmem:[#allocation15_spill] sm:$0xff] %v4095_v12  ;;  %v1265_v54 = vsel %vm443_vm3, %v4725_v60, %v3922_v23  ;;  %v4108_v31 = vpop.permute.xlu0 %2908  ;;  %v1804_v63 = vsel %vm443_vm3, %v2880_v4, %v1803_v41  ;;  %v4728_v20 = vrot.slane %v3998_v55, 4  ;;  %v1263_v11 = vperm.slane %v3933_v43, %v3228_v59  ;;  %v4147_v4 = vpop.permute.xlu2 %2933 }
 0x292   : > { %v1625_v25 = vsel %vm443_vm3, %v4726_v53, %v4071_v46  ;;  %v4119_v57 = vrot.slane %v4727_v0, 4  ;;  %v4122_v58 = vperm.slane %v1265_v54, %v3228_v59  ;;  %v4729_v53 = vunpack.i.l.bf16 %v3976_v18 }
 0x293   : > { %v1231_v27 = vsel %vm443_vm3, %v3991_v61, %v4728_v20  ;;  %v4730_v41 = vrot.slane %v3867_v35, 4  ;;  %v1791_v20 = vrot.slane %v2916_v15, 4  ;;  %v2896_v61 = vunpack.i.h.bf16 %v4024_v17 }
 0x294   : > { %v1802_v0 = vsel %vm443_vm3, %v1801_v48, %v4729_v53  ;;  %v1287_v54 = vsel %vm443_vm3, %v4122_v58, %v1286_v49  ;;  %v1239_v28 = vperm.slane %v1231_v27, %v3228_v59  ;;  %v2895_v27 = vunpack.i.l.bf16 %v4024_v17 }
 0x295   : > { %v4145_v55 = vsel %vm443_vm3, %v4730_v41, %v4100_v47  ;;  %v2957_v48 = vpack.i.bf16 %v3627_v6, %v1287_v54  ;;  %v1280_v53 = vrot.slane %v1263_v11, 4  ;;  %v4155_v12 = vperm.slane %v1802_v0, %v3215_v40 }
 0x296   : > { %v1282_v60 = vrot.slane %v1239_v28, 4  ;;  %v4158_v41 = vperm.slane %v1804_v63, %v3215_v40  ;;  %v1790_v24 = vsel %vm443_vm3, %v4035_v42, %v2916_v15  ;;  %v4699_v6 = vunpack.i.l.bf16 %v4147_v4 }
 0x297   : > { %2958 = vrot.lane.b32.xlu2 %v2957_v48, %s3086_s21  ;;  %v1281_v54 = vsel %vm443_vm3, %v1280_v53, %v1239_v28  ;;  %v2910_v49 = vunpack.i.l.bf16 %v4108_v31  ;;  %v4731_v43 = vunpack.i.h.bf16 %v3976_v18  ;;  %v2223_v36 = vrot.slane %v2896_v61, 4 }
 0x298   : > { %v1283_v17 = vsel %vm443_vm3, %v1263_v11, %v1282_v60  ;;  %v2942_v63 = vpack.i.bf16 %v3641_v2, %v1281_v54  ;;  %v4174_v15 = vperm.slane %v1790_v24, %v3215_v40  ;;  %v2915_v28 = vunpack.i.l.bf16 %v4075_v10 }
 0x299   : > { %v1792_v0 = vsel %vm443_vm3, %v4731_v43, %v1791_v20  ;;  %v2947_v3 = vpack.i.bf16 %v3619_v29, %v1283_v17  ;;  %v2210_v60 = vsel %vm443_vm3, %v2209_v62, %v2895_v27  ;;  %v2222_v18 = vsel %vm443_vm3, %v4063_v56, %v2896_v61  ;;  %v4186_v2 = vpop.permute.xlu0 %2923  ;;  %v4192_v62 = vpop.permute.xlu1 %2928 }
 0x29a   : > { %v2211_v20 = vrot.slane %v2895_v27, 4  ;;  %2943 = vrot.lane.b32.xlu1 %v2942_v63, %s3091_s10  ;;  %v4184_v29 = vperm.slane %v1625_v25, %v3228_v59  ;;  %v1837_v24 = vrot.slane %v4155_v12, 4  ;;  %v4190_v10 = vperm.slane %v1792_v0, %v3215_v40 }
 0x29b   : > { %2948 = vrot.lane.b32.xlu0 %v2947_v3, %s3085_s20  ;;  %v1825_v56 = vrot.slane %v2910_v49, 4  ;;  %v4732_v61 = vrot.slane %v3942_v7, 4  ;;  %v4203_v48 = vrot.slane %v4699_v6, 4  ;;  %v4733_v27 = vunpack.i.h.bf16 %v3938_v8 }
 0x29c   : > { %v4209_v43 = vperm.slane %v2210_v60, %v3215_v40  ;;  %v1827_v17 = vrot.slane %v2915_v28, 4  ;;  %v1838_v0 = vsel %vm443_vm3, %v1837_v24, %v4174_v15  ;;  %v2228_v63 = vperm.slane %v2222_v18, %v3215_v40  ;;  %v871_v60 = vpop.permute.xlu2 %870 }
 0x29d   : > { %v1649_v3 = vsel %vm443_vm3, %v4732_v61, %v4046_v45  ;;  %v2224_v53 = vsel %vm443_vm3, %v4733_v27, %v2223_v36  ;;  %v4734_v61 = vunpack.i.h.bf16 %v3905_v21  ;;  %v2931_v6 = vunpack.i.h.bf16 %v4192_v62 }
 0x29e   : > { %v4220_v8 = vperm.slane %v1649_v3, %v3228_v59  ;;  %v1674_v36 = vrot.slane %v4184_v29, 4  ;;  %v4225_v25 = vperm.slane %v2224_v53, %v3215_v40  ;;  %v2911_v24 = vunpack.i.h.bf16 %v4108_v31 }
 0x29f   : > { %v2212_v42 = vsel %vm443_vm3, %v4734_v61, %v2211_v20  ;;  %v1826_v18 = vsel %vm443_vm3, %v1825_v56, %v2915_v28  ;;  %v2259_v21 = vrot.slane %v4209_v43, 4  ;;  %v1284_v3 = vrot.slane %v4122_v58, 4 }
 0x2a0   : > { %v1675_v20 = vsel %vm443_vm3, %v4220_v8, %v1674_v36  ;;  %v4735_v61 = vrot.slane %v4001_v9, 4  ;;  %v4238_v27 = vperm.slane %v2212_v42, %v3215_v40  ;;  %v4736_v28 = vrot.slane %v3922_v23, 4 }
 0x2a1   : > { %v2972_v53 = vpack.i.bf16 %v1675_v20, %v3709_v14  ;;  %v2423_v9 = vsel %vm443_vm3, %v4091_v39, %v2931_v6  ;;  %v4251_v58 = vperm.slane %v1826_v18, %v3215_v40  ;;  %v2257_v42 = vrot.slane %v2228_v63, 4 }
 0x2a2   : > { %v1243_v11 = vsel %vm443_vm3, %v3961_v50, %v4735_v61  ;;  %v1267_v56 = vsel %vm443_vm3, %v3900_v5, %v4736_v28  ;;  %v1285_v50 = vsel %vm443_vm3, %v1284_v3, %v4078_v51  ;;  %v2269_v36 = vrot.slane %v4225_v25, 4  ;;  %v875_v61 = vpop.permute.xlu0 %874 }
 0x2a3   : > { %v1251_v54 = vperm.slane %v1243_v11, %v3228_v59  ;;  %v1275_v14 = vperm.slane %v1267_v56, %v3228_v59  ;;  %v1815_v11 = vrot.slane %v2911_v24, 4  ;;  %2973 = vrot.lane.b32.xlu2 %v2972_v53, %s3090_s9  ;;  %v2952_v23 = vpack.i.bf16 %v3658_v44, %v1285_v50  ;;  %v879_v50 = vpop.permute.xlu1 %878 }
 0x2a4   : > { %v4260_v20 = vsel %vm443_vm3, %v2228_v63, %v2259_v21  ;;  %v1814_v39 = vsel %vm443_vm3, %v4119_v57, %v2911_v24  ;;  %v2271_v51 = vrot.slane %v4238_v27, 4  ;;  %v4266_v3 = vperm.slane %v2423_v9, %v3215_v40 }
 0x2a5   : > { %v1290_v5 = vrot.slane %v1251_v54, 4  ;;  %v1288_v18 = vrot.slane %v1275_v14, 4  ;;  %2953 = vrot.lane.b32.xlu1 %v2952_v23, %s3088_s23  ;;  %v4737_v44 = vrot.slane %v4071_v46, 4  ;;  %v2930_v63 = vunpack.i.l.bf16 %v4192_v62 }
 0x2a6   : > { %v1861_v21 = vrot.slane %v4251_v58, 4  ;;  %v4738_v28 = vunpack.i.h.bf16 %v3964_v33  ;;  %v1820_v9 = vperm.slane %v1814_v39, %v3215_v40  ;;  %v1828_v46 = vsel %vm443_vm3, %v2910_v49, %v1827_v17 }
 0x2a7   : > { %v1627_v53 = vsel %vm443_vm3, %v3985_v13, %v4737_v44  ;;  %v1289_v57 = vsel %vm443_vm3, %v1288_v18, %v1251_v54  ;;  %v1291_v24 = vsel %vm443_vm3, %v1275_v14, %v1290_v5  ;;  %v898_v23 = vsel %vm897_vm7, %v3647_v38, %v871_v60  ;;  %v883_v44 = vpop.permute.xlu2 %882 }
 0x2a8   : > { %v1816_v56 = vsel %vm443_vm3, %v4738_v28, %v1815_v11  ;;  %v2962_v13 = vpack.i.bf16 %v3695_v30, %v1289_v57  ;;  %v1635_v54 = vperm.slane %v1627_v53, %v3228_v59  ;;  %v4739_v14 = vrot.slane %v4046_v45, 4 }
 0x2a9   : > { %v2967_v31 = vpack.i.bf16 %v3691_v1, %v1291_v24  ;;  %v4296_v30 = vperm.slane %v1838_v0, %v3228_v59  ;;  %v900_v38 = vsel %vm899_vm8, %v898_v23, %v875_v61  ;;  %v1862_v17 = vsel %vm443_vm3, %v1861_v21, %v1820_v9 }
 0x2aa   : > { %v1651_v33 = vsel %vm443_vm3, %v3942_v7, %v4739_v14  ;;  %2963 = vrot.lane.b32.xlu0 %v2962_v13, %s3089_s8  ;;  %v4302_v45 = vperm.slane %v4145_v55, %v3228_v59  ;;  %v2258_v7 = vsel %vm443_vm3, %v2257_v42, %v4209_v43  ;;  %v4307_v1 = vperm.slane %v1862_v17, %v3228_v59  ;;  %v887_v13 = vpop.permute.xlu0 %886 }
 0x2ab   : > { %v1659_v49 = vperm.slane %v1651_v33, %v3228_v59  ;;  %v1887_v11 = vrot.slane %v4296_v30, 4  ;;  %v4311_v0 = vperm.slane %v2258_v7, %v3228_v59  ;;  %v1836_v5 = vperm.slane %v1828_v46, %v3215_v40 }
 0x2ac   : > { %v2283_v39 = vrot.slane %v4302_v45, 4  ;;  %v1678_v18 = vrot.slane %v1635_v54, 4  ;;  %v4740_v55 = vrot.slane %v3988_v52, 4  ;;  %v902_v42 = vsel %vm901_vm9, %v900_v38, %v879_v50 }
 0x2ad   : > { %v1676_v60 = vrot.slane %v1659_v49, 4  ;;  %2968 = vrot.lane.b32.xlu1 %v2967_v31, %s3087_s22  ;;  %v1888_v53 = vsel %vm443_vm3, %v4307_v1, %v1887_v11  ;;  %v1667_v21 = vperm.slane %v4083_v34, %v3228_v59  ;;  %v1824_v57 = vperm.slane %v1816_v56, %v3215_v40  ;;  %v891_v56 = vpop.permute.xlu1 %890 }
 0x2ae   : > { %v1637_v61 = vsel %vm443_vm3, %v4740_v55, %v4111_v32  ;;  %v1863_v24 = vrot.slane %v1820_v9, 4  ;;  %v2284_v28 = vsel %vm443_vm3, %v4311_v0, %v2283_v39  ;;  %v1679_v50 = vsel %vm443_vm3, %v1659_v49, %v1678_v18 }
 0x2af   : > { %v1677_v43 = vsel %vm443_vm3, %v1676_v60, %v1635_v54  ;;  %v1643_v46 = vperm.slane %v1637_v61, %v3228_v59  ;;  %v2987_v54 = vpack.i.bf16 %v1888_v53, %v2284_v28  ;;  %v904_v14 = vsel %vm903_vm10, %v902_v42, %v883_v44  ;;  %v895_v38 = vpop.permute.xlu2 %894 }
 0x2b0   : > { %v2977_v23 = vpack.i.bf16 %v1677_v43, %v3726_v26  ;;  %v1873_v34 = vrot.slane %v1836_v5, 4  ;;  %v1680_v9 = vrot.slane %v1667_v21, 4  ;;  %v906_v31 = vsel %vm905_vm11, %v904_v14, %v887_v13  ;;  %v4744_v14 = vld [vmem:[#allocation8_spill] sm:$0xff] }
 0x2b1   : > { %v1682_v33 = vrot.slane %v1643_v46, 4  ;;  %2988 = vrot.lane.b32.xlu2 %v2987_v54, %s3090_s9  ;;  %v1875_v26 = vrot.slane %v1824_v57, 4  ;;  %v2982_v49 = vpack.i.bf16 %v1679_v50, %v3712_v16  ;;  %v908_v17 = vsel %vm907_vm12, %v906_v31, %v891_v56 }
 0x2b2   : > { %2978 = vrot.lane.b32.xlu0 %v2977_v23, %s3091_s10  ;;  %v4741_v44 = vrot.slane %v4174_v15, 4  ;;  %v1681_v60 = vsel %vm443_vm3, %v1680_v9, %v1643_v46  ;;  %v910_v39 = vsel %vm909_vm13, %v908_v17, %v895_v38  ;;  %v1864_v18 = vsel %vm443_vm3, %v4251_v58, %v1863_v24  ;;  %v4747_v38 = vld [vmem:[#allocation13_spill] sm:$0xff]  ;;  %v4749_v17 = vld [vmem:[#allocation10_spill] sm:$0xff] }
 0x2b3   : > { %v1683_v11 = vsel %vm443_vm3, %v1667_v21, %v1682_v33  ;;  %v2926_v55 = vunpack.i.h.bf16 %v4186_v2  ;;  %1135 = vmatpush.msra.mxu1 %v910_v39  ;;  %v1872_v16 = vperm.slane %v1864_v18, %v3228_v59  ;;  %v4742_v61 = vrot.slane %v4100_v47, 4 }
 0x2b4   : > { %v1840_v7 = vsel %vm443_vm3, %v4155_v12, %v4741_v44  ;;  %v2268_v12 = vperm.slane %v4260_v20, %v3228_v59  ;;  %v2434_v43 = vrot.slane %v2930_v63, 4  ;;  %v1874_v42 = vsel %vm443_vm3, %v1873_v34, %v1824_v57 }
 0x2b5   : > { %v2236_v15 = vsel %vm443_vm3, %v3867_v35, %v4742_v61  ;;  %2983 = vrot.lane.b32.xlu1 %v2982_v49, %s3085_s20  ;;  %v1848_v58 = vperm.slane %v1840_v7, %v3228_v59  ;;  %v2270_v47 = vsel %vm443_vm3, %v2269_v36, %v4238_v27  ;;  %v2992_v53 = vpack.i.bf16 %v1681_v60, %v3772_v37 }
 0x2b6   : > { %v3002_v35 = vpack.i.bf16 %v1683_v11, %v3763_v19  ;;  %v1889_v21 = vrot.slane %v1872_v16, 4  ;;  %v2285_v20 = vrot.slane %v2268_v12, 4  ;;  %v2244_v24 = vperm.slane %v2236_v15, %v3228_v59 }
 0x2b7   : > { %v4743_v28 = vrot.slane %v4158_v41, 4  ;;  %v4372_v57 = vperm.slane %v1874_v42, %v3228_v59  ;;  %v4375_v13 = vperm.slane %v2270_v47, %v3228_v59  ;;  %v1876_v36 = vsel %vm443_vm3, %v1836_v5, %v1875_v26  ;;  %v4751_v42 = vld [vmem:[#allocation15_spill] sm:$0xff] }
 0x2b8   : > { %v2398_v19 = vrot.slane %v2926_v55, 4  ;;  %v2925_v37 = vunpack.i.l.bf16 %v4186_v2  ;;  %v1890_v23 = vsel %vm443_vm3, %v1889_v21, %v1848_v58  ;;  %v1891_v54 = vrot.slane %v1848_v58, 4 }
 0x2b9   : > { %v1850_v46 = vsel %vm443_vm3, %v4743_v28, %v4190_v10  ;;  %3003 = vrot.lane.b32.xlu2 %v3002_v35, %s3086_s21  ;;  %v1893_v50 = vrot.slane %v4372_v57, 4  ;;  %v4745_v33 = vrot.slane %v4744_v14, 4  ;;  %v4746_v5 = vrot.slane %v4111_v32, 4 }
 0x2ba   : > { %2993 = vrot.lane.b32.xlu0 %v2992_v53, %s3088_s23  ;;  %v2286_v9 = vsel %vm443_vm3, %v2285_v20, %v2244_v24  ;;  %v4395_v31 = vperm.slane %v1850_v46, %v3228_v59  ;;  %v2289_v26 = vrot.slane %v4375_v13, 4  ;;  %v4748_v49 = vrot.slane %v4747_v38, 4 }
 0x2bb   : > { %v2246_v34 = vsel %vm443_vm3, %v4745_v33, %v4126_v22  ;;  %v1639_v56 = vsel %vm443_vm3, %v3988_v52, %v4746_v5  ;;  %v2997_v7 = vpack.i.bf16 %v1890_v23, %v2286_v9  ;;  %v1892_v60 = vsel %vm443_vm3, %v1872_v16, %v1891_v54 }
 0x2bc   : > { %v1663_v44 = vsel %vm443_vm3, %v4749_v17, %v4748_v49  ;;  %v2287_v11 = vrot.slane %v2244_v24, 4  ;;  %v1894_v52 = vsel %vm443_vm3, %v1893_v50, %v4395_v31  ;;  %v4407_v39 = vperm.slane %v2246_v34, %v3228_v59 }
 0x2bd   : > { %v1671_v32 = vperm.slane %v1663_v44, %v3228_v59  ;;  %v1647_v18 = vperm.slane %v1639_v56, %v3228_v59  ;;  %v4411_v61 = vperm.slane %v1876_v36, %v3228_v59  ;;  %v4750_v15 = vunpack.i.h.bf16 %v4147_v4  ;;  %2998 = vrot.lane.b32.xlu1 %v2997_v7, %s3091_s10  ;;  %v4759_v44 = vld [vmem:[#allocation4_spill] sm:$0xff] }
 0x2be   : > { %v2411_v16 = vsel %vm443_vm3, %v4751_v42, %v2925_v37  ;;  %v2412_v47 = vrot.slane %v2925_v37, 4  ;;  %v2272_v53 = vsel %vm443_vm3, %v4225_v25, %v2271_v51  ;;  %v2288_v35 = vsel %vm443_vm3, %v2268_v12, %v2287_v11 }
 0x2bf   : > { %v2399_v58 = vsel %vm443_vm3, %v2398_v19, %v4750_v15  ;;  %v2290_v21 = vsel %vm443_vm3, %v2289_v26, %v4407_v39  ;;  %v1684_v20 = vrot.slane %v1671_v32, 4  ;;  %v4427_v24 = vperm.slane %v2272_v53, %v3228_v59  ;;  %v4757_v26 = vld [vmem:[#allocation14_spill] sm:$0xff] }
 0x2c0   : > { %v4752_v28 = vunpack.i.l.bf16 %v4147_v4  ;;  %v3007_v36 = vpack.i.bf16 %v1892_v60, %v2288_v35  ;;  %v3017_v19 = vpack.i.bf16 %v1894_v52, %v2290_v21  ;;  %v4753_v27 = vrot.slane %v4190_v10, 4 }
 0x2c1   : > { %v2417_v51 = vperm.slane %v2411_v16, %v3215_v40  ;;  %v1685_v12 = vsel %vm443_vm3, %v1684_v20, %v1647_v18  ;;  %v1686_v37 = vrot.slane %v1647_v18, 4  ;;  %v1897_v23 = vrot.slane %v4411_v61, 4 }
 0x2c2   : > { %v2435_v46 = vsel %vm443_vm3, %v2434_v43, %v4752_v28  ;;  %v1852_v25 = vsel %vm443_vm3, %v4158_v41, %v4753_v27  ;;  %v2424_v54 = vrot.slane %v2931_v6, 4  ;;  %v2405_v50 = vperm.slane %v2399_v58, %v3215_v40  ;;  %v4754_v43 = vld [vmem:[#allocation11_spill] sm:$0xff]  ;;  %3008 = vrot.lane.b32.xlu0 %v3007_v36, %s3085_s20  ;;  %3018 = vrot.lane.b32.xlu2 %v3017_v19, %s3088_s23  ;;  %v4762_v19 = vld [vmem:[#allocation12_spill] sm:$0xff] }
 0x2c3   : > { %v4755_v33 = vunpack.i.l.bf16 %v4754_v43  ;;  %v4756_v41 = vrot.slane %v4126_v22, 4  ;;  %v2437_v6 = vsel %vm443_vm3, %v2930_v63, %v4203_v48  ;;  %v2441_v5 = vperm.slane %v2435_v46, %v3215_v40 }
 0x2c4   : > { %v1860_v56 = vperm.slane %v1852_v25, %v3228_v59  ;;  %v2293_v9 = vrot.slane %v4427_v24, 4  ;;  %v1276_v38 = vrot.slane %v4757_v26, 4  ;;  %v4758_v49 = vmov %v4750_v15 }
 0x2c5   : > { %v2413_v34 = vsel %vm443_vm3, %v4755_v33, %v2412_v47  ;;  %v2248_v10 = vsel %vm443_vm3, %v4744_v14, %v4756_v41  ;;  %v2400_v17 = vrot.slane %v4758_v49, 4  ;;  %v2472_v22 = vrot.slane %v4266_v3, 4  ;;  %v4761_v47 = vld [vmem:[#allocation3_spill] sm:$0xff] }
 0x2c6   : > { %v3012_v14 = vpack.i.bf16 %v1685_v12, %v4759_v44  ;;  %v4464_v7 = vperm.slane %v2413_v34, %v3215_v40  ;;  %v1687_v62 = vsel %vm443_vm3, %v1671_v32, %v1686_v37  ;;  %v1898_v48 = vsel %vm443_vm3, %v1897_v23, %v1860_v56 }
 0x2c7   : > { %v2256_v63 = vperm.slane %v2248_v10, %v3228_v59  ;;  %v4760_v60 = vunpack.i.h.bf16 %v4754_v43  ;;  %v2445_v4 = vperm.slane %v2437_v6, %v3215_v40  ;;  %v2448_v52 = vrot.slane %v2405_v50, 4 }
 0x2c8   : > { %v2446_v18 = vrot.slane %v2417_v51, 4  ;;  %3013 = vrot.lane.b32.xlu1 %v3012_v14, %s3089_s8  ;;  %v2470_v15 = vrot.slane %v2441_v5, 4  ;;  %v2281_v58 = vrot.slane %v4311_v0, 4  ;;  %v1895_v32 = vrot.slane %v4395_v31, 4 }
 0x2c9   : > { %v2425_v11 = vsel %vm443_vm3, %v4760_v60, %v2424_v54  ;;  %v2294_v42 = vsel %vm443_vm3, %v2293_v9, %v2256_v63  ;;  %v1672_v16 = vrot.slane %v4220_v8, 4  ;;  %v3022_v53 = vpack.i.bf16 %v1687_v62, %v4761_v47 }
 0x2ca   : > { %v3032_v35 = vpack.i.bf16 %v1898_v48, %v2294_v42  ;;  %v2473_v21 = vsel %vm443_vm3, %v2441_v5, %v2472_v22  ;;  %v2401_v20 = vsel %vm443_vm3, %v2926_v55, %v2400_v17  ;;  %v2458_v28 = vrot.slane %v4464_v7, 4 }
 0x2cb   : > { %v1896_v0 = vsel %vm443_vm3, %v4372_v57, %v1895_v32  ;;  %v2291_v46 = vrot.slane %v4407_v39, 4  ;;  %3023 = vrot.lane.b32.xlu0 %v3022_v53, %s3087_s22  ;;  %v1899_v8 = vrot.slane %v1860_v56, 4  ;;  %v2449_v31 = vsel %vm443_vm3, %v2417_v51, %v2448_v52  ;;  %v4764_v32 = vld [vmem:[#allocation7_spill] sm:$0xff] }
 0x2cc   : > { %3033 = vrot.lane.b32.xlu2 %v3032_v35, %s3089_s8  ;;  %v2447_v36 = vsel %vm443_vm3, %v2446_v18, %v2405_v50  ;;  %v4493_v2 = vsel %vm443_vm3, %v1672_v16, %v4184_v29  ;;  %v2481_v57 = vperm.slane %v2473_v21, %v3228_v59  ;;  %v4500_v39 = vsel %vm443_vm3, %v1276_v38, %v4762_v19 }
 0x2cd   : > { %v2292_v55 = vsel %vm443_vm3, %v4375_v13, %v2291_v46  ;;  %v4504_v27 = vsel %vm443_vm3, %v2281_v58, %v4302_v45  ;;  %v2409_v25 = vperm.slane %v2401_v20, %v3215_v40  ;;  %v1885_v51 = vrot.slane %v4307_v1, 4 }
 0x2ce   : > { %v3027_v12 = vpack.i.bf16 %v1896_v0, %v2292_v55  ;;  %v2471_v29 = vsel %vm443_vm3, %v2470_v15, %v4266_v3  ;;  %v1900_v13 = vsel %vm443_vm3, %v4411_v61, %v1899_v8  ;;  %v2295_v37 = vrot.slane %v2256_v63, 4  ;;  %v4763_v15 = vld [vmem:[#allocation9_spill] sm:$0xff] }
 0x2cf   : > { %v2457_v23 = vperm.slane %v2449_v31, %v3228_v59  ;;  %v2453_v54 = vperm.slane %v2447_v36, %v3228_v59  ;;  %v2459_v45 = vsel %vm443_vm3, %v2458_v28, %v2409_v25  ;;  %v2498_v1 = vrot.slane %v2481_v57, 4 }
 0x2d0   : > { %3028 = vrot.lane.b32.xlu1 %v3027_v12, %s3086_s21  ;;  %v2296_v50 = vsel %vm443_vm3, %v4427_v24, %v2295_v37  ;;  %v2477_v43 = vperm.slane %v2471_v29, %v3228_v59  ;;  %v2433_v3 = vperm.slane %v2425_v11, %v3215_v40  ;;  %v2482_v33 = vrot.slane %v2445_v4, 4  ;;  %v4765_v37 = vld [vmem:[#allocation6_spill] sm:$0xff] }
 0x2d1   : > { %v3037_v34 = vpack.i.bf16 %v1900_v13, %v2296_v50  ;;  %v2499_v61 = vsel %vm443_vm3, %v2498_v1, %v2457_v23  ;;  %v2496_v41 = vrot.slane %v2453_v54, 4  ;;  %v2465_v10 = vperm.slane %v2459_v45, %v3228_v59 }
 0x2d2   : > { %v4524_v6 = vsel %vm443_vm3, %v1885_v51, %v4296_v30  ;;  %v2494_v24 = vrot.slane %v2477_v43, 4  ;;  %v2484_v5 = vrot.slane %v2433_v3, 4  ;;  %v2483_v56 = vsel %vm443_vm3, %v2482_v33, %v2433_v3 }
 0x2d3   : > { %3038 = vrot.lane.b32.xlu0 %v3037_v34, %s3087_s22  ;;  %v2497_v40 = vsel %vm443_vm3, %v2477_v43, %v2496_v41  ;;  %v2500_v9 = vrot.slane %v2457_v23, 4  ;;  %v2504_v26 = vrot.slane %v2465_v10, 4  ;;  %v2460_v49 = vrot.slane %v2409_v25, 4 }
 0x2d4   : > { %2515 = vrot.lane.b32.xlu2 %v2499_v61, %s3091_s10  ;;  %v4531_v38 = vsel %vm443_vm3, %v2494_v24, %v2453_v54  ;;  %v2489_v30 = vperm.slane %v2483_v56, %v3228_v59  ;;  %v2485_v17 = vsel %vm443_vm3, %v2445_v4, %v2484_v5  ;;  %v1040_v58 = vrot.slane %v4763_v15, 4 }
 0x2d5   : > { %v2501_v22 = vsel %vm443_vm3, %v2481_v57, %v2500_v9  ;;  %v2461_v14 = vsel %vm443_vm3, %v4464_v7, %v2460_v49  ;;  %v2493_v48 = vperm.slane %v2485_v17, %v3228_v59  ;;  %v1062_v42 = vpop.permute.xlu2 %1061 }
 0x2d6   : > { %v2505_v44 = vsel %vm443_vm3, %v2489_v30, %v2504_v26  ;;  %v2502_v62 = vrot.slane %v2489_v30, 4  ;;  %v2469_v60 = vperm.slane %v2461_v14, %v3228_v59  ;;  %v1041_v16 = vsel %vm443_vm3, %v1040_v58, %v4764_v32 }
 0x2d7   : > { %v2506_v11 = vrot.slane %v2493_v48, 4 }
 0x2d8   : > { %2511 = vrot.lane.b32.xlu1 %v2497_v40, %s3090_s9  ;;  %v2503_v63 = vsel %vm443_vm3, %v2502_v62, %v2465_v10  ;;  %v2508_v52 = vrot.slane %v2469_v60, 4 }
 0x2d9   : > { %v2507_v4 = vsel %vm443_vm3, %v2506_v11, %v2469_v60 }
 0x2da   : > { %v2509_v18 = vsel %vm443_vm3, %v2493_v48, %v2508_v52 }
 0x2db   : > { %2519 = vrot.lane.b32.xlu0 %v2501_v22, %s3085_s20  ;;  %s2688_s20 = sshll.u32 %s319_s19, 3 }
 0x2dc   : > { %2527 = vrot.lane.b32.xlu2 %v2505_v44, %s3086_s21  ;;  %s329_s10 = scalar_lea.vmem %s4683_s7, %s2688_s20 }
 0x2e0   : > { %2523 = vrot.lane.b32.xlu1 %v2503_v63, %s3088_s23  ;;  %s321_s23 = scalar_lea.vmem %s4682_s6, %s2688_s20 }
 0x2e1   : > { %v1074_v28 = vpop.permute.xlu2 %1073 }
 0x2e3   : > { %2531 = vrot.lane.b32.xlu0 %v2507_v4, %s3089_s8 }
 0x2e8   : > { %2535 = vrot.lane.b32.xlu1 %v2509_v18, %s3087_s22 }
 0x2e9   : > { %v1058_v7 = vpop.permute.xlu1 %1057 }
 0x2ea   : > { %v1084_v59 = vsel %vm897_vm7, %v1041_v16, %v1058_v7  ;;  %v2695_v7 = vld [vmem:[%s4681_s5 + $0x10] sm:$0xff] }
 0x2eb   : > { %v1085_v53 = vsel %vm899_vm8, %v1084_v59, %v1062_v42 }
 0x2ec   : > { %v1066_v47 = vpop.permute.xlu0 %1065 }
 0x2ed   : > { %v1086_v21 = vsel %vm901_vm9, %v1085_v53, %v1066_v47 }
 0x2f1   : > { %v2959_v19 = vpop.permute.xlu2 %2958 }
 0x2f2   : > { %v2960_v40 = vunpack.i.l.bf16 %v2959_v19 }
 0x2f4   : > { %v1070_v35 = vpop.permute.xlu1 %1069 }
 0x2f5   : > { %v1087_v20 = vsel %vm903_vm10, %v1086_v21, %v1070_v35  ;;  %v4766_v35 = vld [vmem:[#allocation5_spill] sm:$0xff] }
 0x2f6   : > { %v1088_v0 = vsel %vm905_vm11, %v1087_v20, %v1074_v28  ;;  %v1078_v46 = vpop.permute.xlu0 %1077 }
 0x2f7   : > { %v1089_v8 = vsel %vm907_vm12, %v1088_v0, %v1078_v46 }
 0x2fc   : > { %v1082_v31 = vpop.permute.xlu1 %1081 }
 0x2fd   : > { %v1090_v36 = vsel %vm909_vm13, %v1089_v8, %v1082_v31  ;;  %v2974_v33 = vpop.permute.xlu2 %2973 }
 0x2fe   : > { %1112 = vmatpush.msra.mxu0 %v1090_v36  ;;  %v2976_v15 = vunpack.i.h.bf16 %v2974_v33  ;;  %v2975_v58 = vunpack.i.l.bf16 %v2974_v33 }
 0x300   : > { %v2939_v55 = vpop.permute.xlu0 %2938  ;;  %v1716_v53 = vsel %vm897_vm7, %v4493_v2, %v2976_v15  ;;  %v2112_v21 = vsel %vm897_vm7, %v4766_v35, %v2975_v58  ;;  %v2706_v2 = vld [vmem:[%s4681_s5 + $0x18] sm:$0xff] }
 0x301   : > { %v2941_v51 = vunpack.i.h.bf16 %v2939_v55  ;;  %v2940_v12 = vunpack.i.l.bf16 %v2939_v55 }
 0x303   : > { %v1503_v23 = vsel %vm897_vm7, %v4765_v37, %v2941_v51  ;;  %v1320_v54 = vsel %vm897_vm7, %v4500_v39, %v2940_v12  ;;  %v2961_v39 = vunpack.i.h.bf16 %v2959_v19  ;;  %v911_v19 = vld [vmem:[%s4681_s5] sm:$0xff] }
 0x304   : > { %2694 = vmatmul.msk.f32.vlgmr.msra.gmra.mxu1 %vm1093_vm14, %v911_v19 }
 0x30b   : > { %v2989_v22 = vpop.permute.xlu2 %2988 }
 0x30c   : > { %v2944_v57 = vpop.permute.xlu1 %2943  ;;  %v2990_v51 = vunpack.i.l.bf16 %v2989_v22 }
 0x30d   : > { %v2949_v25 = vpop.permute.xlu0 %2948  ;;  %v2946_v29 = vunpack.i.h.bf16 %v2944_v57  ;;  %v2945_v13 = vunpack.i.l.bf16 %v2944_v57  ;;  %v2692_v57 = vld [vmem:[%s4681_s5 + $0x8] sm:$0xff] }
 0x30e   : > { %v2951_v45 = vunpack.i.h.bf16 %v2949_v25  ;;  %v2950_v50 = vunpack.i.l.bf16 %v2949_v25  ;;  %v2991_v25 = vunpack.i.h.bf16 %v2989_v22  ;;  %2693 = vmatmul.msk.f32.vlgmr.msra.gmra.mxu0 %vm1093_vm14, %v2692_v57 }
 0x30f   : > { %v1321_v1 = vsel %vm899_vm8, %v1320_v54, %v2945_v13  ;;  %v1504_v43 = vsel %vm899_vm8, %v1503_v23, %v2946_v29 }
 0x310   : > { %v1322_v41 = vsel %vm901_vm9, %v1321_v1, %v2950_v50  ;;  %v1505_v10 = vsel %vm901_vm9, %v1504_v43, %v2951_v45  ;;  %v1929_v43 = vsel %vm897_vm7, %v4524_v6, %v2991_v25 }
 0x313   : > { %v3004_v52 = vpop.permute.xlu2 %3003 }
 0x314   : > { %v3006_v54 = vunpack.i.h.bf16 %v3004_v52  ;;  %v3005_v45 = vunpack.i.l.bf16 %v3004_v52 }
 0x317   : > { %v2954_v3 = vpop.permute.xlu1 %2953 }
 0x318   : > { %v2956_v34 = vunpack.i.h.bf16 %v2954_v3  ;;  %v2955_v61 = vunpack.i.l.bf16 %v2954_v3  ;;  %v2325_v3 = vsel %vm897_vm7, %v4504_v27, %v2990_v51  ;;  %v2737_v27 = vld [vmem:[%s4681_s5 + $0x30] sm:$0xff] }
 0x31a   : > { %v1323_v24 = vsel %vm903_vm10, %v1322_v41, %v2955_v61  ;;  %v1506_v5 = vsel %vm903_vm10, %v1505_v10, %v2956_v34 }
 0x31b   : > { %v1324_v9 = vsel %vm905_vm11, %v1323_v24, %v2960_v40  ;;  %v1507_v26 = vsel %vm905_vm11, %v1506_v5, %v2961_v39 }
 0x31c   : > { %v2964_v56 = vpop.permute.xlu0 %2963  ;;  %v3019_v31 = vpop.permute.xlu2 %3018 }
 0x31d   : > { %v2966_v49 = vunpack.i.h.bf16 %v2964_v56  ;;  %v2965_v30 = vunpack.i.l.bf16 %v2964_v56 }
 0x31f   : > { %v2969_v17 = vpop.permute.xlu1 %2968  ;;  %v1325_v62 = vsel %vm907_vm12, %v1324_v9, %v2965_v30  ;;  %v1508_v48 = vsel %vm907_vm12, %v1507_v26, %v2966_v49  ;;  %v2716_v9 = vld [vmem:[%s4681_s5 + $0x20] sm:$0xff] }
 0x320   : > { %v2971_v44 = vunpack.i.h.bf16 %v2969_v17  ;;  %v2970_v14 = vunpack.i.l.bf16 %v2969_v17 }
 0x322   : > { %v1326_v63 = vsel %vm909_vm13, %v1325_v62, %v2970_v14  ;;  %v1509_v60 = vsel %vm909_vm13, %v1508_v48, %v2971_v44  ;;  %v3021_v44 = vunpack.i.h.bf16 %v3019_v31  ;;  %v3020_v14 = vunpack.i.l.bf16 %v3019_v31 }
 0x323   : > { %1347 = vmatpush.msra.mxu2 %v1326_v63  ;;  %1530 = vmatpush.msra.mxu3 %v1509_v60 }
 0x324   : > { %v2979_v11 = vpop.permute.xlu0 %2978  ;;  %2696 = vmatmul.msk.f32.vlgmr.msra.gmra.mxu2 %vm1093_vm14, %v2695_v7  ;;  %2707 = vmatmul.msk.f32.vlgmr.msra.gmra.mxu3 %vm1093_vm14, %v2706_v2 }
 0x325   : > { %v2981_v42 = vunpack.i.h.bf16 %v2979_v11  ;;  %v2980_v32 = vunpack.i.l.bf16 %v2979_v11 }
 0x326   : > { %v3034_v26 = vpop.permute.xlu2 %3033 }
 0x327   : > { %v2984_v4 = vpop.permute.xlu1 %2983  ;;  %v1717_v20 = vsel %vm899_vm8, %v1716_v53, %v2981_v42  ;;  %v2113_v28 = vsel %vm899_vm8, %v2112_v21, %v2980_v32  ;;  %v3036_v60 = vunpack.i.h.bf16 %v3034_v26  ;;  %v3035_v11 = vunpack.i.l.bf16 %v3034_v26 }
 0x328   : > { %v2986_v59 = vunpack.i.h.bf16 %v2984_v4  ;;  %v2985_v47 = vunpack.i.l.bf16 %v2984_v4 }
 0x32a   : > { %v1718_v36 = vsel %vm901_vm9, %v1717_v20, %v2986_v59  ;;  %v2114_v55 = vsel %vm901_vm9, %v2113_v28, %v2985_v47  ;;  %v2747_v59 = vld [vmem:[%s4681_s5 + $0x38] sm:$0xff]  ;;  %v2726_v47 = vld [vmem:[%s4681_s5 + $0x28] sm:$0xff] }
 0x32c   : > { %v2994_v18 = vpop.permute.xlu0 %2993 }
 0x32d   : > { %v2996_v0 = vunpack.i.h.bf16 %v2994_v18  ;;  %v2995_v46 = vunpack.i.l.bf16 %v2994_v18 }
 0x32e   : > { %v2516_v20 = vpop.permute.xlu2 %2515 }
 0x32f   : > { %v2999_v16 = vpop.permute.xlu1 %2998  ;;  %v1719_v12 = vsel %vm903_vm10, %v1718_v36, %v2996_v0  ;;  %v2115_v29 = vsel %vm903_vm10, %v2114_v55, %v2995_v46 }
 0x330   : > { %v3001_v13 = vunpack.i.h.bf16 %v2999_v16  ;;  %v3000_v37 = vunpack.i.l.bf16 %v2999_v16  ;;  %v1720_v61 = vsel %vm905_vm11, %v1719_v12, %v3006_v54  ;;  %v2116_v41 = vsel %vm905_vm11, %v2115_v29, %v3005_v45 }
 0x332   : > { %v1930_v10 = vsel %vm899_vm8, %v1929_v43, %v3001_v13  ;;  %v2326_v24 = vsel %vm899_vm8, %v2325_v3, %v3000_v37 }
 0x334   : > { %v3009_v8 = vpop.permute.xlu0 %3008 }
 0x335   : > { %v3011_v33 = vunpack.i.h.bf16 %v3009_v8  ;;  %v3010_v34 = vunpack.i.l.bf16 %v3009_v8 }
 0x336   : > { %v2528_v55 = vpop.permute.xlu2 %2527 }
 0x337   : > { %v1931_v49 = vsel %vm901_vm9, %v1930_v10, %v3011_v33  ;;  %v2327_v30 = vsel %vm901_vm9, %v2326_v24, %v3010_v34  ;;  %v2571_v24 = vld [vmem:[%s321_s23] sm:$0xff] }
 0x338   : > { %v1932_v4 = vsel %vm903_vm10, %v1931_v49, %v3021_v44  ;;  %v2328_v52 = vsel %vm903_vm10, %v2327_v30, %v3020_v14 }
 0x33a   : > { %v3014_v23 = vpop.permute.xlu1 %3013 }
 0x33b   : > { %v3016_v50 = vunpack.i.h.bf16 %v3014_v23  ;;  %v3015_v1 = vunpack.i.l.bf16 %v3014_v23 }
 0x33d   : > { %v3024_v5 = vpop.permute.xlu0 %3023  ;;  %v1721_v56 = vsel %vm907_vm12, %v1720_v61, %v3016_v50  ;;  %v2117_v39 = vsel %vm907_vm12, %v2116_v41, %v3015_v1 }
 0x33e   : > { %v3026_v40 = vunpack.i.h.bf16 %v3024_v5  ;;  %v3025_v6 = vunpack.i.l.bf16 %v3024_v5 }
 0x340   : > { %v1722_v17 = vsel %vm909_vm13, %v1721_v56, %v3026_v40  ;;  %v2118_v22 = vsel %vm909_vm13, %v2117_v39, %v3025_v6 }
 0x341   : > { %1743 = vmatpush.msrb.mxu0 %v1722_v17  ;;  %2139 = vmatpush.msrb.mxu2 %v2118_v22 }
 0x342   : > { %v3029_v62 = vpop.permute.xlu1 %3028  ;;  %2738 = vmatmul.msk.f32.vlgmr.msrb.gmra.mxu2 %vm1093_vm14, %v2737_v27  ;;  %2717 = vmatmul.msk.f32.vlgmr.msrb.gmra.mxu0 %vm1093_vm14, %v2716_v9 }
 0x343   : > { %v3031_v48 = vunpack.i.h.bf16 %v3029_v62  ;;  %v3030_v63 = vunpack.i.l.bf16 %v3029_v62 }
 0x345   : > { %v1933_v18 = vsel %vm905_vm11, %v1932_v4, %v3031_v48  ;;  %v2329_v7 = vsel %vm905_vm11, %v2328_v52, %v3030_v63  ;;  %v3039_v15 = vpop.permute.xlu0 %3038 }
 0x346   : > { %v1934_v58 = vsel %vm907_vm12, %v1933_v18, %v3036_v60  ;;  %v2330_v42 = vsel %vm907_vm12, %v2329_v7, %v3035_v11  ;;  %v3041_v32 = vunpack.i.h.bf16 %v3039_v15  ;;  %v3040_v16 = vunpack.i.l.bf16 %v3039_v15 }
 0x348   : > { %v1935_v53 = vsel %vm909_vm13, %v1934_v58, %v3041_v32  ;;  %v2331_v35 = vsel %vm909_vm13, %v2330_v42, %v3040_v16 }
 0x349   : > { %1956 = vmatpush.msrb.mxu1 %v1935_v53  ;;  %2352 = vmatpush.msrb.mxu3 %v2331_v35 }
 0x34a   : > { %v2512_v21 = vpop.permute.xlu1 %2511  ;;  %2748 = vmatmul.msk.f32.vlgmr.msrb.gmra.mxu3 %vm1093_vm14, %v2747_v59  ;;  %2727 = vmatmul.msk.f32.vlgmr.msrb.gmra.mxu1 %vm1093_vm14, %v2726_v47 }
 0x34b   : > { %v2538_v28 = vsel %vm897_vm7, %v4531_v38, %v2512_v21  ;;  %v2757_v38 = vld [vmem:[%s4681_s5 + $0x40] sm:$0xff] }
 0x34c   : > { %v2539_v46 = vsel %vm899_vm8, %v2538_v28, %v2516_v20 }
 0x34d   : > { %v2520_v0 = vpop.permute.xlu0 %2519 }
 0x34e   : > { %v2540_v31 = vsel %vm901_vm9, %v2539_v46, %v2520_v0 }
 0x352   : > { %v2524_v8 = vpop.permute.xlu1 %2523 }
 0x353   : > { %v2541_v36 = vsel %vm903_vm10, %v2540_v31, %v2524_v8 }
 0x354   : > { %v2542_v57 = vsel %vm905_vm11, %v2541_v36, %v2528_v55 }
 0x355   : > { %v2532_v2 = vpop.permute.xlu0 %2531 }
 0x356   : > { %v2543_v19 = vsel %vm907_vm12, %v2542_v57, %v2532_v2 }
 0x35a   : > { %v2536_v25 = vpop.permute.xlu1 %2535 }
 0x35b   : > { %v2544_v51 = vsel %vm909_vm13, %v2543_v19, %v2536_v25 }
 0x35c   : > { %2565 = vmatpush.msra.mxu0 %v2544_v51 }
 0x35d   : > { %2758 = vmatmul.msk.f32.vlgmr.msra.gmra.mxu0 %vm1093_vm14, %v2757_v38 }
 0x381   : > { %v1137_v12 = vpop.f32.mrf.mxu1 }
 0x38b   : > { %v1114_v29 = vpop.f32.mrf.mxu0 }
 0x38c   : > { %v1138_v13 = vadd.f32 %v1137_v12, %v1114_v29 }
 0x3a7   : > { %v1349_v37 = vpop.f32.mrf.mxu2  ;;  %v1532_v54 = vpop.f32.mrf.mxu3 }
 0x3a8   : > { %v1352_v23 = vadd.f32 %v1349_v37, %v1138_v13 }
 0x3aa   : > { %v1535_v45 = vadd.f32 %v1532_v54, %v1352_v23 }
 0x3bf   : > { %v1745_v50 = vpop.f32.mrf.mxu0 }
 0x3c0   : > { %v1748_v1 = vadd.f32 %v1745_v50, %v1535_v45 }
 0x3c5   : > { %v2141_v33 = vpop.f32.mrf.mxu2 }
 0x3c7   : > { %v1958_v43 = vpop.f32.mrf.mxu1 }
 0x3c8   : > { %v1961_v3 = vadd.f32 %v1958_v43, %v1748_v1 }
 0x3ca   : > { %v2144_v34 = vadd.f32 %v2141_v33, %v1961_v3 }
 0x3cd   : > { %v2354_v61 = vpop.f32.mrf.mxu3 }
 0x3ce   : > { %v2357_v41 = vadd.f32 %v2354_v61, %v2144_v34 }
 0x3da   : > { %v2567_v10 = vpop.f32.mrf.mxu0 }
 0x3db   : > { %v2570_v5 = vadd.f32 %v2567_v10, %v2357_v41 }
 0x3dd   : > { %v2572_v56 = vadd.f32 %v2571_v24, %v2570_v5 }
 0x3df   : > { %2573 = vst [vmem:[%s329_s10] sm:$0xff] %v2572_v56 }
 0x3e0 PF: > { %s17_s28 = sadd.s32 1, %s3082_s28   ;;  %s4767_s24 = smov %s3074_s26 }
 0x3e1   : > { %p14_p7 = scmp.ge.s32.totalorder %s17_s28, 6   ;;  %s4768_s25 = smov %s3078_s27 }
 0x3e2   : > { %s4769_s26 = smov %s4772_s29  ;;  %s4770_s27 = smov %s4776_s30 }
 0x3e3   :  { %16 = sbr.rel (!%p14_p7) target bundleno = 3 (0x3), region = 92 }

</bundles_post_ra>
